<compile_context>
chip_gen: v5e
topology: v5e:2x2
jax: 0.10.0
libtpu: 0.0.40
codegen_flags: <defaults>
</compile_context>

<pallas_src>
import functools

import jax
import jax.numpy as jnp
from jax.experimental import pallas as pl
from jax.experimental.pallas import tpu as pltpu


# ---------------------------------------------------------------------------
# Fused kernel.  Grid = (2, nc):
#   axis 0 (p): phase (0 = conv/x_proj, 1 = ssm/out_proj)   -- "arbitrary"
#   axis 1 (c): d_inner chunk of width t                    -- "arbitrary"
# ---------------------------------------------------------------------------
def fused_mamba_kernel(
    # inputs
    x_ref,            # (B, d_model)        f32   resident
    w_in_ssm_ref,     # (d_model, t)        bf16  in_proj ssm half  (phase-0 stream)
    conv_w_ref,       # (4, t)              f32   conv taps (unreplicated)
    conv_b_ref,       # (1, t)              f32
    conv_states_ref,  # (4, B, t)           f32   rolling conv state chunk
    w_xproj_ref,      # (t, Rp)             bf16  fused x_proj (dt|B|C), lane-padded
    w_dtp_ref,        # (dt_rank, t)        bf16  dt_proj chunk      (phase-1 stream)
    b_dtp_ref,        # (1, t)              f32
    A_ref,            # (d_state, t)        f32   d_inner on lanes
    D_ref,            # (1, t)              f32
    ssm_state_ref,    # (B, d_state, t)     f32   hidden state chunk
    w_in_mlp_ref,     # (d_model, t)        bf16  in_proj mlp half
    w_out_ref,        # (t, d_model)        bf16  out_proj chunk
    # outputs
    out_ref,          # (B, d_model)        f32   accumulator (constant block)
    new_cs_ref,       # (4, B, t)           f32   aliased with conv_states
    new_ssm_ref,      # (B, d_state, t)     f32   aliased with ssm_state
    # scratch (persist across the whole grid)
    x_bf_sc,          # (B, d_model)        bf16  x cast once
    xc_sc,            # (nc, B, t)          f32   conv+silu activations
    dtBC_sc,          # (B, Rp)             f32   fused x_proj accumulator
    dt0_sc,           # (B, dt_rank)        f32   unpacked once
    BmT_sc,           # (B, d_state, 1)     f32   unpacked once (sublane layout)
    CmT_sc,           # (B, d_state, 1)     f32
    *, dt_rank, d_state):
  p = pl.program_id(0)
  c = pl.program_id(1)

  @pl.when((p == 0) & (c == 0))
  def _init():
    x_bf_sc[...] = x_ref[...].astype(jnp.bfloat16)
    dtBC_sc[...] = jnp.zeros_like(dtBC_sc)
    out_ref[...] = jnp.zeros_like(out_ref)

  # ---- phase 0: in_proj(ssm) + rolling conv + silu + fused x_proj ----------
  @pl.when(p == 0)
  def _phase0():
    x_in = jnp.dot(x_bf_sc[...], w_in_ssm_ref[...],
                   preferred_element_type=jnp.float32)            # (B, t)

    cs = conv_states_ref[...]                                     # (4, B, t)
    # rolling shift: read old state fully BEFORE writing the aliased output.
    new_cs_ref[0] = cs[1]
    new_cs_ref[1] = cs[2]
    new_cs_ref[2] = cs[3]
    new_cs_ref[3] = x_in

    conv_w = conv_w_ref[...]                                      # (4, t)
    xc = (cs[1] * conv_w[0:1, :] +
          cs[2] * conv_w[1:2, :] +
          cs[3] * conv_w[2:3, :] +
          x_in * conv_w[3:4, :] +
          conv_b_ref[...])                                        # (B, t)
    xc = xc * jax.nn.sigmoid(xc)                                  # silu
    xc_sc[c] = xc

    dtBC_sc[...] += jnp.dot(xc.astype(jnp.bfloat16), w_xproj_ref[...],
                            preferred_element_type=jnp.float32)   # (B, Rp)

  # ---- phase 1: dt_proj + SSM step + gated residual + out_proj -------------
  @pl.when(p == 1)
  def _phase1():
    @pl.when(c == 0)
    def _unpack_once():
      dtBC = dtBC_sc[...]
      dt0_sc[...] = dtBC[:, :dt_rank]
      BmT_sc[...] = dtBC[:, dt_rank:dt_rank + d_state][:, :, None]
      CmT_sc[...] = dtBC[:, dt_rank + d_state:dt_rank + 2 * d_state][:, :, None]

    dt1 = jnp.dot(dt0_sc[...].astype(jnp.bfloat16), w_dtp_ref[...],
                  preferred_element_type=jnp.float32) + b_dtp_ref[...]  # (B, t)
    # numerically-stable softplus
    delta = jnp.where(dt1 > 20.0, dt1,
                      jnp.log1p(jnp.exp(jnp.minimum(dt1, 20.0))))

    xc = xc_sc[c]                                                 # (B, t)
    A = A_ref[...]                                                # (d_state, t)
    h = ssm_state_ref[...]                                        # (B, d_state, t)

    dA = jnp.exp(delta[:, None, :] * A[None, :, :])               # (B, d_state, t)
    dBx = (delta * xc)[:, None, :] * BmT_sc[...]                  # (B, d_state, t)
    h_new = dA * h + dBx
    new_ssm_ref[...] = h_new

    y = jnp.sum(h_new * CmT_sc[...], axis=1) + xc * D_ref[...]    # (B, t)

    res = jnp.dot(x_bf_sc[...], w_in_mlp_ref[...],
                  preferred_element_type=jnp.float32)             # (B, t)
    res = res * jax.nn.sigmoid(res)                               # silu
    gated = y * res

    out_ref[...] += jnp.dot(gated.astype(jnp.bfloat16), w_out_ref[...],
                            preferred_element_type=jnp.float32)   # (B, d_model)


# ---------------------------------------------------------------------------
# Wrapper
# ---------------------------------------------------------------------------
@functools.partial(jax.jit, static_argnames=("t_inner",))
def mamba_block(x, params, conv_states, ssm_state, *, t_inner=512):
  B, d_model = x.shape
  d_inner = params["w_in_ssm"].shape[1]
  d_state = params["A"].shape[0]
  dt_rank = params["w_dtp"].shape[0]
  Rp = params["w_xproj"].shape[1]            # lane-padded dt_rank + 2*d_state
  t = min(t_inner, d_inner)
  assert d_inner % t == 0
  nc = d_inner // t

  # phase-aware chunk maps: keep block indices constant across the phase
  # boundary so the pipeline never re-fetches a block it already holds.
  def s1(p, c):                              # phase-0 streamed operands
    return c * (1 - p) + (nc - 1) * p

  def s2(p, c):                              # phase-1 streamed operands
    return c * p

  cp = pltpu.CompilerParams(
      dimension_semantics=("arbitrary", "arbitrary"),
      vmem_limit_bytes=40 << 20)             # v7x-safe (64 MiB physical VMEM)

  out, new_conv_states, new_ssm_state = pl.pallas_call(
      functools.partial(fused_mamba_kernel, dt_rank=dt_rank, d_state=d_state),
      grid=(2, nc),
      in_specs=[
          pl.BlockSpec((B, d_model), lambda p, c: (0, 0)),                 # x
          pl.BlockSpec((d_model, t), lambda p, c: (0, s1(p, c))),          # w_in_ssm
          pl.BlockSpec((4, t), lambda p, c: (0, s1(p, c))),                # conv_w
          pl.BlockSpec((1, t), lambda p, c: (0, s1(p, c))),                # conv_b
          pl.BlockSpec((4, B, t), lambda p, c: (0, 0, s1(p, c))),          # conv_states
          pl.BlockSpec((t, Rp), lambda p, c: (s1(p, c), 0)),               # w_xproj
          pl.BlockSpec((dt_rank, t), lambda p, c: (0, s2(p, c))),          # w_dtp
          pl.BlockSpec((1, t), lambda p, c: (0, s2(p, c))),                # b_dtp
          pl.BlockSpec((d_state, t), lambda p, c: (0, s2(p, c))),          # A
          pl.BlockSpec((1, t), lambda p, c: (0, s2(p, c))),                # D
          pl.BlockSpec((B, d_state, t), lambda p, c: (0, 0, s2(p, c))),    # ssm_state
          pl.BlockSpec((d_model, t), lambda p, c: (0, s2(p, c))),          # w_in_mlp
          pl.BlockSpec((t, d_model), lambda p, c: (s2(p, c), 0)),          # w_out
      ],
      out_specs=(
          pl.BlockSpec((B, d_model), lambda p, c: (0, 0)),                 # out
          pl.BlockSpec((4, B, t), lambda p, c: (0, 0, s1(p, c))),          # new conv state
          pl.BlockSpec((B, d_state, t), lambda p, c: (0, 0, s2(p, c))),    # new ssm state
      ),
      out_shape=(
          jax.ShapeDtypeStruct((B, d_model), jnp.float32),
          jax.ShapeDtypeStruct((4, B, d_inner), jnp.float32),
          jax.ShapeDtypeStruct((B, d_state, d_inner), jnp.float32),
      ),
      scratch_shapes=[
          pltpu.VMEM((B, d_model), jnp.bfloat16),        # x_bf
          pltpu.VMEM((nc, B, t), jnp.float32),           # xc
          pltpu.VMEM((B, Rp), jnp.float32),              # dtBC
          pltpu.VMEM((B, dt_rank), jnp.float32),         # dt0
          pltpu.VMEM((B, d_state, 1), jnp.float32),      # Bm (sublane layout)
          pltpu.VMEM((B, d_state, 1), jnp.float32),      # Cm (sublane layout)
      ],
      input_output_aliases={4: 1, 10: 2},                # conv_states, ssm_state
      compiler_params=cp,
  )(x, params["w_in_ssm"], params["conv_w"], params["conv_b"], conv_states,
    params["w_xproj"], params["w_dtp"], params["b_dtp"], params["A"],
    params["D"], ssm_state, params["w_in_mlp"], params["w_out"])

  return out, new_conv_states, new_ssm_state


# ---------------------------------------------------------------------------
# Pure-JAX reference mirroring the kernel math (same bf16 cast points).
# ---------------------------------------------------------------------------
def mamba_block_ref(x, p, conv_states, ssm_state):
  bf16, f32 = jnp.bfloat16, jnp.float32
  dt_rank = p["w_dtp"].shape[0]
  d_state = p["A"].shape[0]

  x_bf = x.astype(bf16)
  x_in = jnp.dot(x_bf, p["w_in_ssm"], preferred_element_type=f32)
  new_cs = jnp.concatenate([conv_states[1:], x_in[None]], axis=0)
  xc = jnp.sum(p["conv_w"][:, None, :] * new_cs, axis=0) + p["conv_b"]
  xc = xc * jax.nn.sigmoid(xc)

  dtBC = jnp.dot(xc.astype(bf16), p["w_xproj"], preferred_element_type=f32)
  dt0 = dtBC[:, :dt_rank]
  Bm = dtBC[:, dt_rank:dt_rank + d_state]
  Cm = dtBC[:, dt_rank + d_state:dt_rank + 2 * d_state]

  dt1 = jnp.dot(dt0.astype(bf16), p["w_dtp"],
                preferred_element_type=f32) + p["b_dtp"]
  delta = jnp.where(dt1 > 20.0, dt1, jnp.log1p(jnp.exp(jnp.minimum(dt1, 20.0))))

  dA = jnp.exp(delta[:, None, :] * p["A"][None, :, :])
  h_new = dA * ssm_state + (delta * xc)[:, None, :] * Bm[:, :, None]
  y = jnp.sum(h_new * Cm[:, :, None], axis=1) + xc * p["D"]

  res = jnp.dot(x_bf, p["w_in_mlp"], preferred_element_type=f32)
  res = res * jax.nn.sigmoid(res)
  out = jnp.dot((y * res).astype(bf16), p["w_out"], preferred_element_type=f32)
  return out, new_cs, h_new


# ---------------------------------------------------------------------------
# Deterministic synthetic parameters (shapes per ModelArgs relations).
# ---------------------------------------------------------------------------
def make_params(key, d_model, d_inner, d_state, dt_rank):
  ks = jax.random.split(key, 10)
  n = jax.random.normal
  bf16, f32 = jnp.bfloat16, jnp.float32

  w_in_ssm = (n(ks[0], (d_model, d_inner), f32) / d_model**0.5).astype(bf16)
  w_in_mlp = (n(ks[1], (d_model, d_inner), f32) / d_model**0.5).astype(bf16)
  w_out = (n(ks[2], (d_inner, d_model), f32) / d_inner**0.5).astype(bf16)

  # depthwise conv taps & bias, unreplicated (broadcast over users in-kernel)
  conv_w = n(ks[3], (4, d_inner), f32) * 0.5
  conv_b = n(ks[4], (1, d_inner), f32) * 0.1

  # fused x_proj = concat(w_dt_x, w_B, w_C), lane-padded to a multiple of 128
  w_dtx = n(ks[5], (d_inner, dt_rank), f32) / d_inner**0.5
  w_B = n(ks[6], (d_inner, d_state), f32) / d_inner**0.5
  w_C = n(ks[7], (d_inner, d_state), f32) / d_inner**0.5
  w_xproj = jnp.concatenate([w_dtx, w_B, w_C], axis=1)
  R = dt_rank + 2 * d_state
  Rp = ((R + 127) // 128) * 128
  w_xproj = jnp.pad(w_xproj, ((0, 0), (0, Rp - R))).astype(bf16)

  w_dtp = (n(ks[8], (dt_rank, d_inner), f32) / dt_rank**0.5).astype(bf16)
  b_dtp = n(ks[9], (1, d_inner), f32) * 0.1

  # standard Mamba A init, stored as (d_state, d_inner): d_inner on lanes
  A = -jnp.broadcast_to(
      jnp.arange(1, d_state + 1, dtype=f32)[:, None], (d_state, d_inner))
  D = jnp.ones((1, d_inner), f32)

  return dict(w_in_ssm=w_in_ssm, w_in_mlp=w_in_mlp, w_out=w_out,
              conv_w=conv_w, conv_b=conv_b, w_xproj=w_xproj,
              w_dtp=w_dtp, b_dtp=b_dtp, A=A, D=D)


if __name__ == "__main__":
  # Small, TPU-friendly sizes consistent with Mamba's shape relations:
  # d_inner = 2*d_model, d_state = 16, dt_rank = ceil(d_model/16).
  # d_model is a multiple of 128 -> lane-dense output stores.
  batch, d_model = 32, 128
  d_inner, d_state, dt_rank = 2 * d_model, 16, max(1, d_model // 16)

  key = jax.random.PRNGKey(0)
  k_x, k_p, k_c, k_s = jax.random.split(key, 4)

  x = jax.random.normal(k_x, (batch, d_model), jnp.float32)
  params = make_params(k_p, d_model, d_inner, d_state, dt_rank)
  conv_states = 0.1 * jax.random.normal(k_c, (4, batch, d_inner), jnp.float32)
  ssm_state = 0.1 * jax.random.normal(
      k_s, (batch, d_state, d_inner), jnp.float32)

  # t_inner=128 in the demo so nc=2 exercises the chunked accumulation path;
  # production default is 512.
  out, new_cs, new_h = mamba_block(x, params, conv_states, ssm_state,
                                   t_inner=128)
  jax.block_until_ready(out)

  out_r, new_cs_r, new_h_r = mamba_block_ref(x, params, conv_states, ssm_state)
  assert jnp.allclose(out, out_r, rtol=1e-2, atol=1e-2), "output mismatch"
  assert jnp.allclose(new_cs, new_cs_r, rtol=1e-2, atol=1e-2), "conv state mismatch"
  assert jnp.allclose(new_h, new_h_r, rtol=1e-2, atol=1e-2), "ssm state mismatch"

  print("KERNEL_OK")
</pallas_src>

<mosaic_0001>
module attributes {stable_mosaic.version = 11 : i64} {
  func.func @fused_mamba_kernel(%arg0: i32, %arg1: i32, %arg2: memref<32x128xf32, #tpu.memory_space<vmem>>, %arg3: memref<128x128xbf16, #tpu.memory_space<vmem>>, %arg4: memref<4x128xf32, #tpu.memory_space<vmem>>, %arg5: memref<1x128xf32, #tpu.memory_space<vmem>>, %arg6: memref<4x32x128xf32, #tpu.memory_space<vmem>>, %arg7: memref<128x128xbf16, #tpu.memory_space<vmem>>, %arg8: memref<8x128xbf16, #tpu.memory_space<vmem>>, %arg9: memref<1x128xf32, #tpu.memory_space<vmem>>, %arg10: memref<16x128xf32, #tpu.memory_space<vmem>>, %arg11: memref<1x128xf32, #tpu.memory_space<vmem>>, %arg12: memref<32x16x128xf32, #tpu.memory_space<vmem>>, %arg13: memref<128x128xbf16, #tpu.memory_space<vmem>>, %arg14: memref<128x128xbf16, #tpu.memory_space<vmem>>, %arg15: memref<32x128xf32, #tpu.memory_space<vmem>>, %arg16: memref<4x32x128xf32, #tpu.memory_space<vmem>>, %arg17: memref<32x16x128xf32, #tpu.memory_space<vmem>>, %arg18: memref<32x128xbf16, #tpu.memory_space<vmem>>, %arg19: memref<2x32x128xf32, #tpu.memory_space<vmem>>, %arg20: memref<32x128xf32, #tpu.memory_space<vmem>>, %arg21: memref<32x8xf32, #tpu.memory_space<vmem>>, %arg22: memref<32x16x1xf32, #tpu.memory_space<vmem>>, %arg23: memref<32x16x1xf32, #tpu.memory_space<vmem>>) attributes {dimension_semantics = [#tpu.dimension_semantics<arbitrary>, #tpu.dimension_semantics<arbitrary>], iteration_bounds = array<i64: 2, 2>, scalar_prefetch = 0 : i64, scratch_operands = 6 : i64, tpu.core_type = #tpu.core_type<tc>, window_params = [{pipeline_mode = #tpu.pipeline_mode<synchronous>, transform_indices = @transform_0, window_bounds = array<i64: 32, 128>}, {transform_indices = @transform_1, window_bounds = array<i64: 128, 128>}, {transform_indices = @transform_2, window_bounds = array<i64: 4, 128>}, {transform_indices = @transform_3, window_bounds = array<i64: 1, 128>}, {transform_indices = @transform_4, window_bounds = array<i64: 4, 32, 128>}, {transform_indices = @transform_5, window_bounds = array<i64: 128, 128>}, {transform_indices = @transform_6, window_bounds = array<i64: 8, 128>}, {transform_indices = @transform_7, window_bounds = array<i64: 1, 128>}, {transform_indices = @transform_8, window_bounds = array<i64: 16, 128>}, {transform_indices = @transform_9, window_bounds = array<i64: 1, 128>}, {transform_indices = @transform_10, window_bounds = array<i64: 32, 16, 128>}, {transform_indices = @transform_11, window_bounds = array<i64: 128, 128>}, {transform_indices = @transform_12, window_bounds = array<i64: 128, 128>}, {pipeline_mode = #tpu.pipeline_mode<synchronous>, transform_indices = @transform_13, window_bounds = array<i64: 32, 128>}, {transform_indices = @transform_14, window_bounds = array<i64: 4, 32, 128>}, {transform_indices = @transform_15, window_bounds = array<i64: 32, 16, 128>}]} {
    %c0_i32 = arith.constant 0 : i32
    %0 = arith.cmpi eq, %arg0, %c0_i32 : i32
    %c0_i32_0 = arith.constant 0 : i32
    %1 = arith.cmpi eq, %arg1, %c0_i32_0 : i32
    %2 = arith.andi %0, %1 : i1
    %3 = arith.extui %2 : i1 to i32
    %c0_i32_1 = arith.constant 0 : i32
    %4 = arith.cmpi ne, %3, %c0_i32_1 : i32
    scf.if %4 {
      %c0 = arith.constant 0 : index
      %c0_5 = arith.constant 0 : index
      %11 = vector.load %arg2[%c0, %c0_5] : memref<32x128xf32, #tpu.memory_space<vmem>>, vector<32x128xf32>
      %12 = arith.truncf %11 : vector<32x128xf32> to vector<32x128xbf16>
      %c0_6 = arith.constant 0 : index
      %c0_7 = arith.constant 0 : index
      %13 = vector.load %arg18[%c0_6, %c0_7] : memref<32x128xbf16, #tpu.memory_space<vmem>>, vector<32x128xbf16>
      tpu.vector_store %arg18[%c0_6, %c0_7], %12 {strides = array<i32>} : memref<32x128xbf16, #tpu.memory_space<vmem>>, vector<32x128xbf16>,
      %cst = arith.constant 0.000000e+00 : f32
      %14 = vector.broadcast %cst : f32 to vector<32x128xf32>
      %c0_8 = arith.constant 0 : index
      %c0_9 = arith.constant 0 : index
      %15 = vector.load %arg20[%c0_8, %c0_9] : memref<32x128xf32, #tpu.memory_space<vmem>>, vector<32x128xf32>
      tpu.vector_store %arg20[%c0_8, %c0_9], %14 {strides = array<i32>} : memref<32x128xf32, #tpu.memory_space<vmem>>, vector<32x128xf32>,
      %cst_10 = arith.constant 0.000000e+00 : f32
      %16 = vector.broadcast %cst_10 : f32 to vector<32x128xf32>
      %c0_11 = arith.constant 0 : index
      %c0_12 = arith.constant 0 : index
      %17 = vector.load %arg15[%c0_11, %c0_12] : memref<32x128xf32, #tpu.memory_space<vmem>>, vector<32x128xf32>
      tpu.vector_store %arg15[%c0_11, %c0_12], %16 {strides = array<i32>} : memref<32x128xf32, #tpu.memory_space<vmem>>, vector<32x128xf32>,
    } else {
    }
    %c0_i32_2 = arith.constant 0 : i32
    %5 = arith.cmpi eq, %arg0, %c0_i32_2 : i32
    %6 = arith.extui %5 : i1 to i32
    %c0_i32_3 = arith.constant 0 : i32
    %7 = arith.cmpi ne, %6, %c0_i32_3 : i32
    scf.if %7 {
      %c0 = arith.constant 0 : index
      %c0_5 = arith.constant 0 : index
      %11 = vector.load %arg18[%c0, %c0_5] : memref<32x128xbf16, #tpu.memory_space<vmem>>, vector<32x128xbf16>
      %c0_6 = arith.constant 0 : index
      %c0_7 = arith.constant 0 : index
      %12 = vector.load %arg3[%c0_6, %c0_7] : memref<128x128xbf16, #tpu.memory_space<vmem>>, vector<128x128xbf16>
      %cst = arith.constant dense<0.000000e+00> : vector<32x128xf32>
      %13 = tpu.matmul %11, %12, %cst {dimension_numbers = #tpu.dot_dimension_numbers<[1], [0], [0], [1], [0, 0, 1, 1], [], []>} : vector<32x128xbf16>, vector<128x128xbf16>, vector<32x128xf32> -> vector<32x128xf32>
      %c0_8 = arith.constant 0 : index
      %c0_9 = arith.constant 0 : index
      %c0_10 = arith.constant 0 : index
      %14 = vector.load %arg6[%c0_8, %c0_9, %c0_10] : memref<4x32x128xf32, #tpu.memory_space<vmem>>, vector<4x32x128xf32>
      %15 = vector.extract_strided_slice %14 {offsets = [1, 0, 0], sizes = [1, 32, 128], strides = [1, 1, 1]} : vector<4x32x128xf32> to vector<1x32x128xf32>
      %16 = vector.shape_cast %15 : vector<1x32x128xf32> to vector<32x128xf32>
      %c0_11 = arith.constant 0 : index
      %c0_12 = arith.constant 0 : index
      %c0_13 = arith.constant 0 : index
      %17 = vector.load %arg16[%c0_11, %c0_12, %c0_13] : memref<4x32x128xf32, #tpu.memory_space<vmem>>, vector<1x32x128xf32>
      %18 = vector.shape_cast %17 : vector<1x32x128xf32> to vector<32x128xf32>
      %19 = vector.shape_cast %16 : vector<32x128xf32> to vector<1x32x128xf32>
      tpu.vector_store %arg16[%c0_11, %c0_12, %c0_13], %19 {strides = array<i32>} : memref<4x32x128xf32, #tpu.memory_space<vmem>>, vector<1x32x128xf32>,
      %20 = vector.extract_strided_slice %14 {offsets = [2, 0, 0], sizes = [1, 32, 128], strides = [1, 1, 1]} : vector<4x32x128xf32> to vector<1x32x128xf32>
      %21 = vector.shape_cast %20 : vector<1x32x128xf32> to vector<32x128xf32>
      %c1 = arith.constant 1 : index
      %c0_14 = arith.constant 0 : index
      %c0_15 = arith.constant 0 : index
      %22 = vector.load %arg16[%c1, %c0_14, %c0_15] : memref<4x32x128xf32, #tpu.memory_space<vmem>>, vector<1x32x128xf32>
      %23 = vector.shape_cast %22 : vector<1x32x128xf32> to vector<32x128xf32>
      %24 = vector.shape_cast %21 : vector<32x128xf32> to vector<1x32x128xf32>
      tpu.vector_store %arg16[%c1, %c0_14, %c0_15], %24 {strides = array<i32>} : memref<4x32x128xf32, #tpu.memory_space<vmem>>, vector<1x32x128xf32>,
      %25 = vector.extract_strided_slice %14 {offsets = [3, 0, 0], sizes = [1, 32, 128], strides = [1, 1, 1]} : vector<4x32x128xf32> to vector<1x32x128xf32>
      %26 = vector.shape_cast %25 : vector<1x32x128xf32> to vector<32x128xf32>
      %c2 = arith.constant 2 : index
      %c0_16 = arith.constant 0 : index
      %c0_17 = arith.constant 0 : index
      %27 = vector.load %arg16[%c2, %c0_16, %c0_17] : memref<4x32x128xf32, #tpu.memory_space<vmem>>, vector<1x32x128xf32>
      %28 = vector.shape_cast %27 : vector<1x32x128xf32> to vector<32x128xf32>
      %29 = vector.shape_cast %26 : vector<32x128xf32> to vector<1x32x128xf32>
      tpu.vector_store %arg16[%c2, %c0_16, %c0_17], %29 {strides = array<i32>} : memref<4x32x128xf32, #tpu.memory_space<vmem>>, vector<1x32x128xf32>,
      %c3 = arith.constant 3 : index
      %c0_18 = arith.constant 0 : index
      %c0_19 = arith.constant 0 : index
      %30 = vector.load %arg16[%c3, %c0_18, %c0_19] : memref<4x32x128xf32, #tpu.memory_space<vmem>>, vector<1x32x128xf32>
      %31 = vector.shape_cast %30 : vector<1x32x128xf32> to vector<32x128xf32>
      %32 = vector.shape_cast %13 : vector<32x128xf32> to vector<1x32x128xf32>
      tpu.vector_store %arg16[%c3, %c0_18, %c0_19], %32 {strides = array<i32>} : memref<4x32x128xf32, #tpu.memory_space<vmem>>, vector<1x32x128xf32>,
      %c0_20 = arith.constant 0 : index
      %c0_21 = arith.constant 0 : index
      %33 = vector.load %arg4[%c0_20, %c0_21] : memref<4x128xf32, #tpu.memory_space<vmem>>, vector<4x128xf32>
      %34 = vector.extract_strided_slice %14 {offsets = [1, 0, 0], sizes = [1, 32, 128], strides = [1, 1, 1]} : vector<4x32x128xf32> to vector<1x32x128xf32>
      %35 = vector.shape_cast %34 : vector<1x32x128xf32> to vector<32x128xf32>
      %36 = vector.extract_strided_slice %33 {offsets = [0, 0], sizes = [1, 128], strides = [1, 1]} : vector<4x128xf32> to vector<1x128xf32>
      %37 = vector.broadcast %36 : vector<1x128xf32> to vector<32x128xf32>
      %38 = arith.mulf %35, %37 : vector<32x128xf32>
      %39 = vector.extract_strided_slice %14 {offsets = [2, 0, 0], sizes = [1, 32, 128], strides = [1, 1, 1]} : vector<4x32x128xf32> to vector<1x32x128xf32>
      %40 = vector.shape_cast %39 : vector<1x32x128xf32> to vector<32x128xf32>
      %41 = vector.extract_strided_slice %33 {offsets = [1, 0], sizes = [1, 128], strides = [1, 1]} : vector<4x128xf32> to vector<1x128xf32>
      %42 = vector.broadcast %41 : vector<1x128xf32> to vector<32x128xf32>
      %43 = arith.mulf %40, %42 : vector<32x128xf32>
      %44 = arith.addf %38, %43 : vector<32x128xf32>
      %45 = vector.extract_strided_slice %14 {offsets = [3, 0, 0], sizes = [1, 32, 128], strides = [1, 1, 1]} : vector<4x32x128xf32> to vector<1x32x128xf32>
      %46 = vector.shape_cast %45 : vector<1x32x128xf32> to vector<32x128xf32>
      %47 = vector.extract_strided_slice %33 {offsets = [2, 0], sizes = [1, 128], strides = [1, 1]} : vector<4x128xf32> to vector<1x128xf32>
      %48 = vector.broadcast %47 : vector<1x128xf32> to vector<32x128xf32>
      %49 = arith.mulf %46, %48 : vector<32x128xf32>
      %50 = arith.addf %44, %49 : vector<32x128xf32>
      %51 = vector.extract_strided_slice %33 {offsets = [3, 0], sizes = [1, 128], strides = [1, 1]} : vector<4x128xf32> to vector<1x128xf32>
      %52 = vector.broadcast %51 : vector<1x128xf32> to vector<32x128xf32>
      %53 = arith.mulf %13, %52 : vector<32x128xf32>
      %54 = arith.addf %50, %53 : vector<32x128xf32>
      %c0_22 = arith.constant 0 : index
      %c0_23 = arith.constant 0 : index
      %55 = vector.load %arg5[%c0_22, %c0_23] : memref<1x128xf32, #tpu.memory_space<vmem>>, vector<1x128xf32>
      %56 = vector.broadcast %55 : vector<1x128xf32> to vector<32x128xf32>
      %57 = arith.addf %54, %56 : vector<32x128xf32>
      %58 = arith.negf %57 : vector<32x128xf32>
      %59 = math.exp %58 : vector<32x128xf32>
      %cst_24 = arith.constant 1.000000e+00 : f32
      %60 = vector.broadcast %cst_24 : f32 to vector<32x128xf32>
      %61 = arith.addf %60, %59 : vector<32x128xf32>
      %62 = arith.divf %60, %61 : vector<32x128xf32>
      %63 = arith.mulf %57, %62 : vector<32x128xf32>
      %64 = arith.index_cast %arg1 : i32 to index
      %c0_25 = arith.constant 0 : index
      %c0_26 = arith.constant 0 : index
      %65 = vector.load %arg19[%64, %c0_25, %c0_26] : memref<2x32x128xf32, #tpu.memory_space<vmem>>, vector<1x32x128xf32>
      %66 = vector.shape_cast %65 : vector<1x32x128xf32> to vector<32x128xf32>
      %67 = vector.shape_cast %63 : vector<32x128xf32> to vector<1x32x128xf32>
      tpu.vector_store %arg19[%64, %c0_25, %c0_26], %67 {strides = array<i32>} : memref<2x32x128xf32, #tpu.memory_space<vmem>>, vector<1x32x128xf32>,
      %c0_27 = arith.constant 0 : index
      %c0_28 = arith.constant 0 : index
      %68 = vector.load %arg20[%c0_27, %c0_28] : memref<32x128xf32, #tpu.memory_space<vmem>>, vector<32x128xf32>
      %69 = arith.truncf %63 : vector<32x128xf32> to vector<32x128xbf16>
      %c0_29 = arith.constant 0 : index
      %c0_30 = arith.constant 0 : index
      %70 = vector.load %arg7[%c0_29, %c0_30] : memref<128x128xbf16, #tpu.memory_space<vmem>>, vector<128x128xbf16>
      %cst_31 = arith.constant dense<0.000000e+00> : vector<32x128xf32>
      %71 = tpu.matmul %69, %70, %cst_31 {dimension_numbers = #tpu.dot_dimension_numbers<[1], [0], [0], [1], [0, 0, 1, 1], [], []>} : vector<32x128xbf16>, vector<128x128xbf16>, vector<32x128xf32> -> vector<32x128xf32>
      %72 = arith.addf %68, %71 : vector<32x128xf32>
      %c0_32 = arith.constant 0 : index
      %c0_33 = arith.constant 0 : index
      %73 = vector.load %arg20[%c0_32, %c0_33] : memref<32x128xf32, #tpu.memory_space<vmem>>, vector<32x128xf32>
      tpu.vector_store %arg20[%c0_32, %c0_33], %72 {strides = array<i32>} : memref<32x128xf32, #tpu.memory_space<vmem>>, vector<32x128xf32>,
    } else {
    }
    %c1_i32 = arith.constant 1 : i32
    %8 = arith.cmpi eq, %arg0, %c1_i32 : i32
    %9 = arith.extui %8 : i1 to i32
    %c0_i32_4 = arith.constant 0 : i32
    %10 = arith.cmpi ne, %9, %c0_i32_4 : i32
    scf.if %10 {
      %c0_i32_5 = arith.constant 0 : i32
      %11 = arith.cmpi eq, %arg1, %c0_i32_5 : i32
      %12 = arith.extui %11 : i1 to i32
      %c0_i32_6 = arith.constant 0 : i32
      %13 = arith.cmpi ne, %12, %c0_i32_6 : i32
      scf.if %13 {
        %c0_46 = arith.constant 0 : index
        %c0_47 = arith.constant 0 : index
        %72 = vector.load %arg20[%c0_46, %c0_47] : memref<32x128xf32, #tpu.memory_space<vmem>>, vector<32x128xf32>
        %73 = vector.extract_strided_slice %72 {offsets = [0, 0], sizes = [32, 8], strides = [1, 1]} : vector<32x128xf32> to vector<32x8xf32>
        %c0_48 = arith.constant 0 : index
        %c0_49 = arith.constant 0 : index
        %74 = vector.load %arg21[%c0_48, %c0_49] : memref<32x8xf32, #tpu.memory_space<vmem>>, vector<32x8xf32>
        tpu.vector_store %arg21[%c0_48, %c0_49], %73 {strides = array<i32>} : memref<32x8xf32, #tpu.memory_space<vmem>>, vector<32x8xf32>,
        %75 = vector.extract_strided_slice %72 {offsets = [0, 8], sizes = [32, 16], strides = [1, 1]} : vector<32x128xf32> to vector<32x16xf32>
        %76 = vector.shape_cast %75 : vector<32x16xf32> to vector<32x16x1xf32>
        %c0_50 = arith.constant 0 : index
        %c0_51 = arith.constant 0 : index
        %c0_52 = arith.constant 0 : index
        %77 = vector.load %arg22[%c0_50, %c0_51, %c0_52] : memref<32x16x1xf32, #tpu.memory_space<vmem>>, vector<32x16x1xf32>
        tpu.vector_store %arg22[%c0_50, %c0_51, %c0_52], %76 {strides = array<i32>} : memref<32x16x1xf32, #tpu.memory_space<vmem>>, vector<32x16x1xf32>,
        %78 = vector.extract_strided_slice %72 {offsets = [0, 24], sizes = [32, 16], strides = [1, 1]} : vector<32x128xf32> to vector<32x16xf32>
        %79 = vector.shape_cast %78 : vector<32x16xf32> to vector<32x16x1xf32>
        %c0_53 = arith.constant 0 : index
        %c0_54 = arith.constant 0 : index
        %c0_55 = arith.constant 0 : index
        %80 = vector.load %arg23[%c0_53, %c0_54, %c0_55] : memref<32x16x1xf32, #tpu.memory_space<vmem>>, vector<32x16x1xf32>
        tpu.vector_store %arg23[%c0_53, %c0_54, %c0_55], %79 {strides = array<i32>} : memref<32x16x1xf32, #tpu.memory_space<vmem>>, vector<32x16x1xf32>,
      } else {
      }
      %c0 = arith.constant 0 : index
      %c0_7 = arith.constant 0 : index
      %14 = vector.load %arg21[%c0, %c0_7] : memref<32x8xf32, #tpu.memory_space<vmem>>, vector<32x8xf32>
      %15 = arith.truncf %14 : vector<32x8xf32> to vector<32x8xbf16>
      %c0_8 = arith.constant 0 : index
      %c0_9 = arith.constant 0 : index
      %16 = vector.load %arg8[%c0_8, %c0_9] : memref<8x128xbf16, #tpu.memory_space<vmem>>, vector<8x128xbf16>
      %cst = arith.constant dense<0.000000e+00> : vector<32x128xf32>
      %17 = tpu.matmul %15, %16, %cst {dimension_numbers = #tpu.dot_dimension_numbers<[1], [0], [0], [1], [0, 0, 1, 1], [], []>} : vector<32x8xbf16>, vector<8x128xbf16>, vector<32x128xf32> -> vector<32x128xf32>
      %c0_10 = arith.constant 0 : index
      %c0_11 = arith.constant 0 : index
      %18 = vector.load %arg9[%c0_10, %c0_11] : memref<1x128xf32, #tpu.memory_space<vmem>>, vector<1x128xf32>
      %19 = vector.broadcast %18 : vector<1x128xf32> to vector<32x128xf32>
      %20 = arith.addf %17, %19 : vector<32x128xf32>
      %cst_12 = arith.constant 2.000000e+01 : f32
      %21 = vector.broadcast %cst_12 : f32 to vector<32x128xf32>
      %22 = arith.cmpf ogt, %20, %21 : vector<32x128xf32>
      %cst_13 = arith.constant 2.000000e+01 : f32
      %23 = vector.broadcast %cst_13 : f32 to vector<32x128xf32>
      %24 = arith.minimumf %20, %23 : vector<32x128xf32>
      %25 = math.exp %24 : vector<32x128xf32>
      %26 = math.log1p %25 : vector<32x128xf32>
      %27 = arith.select %22, %20, %26 : vector<32x128xi1>, vector<32x128xf32>
      %28 = arith.index_cast %arg1 : i32 to index
      %c0_14 = arith.constant 0 : index
      %c0_15 = arith.constant 0 : index
      %29 = vector.load %arg19[%28, %c0_14, %c0_15] : memref<2x32x128xf32, #tpu.memory_space<vmem>>, vector<1x32x128xf32>
      %30 = vector.shape_cast %29 : vector<1x32x128xf32> to vector<32x128xf32>
      %c0_16 = arith.constant 0 : index
      %c0_17 = arith.constant 0 : index
      %31 = vector.load %arg10[%c0_16, %c0_17] : memref<16x128xf32, #tpu.memory_space<vmem>>, vector<16x128xf32>
      %c0_18 = arith.constant 0 : index
      %c0_19 = arith.constant 0 : index
      %c0_20 = arith.constant 0 : index
      %32 = vector.load %arg12[%c0_18, %c0_19, %c0_20] : memref<32x16x128xf32, #tpu.memory_space<vmem>>, vector<32x16x128xf32>
      %33 = vector.shape_cast %27 : vector<32x128xf32> to vector<32x1x128xf32>
      %34 = vector.shape_cast %31 : vector<16x128xf32> to vector<1x16x128xf32>
      %35 = vector.broadcast %33 : vector<32x1x128xf32> to vector<32x16x128xf32>
      %36 = vector.broadcast %34 : vector<1x16x128xf32> to vector<32x16x128xf32>
      %37 = arith.mulf %35, %36 : vector<32x16x128xf32>
      %38 = math.exp %37 : vector<32x16x128xf32>
      %39 = arith.mulf %27, %30 : vector<32x128xf32>
      %40 = vector.shape_cast %39 : vector<32x128xf32> to vector<32x1x128xf32>
      %c0_21 = arith.constant 0 : index
      %c0_22 = arith.constant 0 : index
      %c0_23 = arith.constant 0 : index
      %41 = vector.load %arg22[%c0_21, %c0_22, %c0_23] : memref<32x16x1xf32, #tpu.memory_space<vmem>>, vector<32x16x1xf32>
      %42 = vector.broadcast %40 : vector<32x1x128xf32> to vector<32x16x128xf32>
      %43 = vector.broadcast %41 : vector<32x16x1xf32> to vector<32x16x128xf32>
      %44 = arith.mulf %42, %43 : vector<32x16x128xf32>
      %45 = arith.mulf %38, %32 : vector<32x16x128xf32>
      %46 = arith.addf %45, %44 : vector<32x16x128xf32>
      %c0_24 = arith.constant 0 : index
      %c0_25 = arith.constant 0 : index
      %c0_26 = arith.constant 0 : index
      %47 = vector.load %arg17[%c0_24, %c0_25, %c0_26] : memref<32x16x128xf32, #tpu.memory_space<vmem>>, vector<32x16x128xf32>
      tpu.vector_store %arg17[%c0_24, %c0_25, %c0_26], %46 {strides = array<i32>} : memref<32x16x128xf32, #tpu.memory_space<vmem>>, vector<32x16x128xf32>,
      %c0_27 = arith.constant 0 : index
      %c0_28 = arith.constant 0 : index
      %c0_29 = arith.constant 0 : index
      %48 = vector.load %arg23[%c0_27, %c0_28, %c0_29] : memref<32x16x1xf32, #tpu.memory_space<vmem>>, vector<32x16x1xf32>
      %49 = vector.broadcast %48 : vector<32x16x1xf32> to vector<32x16x128xf32>
      %50 = arith.mulf %46, %49 : vector<32x16x128xf32>
      %cst_30 = arith.constant dense<0.000000e+00> : vector<32x128xf32>
      %51 = vector.multi_reduction <add>, %50, %cst_30 [1] : vector<32x16x128xf32> to vector<32x128xf32>
      %c0_31 = arith.constant 0 : index
      %c0_32 = arith.constant 0 : index
      %52 = vector.load %arg11[%c0_31, %c0_32] : memref<1x128xf32, #tpu.memory_space<vmem>>, vector<1x128xf32>
      %53 = vector.broadcast %52 : vector<1x128xf32> to vector<32x128xf32>
      %54 = arith.mulf %30, %53 : vector<32x128xf32>
      %55 = arith.addf %51, %54 : vector<32x128xf32>
      %c0_33 = arith.constant 0 : index
      %c0_34 = arith.constant 0 : index
      %56 = vector.load %arg18[%c0_33, %c0_34] : memref<32x128xbf16, #tpu.memory_space<vmem>>, vector<32x128xbf16>
      %c0_35 = arith.constant 0 : index
      %c0_36 = arith.constant 0 : index
      %57 = vector.load %arg13[%c0_35, %c0_36] : memref<128x128xbf16, #tpu.memory_space<vmem>>, vector<128x128xbf16>
      %cst_37 = arith.constant dense<0.000000e+00> : vector<32x128xf32>
      %58 = tpu.matmul %56, %57, %cst_37 {dimension_numbers = #tpu.dot_dimension_numbers<[1], [0], [0], [1], [0, 0, 1, 1], [], []>} : vector<32x128xbf16>, vector<128x128xbf16>, vector<32x128xf32> -> vector<32x128xf32>
      %59 = arith.negf %58 : vector<32x128xf32>
      %60 = math.exp %59 : vector<32x128xf32>
      %cst_38 = arith.constant 1.000000e+00 : f32
      %61 = vector.broadcast %cst_38 : f32 to vector<32x128xf32>
      %62 = arith.addf %61, %60 : vector<32x128xf32>
      %63 = arith.divf %61, %62 : vector<32x128xf32>
      %64 = arith.mulf %58, %63 : vector<32x128xf32>
      %65 = arith.mulf %55, %64 : vector<32x128xf32>
      %c0_39 = arith.constant 0 : index
      %c0_40 = arith.constant 0 : index
      %66 = vector.load %arg15[%c0_39, %c0_40] : memref<32x128xf32, #tpu.memory_space<vmem>>, vector<32x128xf32>
      %67 = arith.truncf %65 : vector<32x128xf32> to vector<32x128xbf16>
      %c0_41 = arith.constant 0 : index
      %c0_42 = arith.constant 0 : index
      %68 = vector.load %arg14[%c0_41, %c0_42] : memref<128x128xbf16, #tpu.memory_space<vmem>>, vector<128x128xbf16>
      %cst_43 = arith.constant dense<0.000000e+00> : vector<32x128xf32>
      %69 = tpu.matmul %67, %68, %cst_43 {dimension_numbers = #tpu.dot_dimension_numbers<[1], [0], [0], [1], [0, 0, 1, 1], [], []>} : vector<32x128xbf16>, vector<128x128xbf16>, vector<32x128xf32> -> vector<32x128xf32>
      %70 = arith.addf %66, %69 : vector<32x128xf32>
      %c0_44 = arith.constant 0 : index
      %c0_45 = arith.constant 0 : index
      %71 = vector.load %arg15[%c0_44, %c0_45] : memref<32x128xf32, #tpu.memory_space<vmem>>, vector<32x128xf32>
      tpu.vector_store %arg15[%c0_44, %c0_45], %70 {strides = array<i32>} : memref<32x128xf32, #tpu.memory_space<vmem>>, vector<32x128xf32>,
    } else {
    }
    return
  }
  func.func @transform_0(%arg0: i32, %arg1: i32) -> (i32, i32) {
    %c0_i32 = arith.constant 0 : i32
    %c0_i32_0 = arith.constant 0 : i32
    %c0_i32_1 = arith.constant 0 : i32
    return %c0_i32, %c0_i32_0 : i32, i32
  }
  func.func @transform_1(%arg0: i32, %arg1: i32) -> (i32, i32) {
    %c1_i32 = arith.constant 1 : i32
    %0 = arith.subi %c1_i32, %arg0 : i32
    %1 = arith.muli %arg1, %0 : i32
    %c1_i32_0 = arith.constant 1 : i32
    %2 = arith.muli %c1_i32_0, %arg0 : i32
    %3 = arith.addi %1, %2 : i32
    %c0_i32 = arith.constant 0 : i32
    %c0_i32_1 = arith.constant 0 : i32
    return %c0_i32, %3 : i32, i32
  }
  func.func @transform_2(%arg0: i32, %arg1: i32) -> (i32, i32) {
    %c1_i32 = arith.constant 1 : i32
    %0 = arith.subi %c1_i32, %arg0 : i32
    %1 = arith.muli %arg1, %0 : i32
    %c1_i32_0 = arith.constant 1 : i32
    %2 = arith.muli %c1_i32_0, %arg0 : i32
    %3 = arith.addi %1, %2 : i32
    %c0_i32 = arith.constant 0 : i32
    %c0_i32_1 = arith.constant 0 : i32
    return %c0_i32, %3 : i32, i32
  }
  func.func @transform_3(%arg0: i32, %arg1: i32) -> (i32, i32) {
    %c1_i32 = arith.constant 1 : i32
    %0 = arith.subi %c1_i32, %arg0 : i32
    %1 = arith.muli %arg1, %0 : i32
    %c1_i32_0 = arith.constant 1 : i32
    %2 = arith.muli %c1_i32_0, %arg0 : i32
    %3 = arith.addi %1, %2 : i32
    %c0_i32 = arith.constant 0 : i32
    %c0_i32_1 = arith.constant 0 : i32
    return %c0_i32, %3 : i32, i32
  }
  func.func @transform_4(%arg0: i32, %arg1: i32) -> (i32, i32, i32) {
    %c1_i32 = arith.constant 1 : i32
    %0 = arith.subi %c1_i32, %arg0 : i32
    %1 = arith.muli %arg1, %0 : i32
    %c1_i32_0 = arith.constant 1 : i32
    %2 = arith.muli %c1_i32_0, %arg0 : i32
    %3 = arith.addi %1, %2 : i32
    %c0_i32 = arith.constant 0 : i32
    %c0_i32_1 = arith.constant 0 : i32
    %c0_i32_2 = arith.constant 0 : i32
    return %c0_i32, %c0_i32_1, %3 : i32, i32, i32
  }
  func.func @transform_5(%arg0: i32, %arg1: i32) -> (i32, i32) {
    %c1_i32 = arith.constant 1 : i32
    %0 = arith.subi %c1_i32, %arg0 : i32
    %1 = arith.muli %arg1, %0 : i32
    %c1_i32_0 = arith.constant 1 : i32
    %2 = arith.muli %c1_i32_0, %arg0 : i32
    %3 = arith.addi %1, %2 : i32
    %c0_i32 = arith.constant 0 : i32
    %c0_i32_1 = arith.constant 0 : i32
    return %3, %c0_i32 : i32, i32
  }
  func.func @transform_6(%arg0: i32, %arg1: i32) -> (i32, i32) {
    %0 = arith.muli %arg1, %arg0 : i32
    %c0_i32 = arith.constant 0 : i32
    %c0_i32_0 = arith.constant 0 : i32
    return %c0_i32, %0 : i32, i32
  }
  func.func @transform_7(%arg0: i32, %arg1: i32) -> (i32, i32) {
    %0 = arith.muli %arg1, %arg0 : i32
    %c0_i32 = arith.constant 0 : i32
    %c0_i32_0 = arith.constant 0 : i32
    return %c0_i32, %0 : i32, i32
  }
  func.func @transform_8(%arg0: i32, %arg1: i32) -> (i32, i32) {
    %0 = arith.muli %arg1, %arg0 : i32
    %c0_i32 = arith.constant 0 : i32
    %c0_i32_0 = arith.constant 0 : i32
    return %c0_i32, %0 : i32, i32
  }
  func.func @transform_9(%arg0: i32, %arg1: i32) -> (i32, i32) {
    %0 = arith.muli %arg1, %arg0 : i32
    %c0_i32 = arith.constant 0 : i32
    %c0_i32_0 = arith.constant 0 : i32
    return %c0_i32, %0 : i32, i32
  }
  func.func @transform_10(%arg0: i32, %arg1: i32) -> (i32, i32, i32) {
    %0 = arith.muli %arg1, %arg0 : i32
    %c0_i32 = arith.constant 0 : i32
    %c0_i32_0 = arith.constant 0 : i32
    %c0_i32_1 = arith.constant 0 : i32
    return %c0_i32, %c0_i32_0, %0 : i32, i32, i32
  }
  func.func @transform_11(%arg0: i32, %arg1: i32) -> (i32, i32) {
    %0 = arith.muli %arg1, %arg0 : i32
    %c0_i32 = arith.constant 0 : i32
    %c0_i32_0 = arith.constant 0 : i32
    return %c0_i32, %0 : i32, i32
  }
  func.func @transform_12(%arg0: i32, %arg1: i32) -> (i32, i32) {
    %0 = arith.muli %arg1, %arg0 : i32
    %c0_i32 = arith.constant 0 : i32
    %c0_i32_0 = arith.constant 0 : i32
    return %0, %c0_i32 : i32, i32
  }
  func.func @transform_13(%arg0: i32, %arg1: i32) -> (i32, i32) {
    %c0_i32 = arith.constant 0 : i32
    %c0_i32_0 = arith.constant 0 : i32
    %c0_i32_1 = arith.constant 0 : i32
    return %c0_i32, %c0_i32_0 : i32, i32
  }
  func.func @transform_14(%arg0: i32, %arg1: i32) -> (i32, i32, i32) {
    %c1_i32 = arith.constant 1 : i32
    %0 = arith.subi %c1_i32, %arg0 : i32
    %1 = arith.muli %arg1, %0 : i32
    %c1_i32_0 = arith.constant 1 : i32
    %2 = arith.muli %c1_i32_0, %arg0 : i32
    %3 = arith.addi %1, %2 : i32
    %c0_i32 = arith.constant 0 : i32
    %c0_i32_1 = arith.constant 0 : i32
    %c0_i32_2 = arith.constant 0 : i32
    return %c0_i32, %c0_i32_1, %3 : i32, i32, i32
  }
  func.func @transform_15(%arg0: i32, %arg1: i32) -> (i32, i32, i32) {
    %0 = arith.muli %arg1, %arg0 : i32
    %c0_i32 = arith.constant 0 : i32
    %c0_i32_0 = arith.constant 0 : i32
    %c0_i32_1 = arith.constant 0 : i32
    return %c0_i32, %c0_i32_0, %0 : i32, i32, i32
  }
}

</mosaic_0001>

<bundles_post_ra>
// kernel: mamba_block.1
= control target key start
LH: loop header
LB: loop body
LE: loop exit
PB: predicated region body
PF: predicated region fallthrough
CT: control target
= control target key end

     0   :  { %s8658_s0 = inlined_call_operand.vmem [shape: f32[32,128], index: 0, kind: input, shape index: {}]   ;;  %s8659_s1 = inlined_call_operand.vmem [shape: bf16[128,256], index: 1, kind: input, shape index: {}]   ;;  %s8660_s2 = inlined_call_operand.vmem [shape: f32[4,256], index: 2, kind: input, shape index: {}]   ;;  %s8661_s3 = inlined_call_operand.vmem [shape: f32[1,256], index: 3, kind: input, shape index: {}]   ;;  %s8662_s4 = inlined_call_operand.hbm [shape: f32[4,32,256], index: 4, kind: input, shape index: {}, may-alias: {4,14}]   ;;  %s8663_s5 = inlined_call_operand.vmem [shape: bf16[256,128], index: 5, kind: input, shape index: {}]   ;;  %s8664_s6 = inlined_call_operand.vmem [shape: bf16[8,256], index: 6, kind: input, shape index: {}]   ;;  %s8665_s7 = inlined_call_operand.vmem [shape: f32[1,256], index: 7, kind: input, shape index: {}]   ;;  %s8666_s8 = inlined_call_operand.vmem [shape: f32[16,256], index: 8, kind: input, shape index: {}]   ;;  %s8667_s9 = inlined_call_operand.vmem [shape: f32[1,256], index: 9, kind: input, shape index: {}]   ;;  %s8668_s10 = inlined_call_operand.hbm [shape: f32[32,16,256], index: 10, kind: input, shape index: {}, may-alias: {10,15}]   ;;  %s8669_s11 = inlined_call_operand.vmem [shape: bf16[128,256], index: 11, kind: input, shape index: {}]   ;;  %s8670_s12 = inlined_call_operand.vmem [shape: bf16[256,128], index: 12, kind: input, shape index: {}]   ;;  %s8671_s13 = inlined_call_operand.hbm [shape: f32[32,128], index: 13, kind: output, shape index: {0}]   ;;  %s8672_s14 = inlined_call_operand.hbm [shape: f32[4,32,256], index: 14, kind: output, shape index: {1}, may-alias: {4,14}]   ;;  %s8673_s15 = inlined_call_operand.hbm [shape: f32[32,16,256], index: 15, kind: output, shape index: {2}, may-alias: {10,15}]  }
   0x1   :  { %8707 = sst [smem:[#allocation59_spill]] %s8658_s0 }
   0x2   :  { %8708 = sst [smem:[#allocation60_spill]] %s8659_s1 }
   0x3   :  { %8709 = sst [smem:[#allocation61_spill]] %s8660_s2 }
   0x4   :  { %8710 = sst [smem:[#allocation62_spill]] %s8662_s4 }
   0x5   :  { %8711 = sst [smem:[#allocation63_spill]] %s8663_s5 }
   0x6   :  { %8712 = sst [smem:[#allocation64_spill]] %s8664_s6 }
   0x7   :  { %8713 = sst [smem:[#allocation65_spill]] %s8665_s7 }
   0x8   :  { %8714 = sst [smem:[#allocation66_spill]] %s8666_s8 }
   0x9   :  { %8715 = sst [smem:[#allocation67_spill]] %s8667_s9 }
   0xa   :  { %8716 = sst [smem:[#allocation68_spill]] %s8668_s10 }
   0xb   :  { %8717 = sst [smem:[#allocation69_spill]] %s8669_s11 }
   0xc   :  { %8718 = sst [smem:[#allocation70_spill]] %s8670_s12 }
   0xd   :  { %8719 = sst [smem:[#allocation71_spill]] %s8671_s13 }
   0xe   :  { %8720 = sst [smem:[#allocation72_spill]] %s8672_s14 }
   0xf   :  { %8721 = sst [smem:[#allocation73_spill]] %s8673_s15 }
  0x10   :  { %21 = vsyncpa [#allocation10], 0 }
  0x11   :  { %23 = vsyncpa [#allocation10 + $0x1], 0 }
  0x12   :  { %24 = vsyncpa [#allocation14], 0 }
  0x13   :  { %26 = vsyncpa [#allocation14 + $0x1], 0 }
  0x14   :  { %27 = vsyncpa [#allocation11], 0 }
  0x15   :  { %28 = vsyncpa [#allocation18], 0 }
  0x16   :  { %30 = vsyncpa [#allocation18 + $0x1], 0  ;;  %s6355_s18 = smov 0   ;;  %s6357_s19 = smov 0  }
  0x17   :  { %s6359_s20 = smov 0   ;;  %s6361_s21 = smov 0  }
  0x18   :  { %s6363_s22 = smov 0   ;;  %s6365_s23 = smov 0  }
  0x19   :  { %s6367_s24 = smov 0   ;;  %s6369_s25 = smov 0  }
  0x1a   :  { %s6371_s26 = smov 0   ;;  %s6373_s27 = smov 0  }
  0x1b   :  { %s6375_s28 = smov 0  }
  0x1c LB: > { %8722 = sst [smem:[#allocation25_spill]] %s6228_s19  ;;  %s6411_s29 = sadd.s32 4294967295, %s6264_s28   ;;  %s6264_s28 = sphi %s6375_s28, %s36_s28   ;;  %s6260_s27 = sphi %s6373_s27, %s8862_s27   ;;  %s6256_s26 = sphi %s6371_s26, %s8861_s26   ;;  %s6252_s25 = sphi %s6369_s25, %s8860_s25   ;;  %s6248_s24 = sphi %s6367_s24, %s8859_s24   ;;  %s6244_s23 = sphi %s6365_s23, %s8858_s23   ;;  %s6240_s22 = sphi %s6363_s22, %s8857_s22   ;;  %s6236_s21 = sphi %s6361_s21, %s8856_s21   ;;  %s6232_s20 = sphi %s6359_s20, %s8855_s20   ;;  %s6228_s19 = sphi %s6357_s19, %s8854_s19   ;;  %s6224_s18 = sphi %s6355_s18, %s8853_s18  }
  0x1d   : > { %8723 = sst [smem:[#allocation26_spill]] %s6232_s20  ;;  %s45_s16 = sadd.s32 1, %s6256_s26 }
  0x1e   : > { %8724 = sst [smem:[#allocation27_spill]] %s6240_s22  ;;  %s48_s17 = sadd.s32 1, %s6260_s27 }
  0x1f   : > { %8725 = sst [smem:[#allocation28_spill]] %s6244_s23  ;;  %p46_p0 = scmp.ge.s32.totalorder %s45_s16, 2 }
  0x20   : > { %8726 = sst [smem:[#allocation29_spill]] %s6248_s24  ;;  %s73_s15 = ssub.s32 1, %s6260_s27 }
  0x21   : > { %8727 = sst [smem:[#allocation30_spill]] %s6256_s26  ;;  %s74_s13 = smul.u32 %s6256_s26, %s73_s15 }
  0x22   : > { %8728 = sst [smem:[#allocation31_spill]] %s6260_s27  ;;  %s82_s14 = sadd.s32 1, %s6244_s23 }
  0x23   : > { %8729 = sst [smem:[#allocation32_spill]] %s6264_s28  ;;  %s8864_s16 = smov (%p46_p0, %s45_s16), 0 }
  0x24   : > { %8730 = sst [smem:[#allocation33_spill]] %s6411_s29  ;;  %s8866_s17 = smov (!%p46_p0, %s48_s17), %s6260_s27 }
  0x25   : > { %8731 = sst [smem:[#allocation34_spill]] %s8864_s16  ;;  %s6423_s30 = sadd.s32 %s6260_s27, %s74_s13 }
  0x26   : > { %p89_p1 = scmp.ne.s32.totalorder %s6244_s23, %s6240_s22  ;;  %p50_p2 = scmp.ge.s32.totalorder %s8866_s17, 2 }
  0x27   : > { %p90_p3 = scmp.eq.s32.totalorder %s6264_s28, 0  ;;  %p8680_p4 = scmp.ne.s32.totalorder %s6240_s22, %s6236_s21 }
  0x28   : > { %p192_p5 = scmp.eq.s32.totalorder %s6411_s29, 0  ;;  %s8868_s17 = smov (%p50_p2, %s8866_s17), 0 }
  0x29   : > { %8732 = sst [smem:[#allocation35_spill]] %s8868_s17  ;;  %p6438_p6 = por %p90_p3, %p89_p1 }
  0x2a   : > { %p6447_p7 = por %p192_p5, %p8680_p4  ;;  %s76_s0 = ssub.s32 1, %s8868_s17 }
  0x2b   : > { %s6454_s12 = smul.u32 %s6256_s26, %s6260_s27  ;;  %s294_s6 = sadd.s32 1, %s6232_s20 }
  0x2c   : > { %s77_s9 = smul.u32 %s76_s0, %s8864_s16  ;;  %p8681_p8 = scmp.ne.s32.totalorder %s6232_s20, %s6228_s19 }
  0x2d   : > { %s290_s7 = smul.u32 %s8868_s17, %s8864_s16  ;;  %p363_p9 = scmp.ne.s32.totalorder %s6228_s19, %s6224_s18 }
  0x2e   : > { %s78_s5 = sadd.s32 %s77_s9, %s8868_s17  ;;  %p6472_p12 = por %p8681_p8, %p90_p3 }
  0x2f   : > { %s79_s27 = ssub.s32 %s6423_s30, %s78_s5  ;;  %s291_s26 = ssub.s32 %s6454_s12, %s290_s7 }
  0x30   : > { %p80_p10 = scmp.eq.s32.totalorder %s79_s27, 0  ;;  %p292_p11 = scmp.eq.s32.totalorder %s291_s26, 0 }
  0x31   : > { %p6481_p13 = por %p363_p9, %p192_p5  ;;  %p470_p0 = scmp.eq.s32.totalorder %s6411_s29, 3 }
  0x32   : > { %s6486_s2 = scalar_select %p80_p10, %s6244_s23, %s82_s14  }
  0x33   : > { %s6489_s9 = scalar_select %p292_p11, %s6232_s20, %s294_s6  }
  0x34   : > { %8737 = sst [smem:[#allocation36_spill]] %s6486_s2  ;;  %s8739_s5 = sadd.s32 4294967294, %s6264_s28  }
  0x35   : > { %8738 = sst [smem:[#allocation37_spill]] %s6489_s9  ;;  %p476_p2 = scmp.eq.s32.totalorder %s8739_s5, 3 }
  0x36   : > { %p6499_p4 = por %p470_p0, %p89_p1  ;;  %p8742_p3 = scmp.ne.s32.totalorder %s6240_s22, %s6236_s21 }
  0x37   : > { %p8745_p5 = scmp.ne.s32.totalorder %s6232_s20, %s6228_s19  ;;  %p6522_p11 = por %p476_p2, %p363_p9 }
  0x38   : > { %s8740_s7 = scalar_select %p6499_p4, 1, 0 }
  0x39   : > { %p6506_p8 = por %p476_p2, %p8742_p3  ;;  %p6515_p10 = por %p470_p0, %p8745_p5 }
  0x3a   : > { %8741 = sst [smem:[#allocation38_spill]] %s8740_s7  ;;  %p5316_p1 = scmp.ge.s32.totalorder %s6264_s28, 4 }
  0x3b   : > { %s8743_s26 = scalar_select %p6506_p8, 1, 0 }
  0x3c   : > { %s8746_s14 = scalar_select %p6515_p10, 1, 0 }
  0x3d   : > { %8744 = sst [smem:[#allocation39_spill]] %s8743_s26  ;;  %523 = sbr.rel (%p5316_p1) target bundleno = 137 (0x89), region = 20 }
  0x3e   : > { %8747 = sst [smem:[#allocation40_spill]] %s8746_s14 }
  0x3f   : > { %s8748_s6 = scalar_select %p6522_p11, 1, 0 }
  0x41   : > { %8749 = sst [smem:[#allocation41_spill]] %s8748_s6 }
  0x42   : > { %526 = sbr.rel (!%p6438_p6) target bundleno = 92 (0x5c), region = 24  ;;  %s528_s21 = sand.u32 (%p6438_p6), 1, %s6244_s23  }
  0x43   : > { %s5318_s27 = sshll.u32 (%p6438_p6), %s6423_s30, 2  ;;  %s5317_s5 = sshll.u32 (%p6438_p6), %s528_s21, 6 }
  0x44   : > { %s8750_s1 = sld [smem:[#allocation60_spill]] (%p6438_p6)  ;;  %s530_s18 = scalar_lea.vmem (%p6438_p6), [#allocation8], %s5317_s5 }
  0x4a   : > { %s6534_s9 = scalar_lea.vmem %s8750_s1, %s5318_s27 }
  0x4b   : > { %v552_v0 = vld [vmem:[%s6534_s9] sm:$0xf]  ;;  %v554_v1 = vld [vmem:[%s6534_s9 + $0x8] sm:$0xf]  ;;  %v556_v2 = vld [vmem:[%s6534_s9 + $0x10] sm:$0xf] }
  0x4c   : > { %553 = vst [vmem:[%s530_s18] sm:$0xf] %v552_v0  ;;  %v558_v3 = vld [vmem:[%s6534_s9 + $0x18] sm:$0xf]  ;;  %v560_v4 = vld [vmem:[%s6534_s9 + $0x20] sm:$0xf] }
  0x4d   : > { %555 = vst [vmem:[%s530_s18 + $0x4] sm:$0xf] %v554_v1  ;;  %v562_v5 = vld [vmem:[%s6534_s9 + $0x28] sm:$0xf]  ;;  %v564_v6 = vld [vmem:[%s6534_s9 + $0x30] sm:$0xf] }
  0x4e   : > { %557 = vst [vmem:[%s530_s18 + $0x8] sm:$0xf] %v556_v2  ;;  %v566_v7 = vld [vmem:[%s6534_s9 + $0x38] sm:$0xf]  ;;  %v568_v8 = vld [vmem:[%s6534_s9 + $0x40] sm:$0xf] }
  0x4f   : > { %559 = vst [vmem:[%s530_s18 + $0xc] sm:$0xf] %v558_v3  ;;  %v570_v9 = vld [vmem:[%s6534_s9 + $0x48] sm:$0xf]  ;;  %v572_v10 = vld [vmem:[%s6534_s9 + $0x50] sm:$0xf] }
  0x50   : > { %561 = vst [vmem:[%s530_s18 + $0x10] sm:$0xf] %v560_v4  ;;  %v574_v11 = vld [vmem:[%s6534_s9 + $0x58] sm:$0xf]  ;;  %v576_v12 = vld [vmem:[%s6534_s9 + $0x60] sm:$0xf] }
  0x51   : > { %563 = vst [vmem:[%s530_s18 + $0x14] sm:$0xf] %v562_v5  ;;  %v578_v13 = vld [vmem:[%s6534_s9 + $0x68] sm:$0xf]  ;;  %v580_v14 = vld [vmem:[%s6534_s9 + $0x70] sm:$0xf] }
  0x52   : > { %565 = vst [vmem:[%s530_s18 + $0x18] sm:$0xf] %v564_v6  ;;  %v582_v15 = vld [vmem:[%s6534_s9 + $0x78] sm:$0xf] }
  0x53   : > { %567 = vst [vmem:[%s530_s18 + $0x1c] sm:$0xf] %v566_v7 }
  0x54   : > { %569 = vst [vmem:[%s530_s18 + $0x20] sm:$0xf] %v568_v8 }
  0x55   : > { %571 = vst [vmem:[%s530_s18 + $0x24] sm:$0xf] %v570_v9 }
  0x56   : > { %573 = vst [vmem:[%s530_s18 + $0x28] sm:$0xf] %v572_v10 }
  0x57   : > { %575 = vst [vmem:[%s530_s18 + $0x2c] sm:$0xf] %v574_v11 }
  0x58   : > { %577 = vst [vmem:[%s530_s18 + $0x30] sm:$0xf] %v576_v12 }
  0x59   : > { %579 = vst [vmem:[%s530_s18 + $0x34] sm:$0xf] %v578_v13 }
  0x5a   : > { %581 = vst [vmem:[%s530_s18 + $0x38] sm:$0xf] %v580_v14 }
  0x5b   : > { %583 = vst [vmem:[%s530_s18 + $0x3c] sm:$0xf] %v582_v15 }
  0x5c PF: > { %s665_s2 = sand.u32 1, %s6244_s23   ;;  %s5320_s17 = sshll.u32 %s6423_s30, 3 }
  0x5d   : > { %s5319_s21 = sshll.u32 %s665_s2, 7  ;;  %s8751_s4 = sld [smem:[#allocation62_spill]] }
  0x5e   : > { %s669_s26 = scalar_lea.vmem [#allocation9], %s5319_s21  ;;  %s666_s9 = scalar_lea.sflag [#allocation10], %s665_s2 }
  0x5f   : > { %s679_s14 = sshll.u32 %s669_s26, 4  ;;  %s8691_s7 = smov 256   ;;  %s680_s14 = int_to_ptr.vmem [resolvable:$true] %s679_s14 }
  0x60   : > { %s6267_s29 = smov 128   ;;  %s6268_s18 = smov 8  }
  0x61   : > { %720 = sbr.rel (!%p6472_p12) target bundleno = 108 (0x6c), region = 89  ;;  %s722_s30 = sand.u32 (%p6472_p12), 1, %s6232_s20  }
  0x62   : > { %s5322_s27 = sshll.u32 (%p6472_p12), %s6454_s12, 3  ;;  %s8752_s8 = sld [smem:[#allocation66_spill]] (%p6472_p12) }
  0x63   : > { %s676_s1 = scalar_lea.hbm %s8751_s4, %s5320_s17  ;;  %s5321_s17 = sshll.u32 (%p6472_p12), %s722_s30, 4 }
  0x64   : > { %s677_s6 = sshll.u32 %s676_s1, 4  ;;  %s724_s2 = scalar_lea.vmem (%p6472_p12), [#allocation12], %s5321_s17  ;;  %s678_s6 = int_to_ptr.hbm [resolvable:$true] %s677_s6 }
  0x65   : > { %5599 = dma.hbm_to_vmem [thread:$0]  (%p6438_p6), %s678_s6, 2048, %s680_s14, %s666_s9, %s8691_s7, %s6267_s29, %s6268_s18  }
  0x68   : > { %s727_s26 = scalar_lea.vmem %s8752_s8, %s5322_s27 }
  0x69   : > { %v758_v16 = vld [vmem:[%s727_s26] sm:$0xff]  ;;  %v760_v17 = vld [vmem:[%s727_s26 + $0x10] sm:$0xff] }
  0x6a   : > { %759 = vst [vmem:[%s724_s2] sm:$0xff] %v758_v16 }
  0x6b   : > { %761 = vst [vmem:[%s724_s2 + $0x8] sm:$0xff] %v760_v17 }
  0x6c PF: > { %s776_s13 = sand.u32 1, %s6232_s20   ;;  %s5324_s14 = sshll.u32 %s6454_s12, 3 }
  0x6d   : > { %s5323_s6 = sshll.u32 %s776_s13, 9  ;;  %s8753_s10 = sld [smem:[#allocation68_spill]] }
  0x6e   : > { %s780_s4 = scalar_lea.vmem [#allocation13], %s5323_s6  ;;  %s777_s27 = scalar_lea.sflag [#allocation14], %s776_s13 }
  0x6f   : > { %s788_s1 = sshll.u32 %s780_s4, 4  ;;  %s8754_s17 = smov 256   ;;  %s789_s1 = int_to_ptr.vmem [resolvable:$true] %s788_s1 }
  0x70   : > { %s5325_s21 = sshll.u32 (%p6472_p12), %s776_s13, 6  ;;  %s5326_s26 = sshll.u32 (%p6472_p12), %s6454_s12, 2 }
  0x71   : > { %797 = sbr.rel (!%p6472_p12) target bundleno = 137 (0x89), region = 135  ;;  %s8755_s11 = sld [smem:[#allocation69_spill]] (%p6472_p12) }
  0x72   : > { %s801_s4 = scalar_lea.vmem (%p6472_p12), [#allocation15], %s5325_s21 }
  0x73   : > { %s785_s30 = scalar_lea.hbm %s8753_s10, %s5324_s14 }
  0x74   : > { %s786_s7 = sshll.u32 %s785_s30, 4  ;;  %s787_s7 = int_to_ptr.hbm [resolvable:$true] %s786_s7 }
  0x75   : > { %5600 = dma.hbm_to_vmem [thread:$0]  (%p6472_p12), %s787_s7, 8192, %s789_s1, %s777_s27, %s8754_s17, %s6267_s29, %s6268_s18  }
  0x77   : > { %s6581_s5 = scalar_lea.vmem %s8755_s11, %s5326_s26 }
  0x78   : > { %v821_v18 = vld [vmem:[%s6581_s5] sm:$0xf]  ;;  %v823_v19 = vld [vmem:[%s6581_s5 + $0x8] sm:$0xf]  ;;  %v825_v20 = vld [vmem:[%s6581_s5 + $0x10] sm:$0xf] }
  0x79   : > { %822 = vst [vmem:[%s801_s4] sm:$0xf] %v821_v18  ;;  %v827_v21 = vld [vmem:[%s6581_s5 + $0x18] sm:$0xf]  ;;  %v829_v22 = vld [vmem:[%s6581_s5 + $0x20] sm:$0xf] }
  0x7a   : > { %824 = vst [vmem:[%s801_s4 + $0x4] sm:$0xf] %v823_v19  ;;  %v831_v23 = vld [vmem:[%s6581_s5 + $0x28] sm:$0xf]  ;;  %v833_v24 = vld [vmem:[%s6581_s5 + $0x30] sm:$0xf] }
  0x7b   : > { %826 = vst [vmem:[%s801_s4 + $0x8] sm:$0xf] %v825_v20  ;;  %v835_v25 = vld [vmem:[%s6581_s5 + $0x38] sm:$0xf]  ;;  %v837_v26 = vld [vmem:[%s6581_s5 + $0x40] sm:$0xf] }
  0x7c   : > { %828 = vst [vmem:[%s801_s4 + $0xc] sm:$0xf] %v827_v21  ;;  %v839_v27 = vld [vmem:[%s6581_s5 + $0x48] sm:$0xf]  ;;  %v841_v28 = vld [vmem:[%s6581_s5 + $0x50] sm:$0xf] }
  0x7d   : > { %830 = vst [vmem:[%s801_s4 + $0x10] sm:$0xf] %v829_v22  ;;  %v843_v29 = vld [vmem:[%s6581_s5 + $0x58] sm:$0xf]  ;;  %v845_v30 = vld [vmem:[%s6581_s5 + $0x60] sm:$0xf] }
  0x7e   : > { %832 = vst [vmem:[%s801_s4 + $0x14] sm:$0xf] %v831_v23  ;;  %v847_v31 = vld [vmem:[%s6581_s5 + $0x68] sm:$0xf]  ;;  %v849_v32 = vld [vmem:[%s6581_s5 + $0x70] sm:$0xf] }
  0x7f   : > { %834 = vst [vmem:[%s801_s4 + $0x18] sm:$0xf] %v833_v24  ;;  %v851_v33 = vld [vmem:[%s6581_s5 + $0x78] sm:$0xf] }
  0x80   : > { %836 = vst [vmem:[%s801_s4 + $0x1c] sm:$0xf] %v835_v25 }
  0x81   : > { %838 = vst [vmem:[%s801_s4 + $0x20] sm:$0xf] %v837_v26 }
  0x82   : > { %840 = vst [vmem:[%s801_s4 + $0x24] sm:$0xf] %v839_v27 }
  0x83   : > { %842 = vst [vmem:[%s801_s4 + $0x28] sm:$0xf] %v841_v28 }
  0x84   : > { %844 = vst [vmem:[%s801_s4 + $0x2c] sm:$0xf] %v843_v29 }
  0x85   : > { %846 = vst [vmem:[%s801_s4 + $0x30] sm:$0xf] %v845_v30 }
  0x86   : > { %848 = vst [vmem:[%s801_s4 + $0x34] sm:$0xf] %v847_v31 }
  0x87   : > { %850 = vst [vmem:[%s801_s4 + $0x38] sm:$0xf] %v849_v32 }
  0x88   : > { %852 = vst [vmem:[%s801_s4 + $0x3c] sm:$0xf] %v851_v33 }
  0x89 PF: > { %p5327_p6 = scmp.ge.s32.totalorder %s6264_s28, 1  ;;  %p918_p9 = scmp.lt.s32.totalorder %s6264_s28, 5 }
  0x8b   : > { %p919_p12 = pnand %p5327_p6, %p918_p9 }
  0x8d   : > { %922 = sbr.rel (%p919_p12) target bundleno = 1979 (0x7bb), region = 180 }
  0x92   : > { %s6602_s8 = sand.u32 1, %s6240_s22  }
  0x93   : > { %s5328_s12 = sshll.u32 %s6602_s8, 6  ;;  %s8693_s29 = sshll.u32 %s6602_s8, 7 }
  0x94   : > { %s6606_s0 = scalar_lea.vmem [#allocation8], %s5328_s12  ;;  %s932_s7 = scalar_lea.sflag [#allocation10], %s6602_s8 }
  0x95   : > { %s6611_s18 = scalar_lea.vmem [#allocation9], %s8693_s29 }
  0x96   : > { %6203 = dma.done.wait (%p6447_p7), %s932_s7, 2048  }
  0x97   : > { %6205 = vsyncadd (%p6447_p7), %s932_s7, 4294965248  ;;  %s6618_s13 = sand.u32 1, %s6228_s19  }
  0x98   : > { %s5330_s14 = sshll.u32 %s6618_s13, 4  ;;  %s8692_s6 = sshll.u32 %s6618_s13, 9 }
  0x99   : > { %s6622_s9 = scalar_lea.vmem [#allocation12], %s5330_s14  ;;  %s949_s30 = scalar_lea.sflag [#allocation14], %s6618_s13 }
  0x9a   : > { %8756 = sst [smem:[#allocation42_spill]] %s6622_s9  ;;  %s6627_s1 = scalar_lea.vmem [#allocation13], %s8692_s6 }
  0x9b   : > { %8757 = sst [smem:[#allocation43_spill]] %s6627_s1 }
  0x9c   : > { %6207 = dma.done.wait (%p6481_p13), %s949_s30, 8192  }
  0x9d   : > { %6209 = vsyncadd (%p6481_p13), %s949_s30, 4294959104  ;;  %s1072_s27 = ssub.s32 1, %s6252_s25  ;;  %s6637_s17 = smul.u32 %s6248_s24, %s6252_s25 }
  0x9e   : > { %s1073_s21 = smul.u32 %s6248_s24, %s1072_s27  ;;  %p1138_p7 = scmp.eq.s32.totalorder %s6252_s25, 0 }
  0x9f   : > { %8758 = sst [smem:[#allocation44_spill]] %s6637_s17  ;;  %p1107_p2 = scmp.lt.s32.totalorder %s6637_s17, 1 }
  0xa0   : > { %s5339_s16 = sshll.u32 %s6637_s17, 4  ;;  %s6644_s26 = sadd.s32 %s6252_s25, %s1073_s21 }
  0xa1   : > { %8759 = sst [smem:[#allocation45_spill]] %s6644_s26  ;;  %p6646_p13 = scmp.lt.s32.totalorder %s5339_s16, 31 }
  0xa2   : > { %p1075_p3 = scmp.lt.s32.totalorder %s6644_s26, 1  ;;  %s5336_s5 = sshll.u32 %s6644_s26, 4 }
  0xa3   : > { %p1098_p5 = scmp.lt.s32.totalorder %s5336_s5, 31  ;;  %p1139_p1 = scmp.eq.s32.totalorder %s6248_s24, 0 }
  0xa4   : > { %s6654_s4 = scalar_select %p1075_p3, %s6644_s26, 1 }
  0xa5   : > { %s8870_s5 = smov (!%p1098_p5, %s5336_s5), 31  ;;  %s8761_s6 = sld [smem:[#allocation61_spill]] }
  0xa6   : > { %s5335_s12 = sshll.u32 %s6654_s4, 2  ;;  %s5337_s15 = sshll.u32 %s8870_s5, 2 }
  0xa7   : > { %s8762_s23 = sld [smem:[#allocation63_spill]]  ;;  %p1140_p6 = pnand %p1139_p1, %p1138_p7 }
  0xa8   : > { %s6676_s20 = scalar_select %p1107_p2, %s6637_s17, 1 }
  0xa9   : > { %s8872_s16 = smov (!%p6646_p13, %s5339_s16), 31  ;;  %s8764_s10 = sld [smem:[#allocation64_spill]] }
  0xaa   : > { %s5338_s7 = sshll.u32 %s6676_s20, 2  ;;  %s8765_s30 = sld [smem:[#allocation67_spill]] }
  0xab   : > { %s6664_s29 = scalar_lea.vmem %s8761_s6, %s5335_s12  ;;  %s8763_s12 = sld [smem:[#allocation65_spill]] }
  0xac   : > { %s5340_s28 = sshll.u32 %s8872_s16, 2  ;;  %s8766_s26 = sld [smem:[#allocation70_spill]] }
  0xad   : > { %s6669_s22 = scalar_lea.vmem %s8762_s23, %s5337_s15  ;;  %s8767_s9 = sshll.u32 %s6618_s13, 6 }
  0xae   : > { %s6701_s24 = scalar_lea.vmem [#allocation15], %s8767_s9  ;;  %s8768_s14 = sshll.u32 %s6602_s8, 7 }
  0xaf   : > { %s6688_s11 = scalar_lea.vmem %s8764_s10, %s5338_s7  ;;  %s6705_s6 = scalar_lea.vmem [#allocation17], %s8768_s14 }
  0xb0   : > { %s1121_s19 = scalar_lea.vmem %s8765_s30, %s6676_s20  ;;  %1143 = sbr.rel (%p1140_p6) target bundleno = 192 (0xc0), region = 204 }
  0xb1   : > { %s1115_s5 = scalar_lea.vmem %s8763_s12, %s6676_s20  ;;  %s8769_s12 = sshll.u32 %s6618_s13, 9 }
  0xb2   : > { %s6697_s1 = scalar_lea.vmem %s8766_s26, %s5340_s28  ;;  %s6709_s27 = scalar_lea.vmem [#allocation19], %s8769_s12 }
  0xb3   : > { %s8770_s10 = sld [smem:[#allocation59_spill]] (!%p1140_p6) }
  0xb5   : > { %v6269_v39 = vmov 0.0  }
  0xb6   : > { %1156 = vst [vmem:[#allocation4 + $0x8] sm:$0xff] %v6269_v39 }
  0xb7   : > { %1157 = vst [vmem:[#allocation4 + $0x10] sm:$0xff] %v6269_v39 }
  0xb8   : > { %1158 = vst [vmem:[#allocation4] sm:$0xff] %v6269_v39 }
  0xb9   : > { %v1144_v34 = vld [vmem:[%s8770_s10] sm:$0xff]  ;;  %v1145_v35 = vld [vmem:[%s8770_s10 + $0x8] sm:$0xff]  ;;  %v1146_v36 = vld [vmem:[%s8770_s10 + $0x10] sm:$0xff]  ;;  %1159 = vst [vmem:[#allocation4 + $0x18] sm:$0xff] %v6269_v39 }
  0xba   : > { %v5559_v37 = vpack.c.bf16 %v1145_v35, %v1144_v34  ;;  %v1147_v38 = vld [vmem:[%s8770_s10 + $0x18] sm:$0xff]  ;;  %1160 = vst [vmem:[#allocation16] sm:$0xff] %v6269_v39 }
  0xbb   : > { %v5564_v40 = vpack.c.bf16 %v1147_v38, %v1146_v36  ;;  %1161 = vst [vmem:[#allocation16 + $0x8] sm:$0xff] %v6269_v39 }
  0xbc   : > { %5560 = vst [vmem:[#allocation2] sm:$0xff] %v5559_v37  }
  0xbd   : > { %5566 = vst [vmem:[#allocation2 + $0x8] sm:$0xff] %v5564_v40  }
  0xbe   : > { %1162 = vst [vmem:[#allocation16 + $0x10] sm:$0xff] %v6269_v39 }
  0xbf   : > { %1163 = vst [vmem:[#allocation16 + $0x18] sm:$0xff] %v6269_v39 }
  0xc0 PF: > { %p5341_p9 = scmp.ne.s32.totalorder %s6252_s25, 0 }
  0xc2   : > { %1166 = sbr.rel (%p5341_p9) target bundleno = 552 (0x228), region = 208 }
  0xc7   : > { %v5529_v41 = vld [vmem:[%s6606_s0 + $0x38] sm:$0xff]  ;;  %v5528_v42 = vld [vmem:[%s6606_s0 + $0x30] sm:$0xff]  ;;  %v5527_v43 = vld [vmem:[%s6606_s0 + $0x28] sm:$0xff] }
  0xc8   : > { %1247 = vmatpush.bf16.msra.mxu0 %v5529_v41  ;;  %5567 = vmatpush.bf16.msra.mxu2 %v5529_v41  ;;  %v5526_v44 = vld [vmem:[%s6606_s0 + $0x20] sm:$0xff]  ;;  %v5525_v45 = vld [vmem:[%s6606_s0 + $0x18] sm:$0xff]  ;;  %v5524_v46 = vld [vmem:[%s6606_s0 + $0x10] sm:$0xff] }
  0xc9   : > { %v5523_v47 = vld [vmem:[%s6606_s0 + $0x8] sm:$0xff]  ;;  %v5522_v48 = vld [vmem:[%s6606_s0] sm:$0xff]  ;;  %v5520_v49 = vld [vmem:[#allocation2] sm:$0xff] }
  0xca   : > { %v5521_v50 = vld [vmem:[#allocation2 + $0x8] sm:$0xff]  ;;  %v1266_v51 = vld [vmem:[%s6611_s18 + $0x20] sm:$0xff]  ;;  %v1268_v54 = vld [vmem:[%s6611_s18 + $0x30] sm:$0xff] }
  0xcb   : > { %v1270_v52 = vld [vmem:[%s6611_s18 + $0x40] sm:$0xff]  ;;  %1278 = vst [vmem:[%s6705_s6] sm:$0xff] %v1266_v51  ;;  %v1272_v55 = vld [vmem:[%s6611_s18 + $0x50] sm:$0xff]  ;;  %v1267_v57 = vld [vmem:[%s6611_s18 + $0x28] sm:$0xff] }
  0xcc   : > { %1248 = vmatpush.bf16.msra.mxu0 %v5528_v42  ;;  %5568 = vmatpush.bf16.msra.mxu2 %v5528_v42  ;;  %v1274_v53 = vld [vmem:[%s6611_s18 + $0x60] sm:$0xff]  ;;  %5382 = vst [vmem:[%s6705_s6 + $0x20] sm:$0xff] %v1270_v52  ;;  %v1276_v56 = vld [vmem:[%s6611_s18 + $0x70] sm:$0xff]  ;;  %v1271_v58 = vld [vmem:[%s6611_s18 + $0x48] sm:$0xff] }
  0xcd   : > { %5386 = vst [vmem:[%s6705_s6 + $0x40] sm:$0xff] %v1274_v53  ;;  %v1275_v59 = vld [vmem:[%s6611_s18 + $0x68] sm:$0xff]  ;;  %v1269_v60 = vld [vmem:[%s6611_s18 + $0x38] sm:$0xff]  ;;  %v1297_v0 = vld [vmem:[%s6664_s29] sm:$0xf] }
  0xce   : > { %1280 = vst [vmem:[%s6705_s6 + $0x10] sm:$0xff] %v1268_v54  ;;  %v1273_v61 = vld [vmem:[%s6611_s18 + $0x58] sm:$0xff]  ;;  %v5537_v63 = vld [vmem:[%s6669_s22 + $0x38] sm:$0xff]  ;;  %v5536_v1 = vld [vmem:[%s6669_s22 + $0x30] sm:$0xff]  ;;  %v1298_v2 = vperm.slane %v1297_v0, 0  ;;  %v1303_v3 = vperm.slane %v1297_v0, 1 }
  0xcf   : > { %5384 = vst [vmem:[%s6705_s6 + $0x30] sm:$0xff] %v1272_v55  ;;  %v1277_v62 = vld [vmem:[%s6611_s18 + $0x78] sm:$0xff]  ;;  %1494 = vmatpush.bf16.msra.mxu1 %v5537_v63  ;;  %5575 = vmatpush.bf16.msra.mxu3 %v5537_v63  ;;  %v1312_v7 = vperm.slane %v1297_v0, 2  ;;  %v5534_v8 = vld [vmem:[%s6669_s22 + $0x20] sm:$0xff]  ;;  %v1321_v11 = vperm.slane %v1297_v0, 3  ;;  %v5533_v14 = vld [vmem:[%s6669_s22 + $0x18] sm:$0xff]  ;;  %s8771_s18 = scalar_lea.vmem %s8661_s3, %s6654_s4 }
  0xd0   : > { %1249 = vmatpush.bf16.msra.mxu0 %v5527_v43  ;;  %5569 = vmatpush.bf16.msra.mxu2 %v5527_v43  ;;  %5388 = vst [vmem:[%s6705_s6 + $0x50] sm:$0xff] %v1276_v56  ;;  %v5535_v4 = vld [vmem:[%s6669_s22 + $0x28] sm:$0xff]  ;;  %v1299_v5 = vmul.f32 %v1298_v2, %v1266_v51  ;;  %v1304_v6 = vmul.f32 %v1303_v3, %v1270_v52  ;;  %v5532_v19 = vld [vmem:[%s6669_s22 + $0x10] sm:$0xff]  ;;  %v5718_v23 = vld [vmem:[%s8771_s18] ss:$0 sm:$0xff] }
  0xd1   : > { %1279 = vst [vmem:[%s6705_s6 + $0x8] sm:$0xff] %v1267_v57  ;;  %v1313_v10 = vmul.f32 %v1312_v7, %v1274_v53  ;;  %v1301_v12 = vmul.f32 %v1298_v2, %v1268_v54  ;;  %v1306_v13 = vmul.f32 %v1303_v3, %v1272_v55  ;;  %v1300_v16 = vmul.f32 %v1298_v2, %v1267_v57  ;;  %v5531_v29 = vld [vmem:[%s6669_s22 + $0x8] sm:$0xff]  ;;  %v5530_v38 = vld [vmem:[%s6669_s22] sm:$0xff]  ;;  %s8772_s22 = sld [smem:[#allocation29_spill]] }
  0xd2   : > { %5383 = vst [vmem:[%s6705_s6 + $0x28] sm:$0xff] %v1271_v58  ;;  %v1308_v9 = vadd.f32 %v1304_v6, %v1299_v5  ;;  %v1305_v17 = vmul.f32 %v1303_v3, %v1271_v58  ;;  %v1315_v22 = vmul.f32 %v1312_v7, %v1276_v56  ;;  %v1314_v26 = vmul.f32 %v1312_v7, %v1275_v59 }
  0xd3   : > { %5387 = vst [vmem:[%s6705_s6 + $0x48] sm:$0xff] %v1275_v59  ;;  %1495 = vmatpush.bf16.msra.mxu1 %v5536_v1  ;;  %5576 = vmatpush.bf16.msra.mxu3 %v5536_v1  ;;  %v1310_v21 = vadd.f32 %v1306_v13, %v1301_v12  ;;  %v1302_v27 = vmul.f32 %v1298_v2, %v1269_v60 }
  0xd4   : > { %1250 = vmatpush.bf16.msra.mxu0 %v5526_v44  ;;  %5570 = vmatpush.bf16.msra.mxu2 %v5526_v44  ;;  %1281 = vst [vmem:[%s6705_s6 + $0x18] sm:$0xff] %v1269_v60  ;;  %v1317_v15 = vadd.f32 %v1313_v10, %v1308_v9  ;;  %v1309_v25 = vadd.f32 %v1305_v17, %v1300_v16 }
  0xd5   : > { %5385 = vst [vmem:[%s6705_s6 + $0x38] sm:$0xff] %v1273_v61  ;;  %v1307_v28 = vmul.f32 %v1303_v3, %v1273_v61  ;;  %v1319_v30 = vadd.f32 %v1315_v22, %v1310_v21  ;;  %v1316_v41 = vmul.f32 %v1312_v7, %v1277_v62 }
  0xd6   : > { %5389 = vst [vmem:[%s6705_s6 + $0x58] sm:$0xff] %v1277_v62  ;;  %v1318_v34 = vadd.f32 %v1314_v26, %v1309_v25 }
  0xd7   : > { %1496 = vmatpush.bf16.msra.mxu1 %v5535_v4  ;;  %5577 = vmatpush.bf16.msra.mxu3 %v5535_v4  ;;  %v1311_v37 = vadd.f32 %v1307_v28, %v1302_v27  ;;  %s5398_s13 = sshll.u32 %s8772_s22, 5 }
  0xd8   : > { %1251 = vmatpush.bf16.msra.mxu0 %v5525_v45  ;;  %5571 = vmatpush.bf16.msra.mxu2 %v5525_v45  ;;  %s6788_s26 = scalar_lea.vmem [#allocation3], %s5398_s13 }
  0xd9   : > { %v1320_v45 = vadd.f32 %v1316_v41, %v1311_v37 }
  0xdb   : > { %1497 = vmatpush.bf16.msra.mxu1 %v5534_v8  ;;  %5578 = vmatpush.bf16.msra.mxu3 %v5534_v8 }
  0xdc   : > { %1252 = vmatpush.bf16.msra.mxu0 %v5524_v46  ;;  %5572 = vmatpush.bf16.msra.mxu2 %v5524_v46 }
  0xdf   : > { %1498 = vmatpush.bf16.msra.mxu1 %v5533_v14  ;;  %5579 = vmatpush.bf16.msra.mxu3 %v5533_v14 }
  0xe0   : > { %1253 = vmatpush.bf16.msra.mxu0 %v5523_v47  ;;  %5573 = vmatpush.bf16.msra.mxu2 %v5523_v47 }
  0xe3   : > { %1499 = vmatpush.bf16.msra.mxu1 %v5532_v19  ;;  %5580 = vmatpush.bf16.msra.mxu3 %v5532_v19 }
  0xe4   : > { %1254 = vmatpush.bf16.msra.mxu0 %v5522_v48  ;;  %5574 = vmatpush.bf16.msra.mxu2 %v5522_v48 }
  0xe7   : > { %1255 = vmatmul.bf16.vlgmr.msra.gmra.mxu0 %v5520_v49  ;;  %1260 = vmatmul.bf16.vlgmr.msra.gmra.mxu2 %v5521_v50 }
  0xe8   : > { %1500 = vmatpush.bf16.msra.mxu1 %v5531_v29  ;;  %5581 = vmatpush.bf16.msra.mxu3 %v5531_v29 }
  0xec   : > { %1501 = vmatpush.bf16.msra.mxu1 %v5530_v38  ;;  %5582 = vmatpush.bf16.msra.mxu3 %v5530_v38 }
 0x164   : > { %v1256_v18 = vpop.f32.mrf.mxu0 }
 0x165   : > { %5390 = vst [vmem:[%s6705_s6 + $0x60] sm:$0xff] %v1256_v18  ;;  %v1322_v20 = vmul.f32 %v1321_v11, %v1256_v18 }
 0x167   : > { %v1326_v24 = vadd.f32 %v1322_v20, %v1317_v15 }
 0x169   : > { %v6770_v31 = vadd.f32 %v5718_v23, %v1326_v24 }
 0x16a   : > { %v1261_v32 = vpop.f32.mrf.mxu2 }
 0x16b   : > { %5392 = vst [vmem:[%s6705_s6 + $0x70] sm:$0xff] %v1261_v32  ;;  %v1324_v33 = vmul.f32 %v1321_v11, %v1261_v32  ;;  %v5394_v35 = vmul.f32 -1.442695, %v6770_v31 }
 0x16c   : > { %v1258_v36 = vpop.f32.mrf.mxu0 }
 0x16d   : > { %v1328_v39 = vadd.f32 %v1324_v33, %v1319_v30  ;;  %5391 = vst [vmem:[%s6705_s6 + $0x68] sm:$0xff] %v1258_v36  ;;  %v1323_v40 = vmul.f32 %v1321_v11, %v1258_v36  ;;  %5719 = vpow2.f32 %v5394_v35 }
 0x16f   : > { %v1327_v42 = vadd.f32 %v1323_v40, %v1318_v34  ;;  %v6776_v43 = vadd.f32 %v5718_v23, %v1328_v39 }
 0x171   : > { %v6778_v44 = vadd.f32 %v5718_v23, %v1327_v42  ;;  %v5396_v46 = vmul.f32 -1.442695, %v6776_v43 }
 0x172   : > { %v1263_v47 = vpop.f32.mrf.mxu2 }
 0x173   : > { %v5720_v48 = vpop.eup %5719  ;;  %v5395_v49 = vmul.f32 -1.442695, %v6778_v44  ;;  %5393 = vst [vmem:[%s6705_s6 + $0x78] sm:$0xff] %v1263_v47  ;;  %v1325_v50 = vmul.f32 %v1321_v11, %v1263_v47  ;;  %5721 = vpow2.f32 %v5396_v46  ;;  %v1425_v46 = vld [vmem:[#allocation4 + $0x10] sm:$0xff] }
 0x174   : > { %v1350_v51 = vadd.f32 1.0, %v5720_v48 }
 0x175   : > { %5723 = vpow2.f32 %v5395_v49  ;;  %v1329_v52 = vadd.f32 %v1325_v50, %v1320_v45  ;;  %v1426_v49 = vld [vmem:[#allocation4] sm:$0xff] }
 0x176   : > { %5725 = vrcp.f32 %v1350_v51  ;;  %v1365_v61 = vand.u32 2147483648, %v1350_v51  ;;  %vm1359_vm0 = vweird.f32 %v1350_v51  ;;  %v1363_v63 = vand.u32 2147483647, %v1350_v51 }
 0x177   : > { %v6783_v53 = vadd.f32 %v5718_v23, %v1329_v52  ;;  %v1427_v52 = vld [vmem:[#allocation4 + $0x18] sm:$0xff] }
 0x178   : > { %v1366_v4 = vor.u32 1.1754944e-38, %v1365_v61  ;;  %vm1364_vm3 = vcmp.eq.f32.partialorder %v1363_v63, 8.507059e+37 }
 0x179   : > { %v5722_v54 = vpop.eup %5721  ;;  %v5397_v55 = vmul.f32 -1.442695, %v6783_v53 }
 0x17a   : > { %v1352_v56 = vadd.f32 1.0, %v5722_v54 }
 0x17b   : > { %v5724_v57 = vpop.eup %5723  ;;  %5727 = vpow2.f32 %v5397_v55 }
 0x17c   : > { %v5726_v58 = vpop.eup %5725  ;;  %v1351_v59 = vadd.f32 1.0, %v5724_v57  ;;  %5729 = vrcp.f32 %v1352_v56  ;;  %v1393_v12 = vand.u32 2147483647, %v1352_v56  ;;  %v1395_v13 = vand.u32 2147483648, %v1352_v56 }
 0x17d   : > { %v1355_v60 = vmul.f32 %v5726_v58, %v1350_v51  ;;  %vm1360_vm1 = vweird.f32 %v5726_v58  ;;  %vm1389_vm5 = vweird.f32 %v1352_v56 }
 0x17e   : > { %5731 = vrcp.f32 %v1351_v59  ;;  %vm1361_vm2 = vmor %vm1359_vm0, %vm1360_vm1  ;;  %v1380_v17 = vand.u32 2147483648, %v1351_v59  ;;  %v1378_v19 = vand.u32 2147483647, %v1351_v59  ;;  %vm1374_vm7 = vweird.f32 %v1351_v59 }
 0x17f   : > { %v1356_v62 = vsub.f32 1.0, %v1355_v60  ;;  %v1396_v22 = vor.u32 1.1754944e-38, %v1395_v13  ;;  %vm1394_vm9 = vcmp.eq.f32.partialorder %v1393_v12, 8.507059e+37 }
 0x180   : > { %v1381_v26 = vor.u32 1.1754944e-38, %v1380_v17  ;;  %vm1379_vm11 = vcmp.eq.f32.partialorder %v1378_v19, 8.507059e+37 }
 0x181   : > { %v5728_v0 = vpop.eup %5727  ;;  %v1357_v1 = vmul.f32 %v5726_v58, %v1356_v62 }
 0x182   : > { %v5730_v2 = vpop.eup %5729  ;;  %v1353_v3 = vadd.f32 1.0, %v5728_v0 }
 0x183   : > { %v1358_v5 = vadd.f32 %v5726_v58, %v1357_v1  ;;  %v1385_v6 = vmul.f32 %v5730_v2, %v1352_v56  ;;  %vm1390_vm4 = vweird.f32 %v5730_v2 }
 0x184   : > { %v5732_v7 = vpop.eup %5731  ;;  %5733 = vrcp.f32 %v1353_v3  ;;  %vm1391_vm8 = vmor %vm1389_vm5, %vm1390_vm4  ;;  %v1410_v32 = vand.u32 2147483648, %v1353_v3  ;;  %v1408_v35 = vand.u32 2147483647, %v1353_v3  ;;  %vm1404_vm13 = vweird.f32 %v1353_v3 }
 0x185   : > { %v1362_v8 = vsel %vm1361_vm2, %v5726_v58, %v1358_v5  ;;  %v1370_v9 = vmul.f32 %v5732_v7, %v1351_v59  ;;  %v1386_v10 = vsub.f32 1.0, %v1385_v6  ;;  %vm1375_vm6 = vweird.f32 %v5732_v7 }
 0x186   : > { %v1367_v11 = vsel %vm1364_vm3, %v1366_v4, %v1362_v8  ;;  %vm1376_vm10 = vmor %vm1374_vm7, %vm1375_vm6  ;;  %v1411_v38 = vor.u32 1.1754944e-38, %v1410_v32  ;;  %vm1409_vm15 = vcmp.eq.f32.partialorder %v1408_v35, 8.507059e+37 }
 0x187   : > { %v1371_v14 = vsub.f32 1.0, %v1370_v9  ;;  %v1414_v15 = vmul.f32 %v1367_v11, %v6770_v31  ;;  %v1387_v16 = vmul.f32 %v5730_v2, %v1386_v10 }
 0x189   : > { %v1372_v18 = vmul.f32 %v5732_v7, %v1371_v14  ;;  %1420 = vst [vmem:[%s6788_s26] sm:$0xff] %v1414_v15  ;;  %v1388_v20 = vadd.f32 %v5730_v2, %v1387_v16 }
 0x18a   : > { %v5734_v21 = vpop.eup %5733 }
 0x18b   : > { %v1373_v23 = vadd.f32 %v5732_v7, %v1372_v18  ;;  %v1392_v24 = vsel %vm1391_vm8, %v5730_v2, %v1388_v20  ;;  %v1400_v25 = vmul.f32 %v5734_v21, %v1353_v3  ;;  %vm1405_vm12 = vweird.f32 %v5734_v21 }
 0x18c   : > { %v1397_v27 = vsel %vm1394_vm9, %v1396_v22, %v1392_v24  ;;  %vm1406_vm14 = vmor %vm1404_vm13, %vm1405_vm12 }
 0x18d   : > { %v1377_v28 = vsel %vm1376_vm10, %v5732_v7, %v1373_v23  ;;  %v1401_v29 = vsub.f32 1.0, %v1400_v25  ;;  %v1416_v30 = vmul.f32 %v1397_v27, %v6776_v43  ;;  %v1424_v43 = vld [vmem:[#allocation4 + $0x8] sm:$0xff] }
 0x18e   : > { %v1382_v31 = vsel %vm1379_vm11, %v1381_v26, %v1377_v28 }
 0x18f   : > { %v1415_v33 = vmul.f32 %v1382_v31, %v6778_v44  ;;  %v1402_v34 = vmul.f32 %v5734_v21, %v1401_v29  ;;  %1422 = vst [vmem:[%s6788_s26 + $0x10] sm:$0xff] %v1416_v30 }
 0x191   : > { %1421 = vst [vmem:[%s6788_s26 + $0x8] sm:$0xff] %v1415_v33  ;;  %v1428_v36 = vpack.c.bf16 %v1415_v33, %v1414_v15  ;;  %v1403_v37 = vadd.f32 %v5734_v21, %v1402_v34 }
 0x193   : > { %1502 = vmatmul.bf16.vlgmr.msra.gmra.mxu1 %v1428_v36  ;;  %v1407_v39 = vsel %vm1406_vm14, %v5734_v21, %v1403_v37 }
 0x194   : > { %v1412_v40 = vsel %vm1409_vm15, %v1411_v38, %v1407_v39 }
 0x195   : > { %v1417_v41 = vmul.f32 %v1412_v40, %v6783_v53 }
 0x197   : > { %1423 = vst [vmem:[%s6788_s26 + $0x18] sm:$0xff] %v1417_v41  ;;  %v1429_v42 = vpack.c.bf16 %v1417_v41, %v1416_v30 }
 0x199   : > { %1507 = vmatmul.bf16.vlgmr.msra.gmra.mxu3 %v1429_v42 }
 0x210   : > { %v1503_v44 = vpop.f32.mrf.mxu1 }
 0x211   : > { %v1513_v45 = vadd.f32 %v1503_v44, %v1424_v43 }
 0x213   : > { %1517 = vst [vmem:[#allocation4 + $0x8] sm:$0xff] %v1513_v45 }
 0x218   : > { %v1505_v47 = vpop.f32.mrf.mxu1 }
 0x219   : > { %v1514_v48 = vadd.f32 %v1505_v47, %v1425_v46 }
 0x21b   : > { %1518 = vst [vmem:[#allocation4 + $0x10] sm:$0xff] %v1514_v48 }
 0x21c   : > { %v1508_v50 = vpop.f32.mrf.mxu3 }
 0x21d   : > { %v1515_v51 = vadd.f32 %v1508_v50, %v1426_v49 }
 0x21f   : > { %1519 = vst [vmem:[#allocation4] sm:$0xff] %v1515_v51 }
 0x224   : > { %v1510_v54 = vpop.f32.mrf.mxu3 }
 0x225   : > { %v1516_v55 = vadd.f32 %v1510_v54, %v1427_v52 }
 0x227   : > { %1520 = vst [vmem:[#allocation4 + $0x18] sm:$0xff] %v1516_v55 }
 0x228 PF: > { %p5431_p12 = scmp.ne.s32.totalorder %s6252_s25, 1 }
 0x22a   : > { %1524 = sbr.rel (%p5431_p12) target bundleno = 1931 (0x78b), region = 212 }
 0x22f   : > { %s8773_s4 = sld [smem:[#allocation29_spill]] }
 0x235   : > { %p5432_p7 = scmp.ne.s32.totalorder %s8773_s4, 0 }
 0x237   : > { %1527 = sbr.rel (%p5432_p7) target bundleno = 1310 (0x51e), region = 216 }
 0x23c   : > { %v1538_v53 = vlaneseq  ;;  %v6799_v56 = vld [vmem:[#allocation4 + $0x8] sm:$0xff]  ;;  %vm1532_vm0 = vcmask 64512   ;;  %v1529_v0 = vld [vmem:[#allocation4 + $0x10] sm:$0xff]  ;;  %vm1953_vm1 = vcmask 7168   ;;  %v1530_v16 = vld [vmem:[#allocation4] sm:$0xff] }
 0x23d   : > { %1533 = vst.msk [vmem:[#allocation5] sm:$0xff] %vm1532_vm0, %v6799_v56  ;;  %v6812_v59 = vperm.slane %v6799_v56, 1  ;;  %v6815_v60 = vperm.slane %v6799_v56, 2  ;;  %v6827_v62 = vperm.slane %v6799_v56, 3  ;;  %v6834_v63 = vperm.slane %v6799_v56, 5  ;;  %v1531_v36 = vld [vmem:[#allocation4 + $0x18] sm:$0xff] }
 0x23e   : > { %v6803_v57 = vshrl.u32 %v1538_v53, 7  ;;  %1534 = vst.msk [vmem:[#allocation5 + $0x8] sm:$0xff] %vm1532_vm0, %v1529_v0  ;;  %v6840_v1 = vperm.slane %v6799_v56, 4  ;;  %v6843_v2 = vperm.slane %v6799_v56, 6  ;;  %v6850_v3 = vperm.slane %v6799_v56, 7 }
 0x23f   : > { %v6854_v4 = vperm.slane %v1529_v0, 0  ;;  %v6860_v5 = vperm.slane %v1529_v0, 2  ;;  %v6865_v7 = vperm.slane %v1529_v0, 1  ;;  %v6867_v8 = vperm.slane %v1529_v0, 3  ;;  %1535 = vst.msk [vmem:[#allocation5 + $0x10] sm:$0xff] %vm1532_vm0, %v1530_v16 }
 0x240   : > { %v6806_v58 = vadd.s32 8, %v6803_v57  ;;  %v6820_v61 = vadd.s32 16, %v6803_v57  ;;  %v6874_v10 = vperm.slane %v1529_v0, 4  ;;  %v6880_v13 = vperm.slane %v1529_v0, 5  ;;  %1536 = vst.msk [vmem:[#allocation5 + $0x18] sm:$0xff] %vm1532_vm0, %v1531_v36 }
 0x241   : > { %v6889_v17 = vperm.slane %v1529_v0, 7  ;;  %v6894_v19 = vperm.slane %v1529_v0, 6  ;;  %v6896_v20 = vperm.slane %v1530_v16, 0  ;;  %v6904_v23 = vperm.slane %v1530_v16, 1 }
 0x242   : > { %5736 = vset.pattern.permute.xlu1 %v6806_v58  ;;  %5738 = vset.pattern.permute.xlu2 %v6806_v58  ;;  %v6910_v26 = vperm.slane %v1530_v16, 2  ;;  %v6918_v29 = vperm.slane %v1530_v16, 4  ;;  %v6923_v32 = vperm.slane %v1530_v16, 3  ;;  %v6926_v33 = vperm.slane %v1530_v16, 5 }
 0x243   : > { %5735 = vset.pattern.permute.xlu0 %v6806_v58  ;;  %v6935_v37 = vperm.slane %v1530_v16, 6  ;;  %v6941_v40 = vperm.slane %v1530_v16, 7  ;;  %v6949_v43 = vperm.slane %v1531_v36, 1  ;;  %v6954_v46 = vperm.slane %v1531_v36, 0 }
 0x244   : > { %v6957_v47 = vperm.slane %v1531_v36, 2  ;;  %v6965_v50 = vperm.slane %v1531_v36, 3  ;;  %v6971_v54 = vperm.slane %v1531_v36, 4  ;;  %v1537_v0 = vperm.slane %v6799_v56, 0 }
 0x245   : > { %v7002_v16 = vadd.s32 24, %v6803_v57 }
 0x24a   : > { %1555 = vperm.xlu1 %5736, %v6812_v59   ;;  %1568 = vperm.xlu2 %5738, %v6815_v60  }
 0x24b   : > { %1542 = vperm.xlu0 %5735, %v1537_v0  }
 0x252   : > { %5737 = vset.pattern.permute.xlu1 %v6820_v61  ;;  %5739 = vset.pattern.permute.xlu2 %v6820_v61 }
 0x253   : > { %1594 = vperm.xlu0 %5735, %v6840_v1  }
 0x25a   : > { %1561 = vperm.xlu1 %5737, %v6812_v59   ;;  %1574 = vperm.xlu2 %5739, %v6815_v60  }
 0x25b   : > { %1659 = vperm.xlu0 %5735, %v6865_v7  }
 0x262   : > { %5740 = vset.pattern.permute.xlu1 %v6806_v58  ;;  %1587 = vperm.xlu2 %5739, %v6827_v62  }
 0x263   : > { %1724 = vperm.xlu0 %5735, %v6894_v19  }
 0x26a   : > { %1581 = vperm.xlu1 %5740, %v6827_v62   ;;  %5742 = vset.pattern.permute.xlu2 %v6806_v58 }
 0x26b   : > { %1789 = vperm.xlu0 %5735, %v6923_v32  }
 0x272   : > { %5741 = vset.pattern.permute.xlu1 %v6820_v61  ;;  %1607 = vperm.xlu2 %5742, %v6834_v63  }
 0x273   : > { %1854 = vperm.xlu0 %5735, %v6954_v46  }
 0x27a   : > { %1600 = vperm.xlu1 %5741, %v6840_v1   ;;  %1620 = vperm.xlu2 %5742, %v6843_v2  }
 0x282   : > { %1613 = vperm.xlu1 %5741, %v6834_v63   ;;  %5744 = vset.pattern.permute.xlu2 %v6820_v61 }
 0x28a   : > { %5743 = vset.pattern.permute.xlu1 %v6806_v58  ;;  %1639 = vperm.xlu2 %5744, %v6850_v3  }
 0x292   : > { %1633 = vperm.xlu1 %5743, %v6850_v3   ;;  %1652 = vperm.xlu2 %5744, %v6854_v4  }
 0x29a   : > { %1646 = vperm.xlu1 %5743, %v6854_v4   ;;  %5746 = vset.pattern.permute.xlu2 %v6806_v58 }
 0x2a2   : > { %5745 = vset.pattern.permute.xlu1 %v6820_v61  ;;  %1672 = vperm.xlu2 %5746, %v6860_v5  }
 0x2a4   : > { %v1569_v6 = vpop.permute.xlu2 %1568 }
 0x2a5   : > { %1958 = vst.msk [vmem:[#allocation6 + $0x20] sm:$0xff] %vm1953_vm1, %v1569_v6  ;;  %v6980_v6 = vperm.slane %v1531_v36, 6 }
 0x2aa   : > { %1665 = vperm.xlu1 %5745, %v6865_v7   ;;  %1685 = vperm.xlu2 %5746, %v6867_v8  }
 0x2b2   : > { %1678 = vperm.xlu1 %5745, %v6860_v5   ;;  %5748 = vset.pattern.permute.xlu2 %v6820_v61 }
 0x2b4   : > { %v1575_v9 = vpop.permute.xlu2 %1574 }
 0x2b5   : > { %1959 = vst.msk [vmem:[#allocation6 + $0x28] sm:$0xff] %vm1953_vm1, %v1575_v9 }
 0x2ba   : > { %5747 = vset.pattern.permute.xlu1 %v6806_v58  ;;  %1704 = vperm.xlu2 %5748, %v6874_v10  }
 0x2bc   : > { %v1556_v11 = vpop.permute.xlu1 %1555  ;;  %v1588_v12 = vpop.permute.xlu2 %1587 }
 0x2bd   : > { %1956 = vst.msk [vmem:[#allocation6 + $0x10] sm:$0xff] %vm1953_vm1, %v1556_v11 }
 0x2be   : > { %1961 = vst.msk [vmem:[#allocation6 + $0x38] sm:$0xff] %vm1953_vm1, %v1588_v12  ;;  %v6985_v12 = vperm.slane %v1531_v36, 5 }
 0x2c0   : > { %1919 = vperm.xlu0 %5735, %v6985_v12  }
 0x2c2   : > { %1698 = vperm.xlu1 %5747, %v6874_v10   ;;  %1717 = vperm.xlu2 %5748, %v6880_v13  }
 0x2c8   : > { %5761 = vset.pattern.permute.xlu0 %v6820_v61 }
 0x2ca   : > { %1711 = vperm.xlu1 %5747, %v6880_v13   ;;  %5750 = vset.pattern.permute.xlu2 %v6806_v58 }
 0x2cc   : > { %v1562_v14 = vpop.permute.xlu1 %1561  ;;  %v1608_v15 = vpop.permute.xlu2 %1607 }
 0x2cd   : > { %1957 = vst.msk [vmem:[#allocation6 + $0x18] sm:$0xff] %vm1953_vm1, %v1562_v14  ;;  %v6995_v14 = vadd.s32 32, %v6803_v57 }
 0x2ce   : > { %1964 = vst.msk [vmem:[#allocation6 + $0x50] sm:$0xff] %vm1953_vm1, %v1608_v15 }
 0x2d0   : > { %1548 = vperm.xlu0 %5761, %v1537_v0  }
 0x2d2   : > { %5749 = vset.pattern.permute.xlu1 %v6820_v61  ;;  %1737 = vperm.xlu2 %5750, %v6889_v17  }
 0x2d4   : > { %v1621_v18 = vpop.permute.xlu2 %1620 }
 0x2d5   : > { %1966 = vst.msk [vmem:[#allocation6 + $0x60] sm:$0xff] %vm1953_vm1, %v1621_v18 }
 0x2d8   : > { %1626 = vperm.xlu0 %5761, %v6843_v2  }
 0x2da   : > { %1730 = vperm.xlu1 %5749, %v6894_v19   ;;  %1750 = vperm.xlu2 %5750, %v6896_v20  }
 0x2dc   : > { %v1582_v21 = vpop.permute.xlu1 %1581 }
 0x2dd   : > { %1960 = vst.msk [vmem:[#allocation6 + $0x30] sm:$0xff] %vm1953_vm1, %v1582_v21 }
 0x2e0   : > { %1691 = vperm.xlu0 %5761, %v6867_v8  }
 0x2e2   : > { %1743 = vperm.xlu1 %5749, %v6889_v17   ;;  %5752 = vset.pattern.permute.xlu2 %v6820_v61 }
 0x2e4   : > { %v1640_v22 = vpop.permute.xlu2 %1639 }
 0x2e5   : > { %1969 = vst.msk [vmem:[#allocation6 + $0x78] sm:$0xff] %vm1953_vm1, %v1640_v22 }
 0x2e8   : > { %1756 = vperm.xlu0 %5761, %v6896_v20  }
 0x2ea   : > { %5751 = vset.pattern.permute.xlu1 %v6806_v58  ;;  %1769 = vperm.xlu2 %5752, %v6904_v23  }
 0x2ec   : > { %v1601_v24 = vpop.permute.xlu1 %1600  ;;  %v1653_v25 = vpop.permute.xlu2 %1652 }
 0x2ed   : > { %1963 = vst.msk [vmem:[#allocation6 + $0x48] sm:$0xff] %vm1953_vm1, %v1601_v24 }
 0x2ee   : > { %1971 = vst.msk [vmem:[#allocation6 + $0x88] sm:$0xff] %vm1953_vm1, %v1653_v25 }
 0x2f0   : > { %1821 = vperm.xlu0 %5761, %v6926_v33  }
 0x2f2   : > { %1763 = vperm.xlu1 %5751, %v6904_v23   ;;  %1782 = vperm.xlu2 %5752, %v6910_v26  }
 0x2f4   : > { %v1614_v27 = vpop.permute.xlu1 %1613 }
 0x2f5   : > { %1965 = vst.msk [vmem:[#allocation6 + $0x58] sm:$0xff] %vm1953_vm1, %v1614_v27 }
 0x2f8   : > { %1886 = vperm.xlu0 %5761, %v6957_v47  }
 0x2fa   : > { %1776 = vperm.xlu1 %5751, %v6910_v26   ;;  %5754 = vset.pattern.permute.xlu2 %v6806_v58 }
 0x2fc   : > { %v1673_v28 = vpop.permute.xlu2 %1672 }
 0x2fd   : > { %1974 = vst.msk [vmem:[#allocation6 + $0xa0] sm:$0xff] %vm1953_vm1, %v1673_v28 }
 0x302   : > { %5753 = vset.pattern.permute.xlu1 %v6820_v61  ;;  %1802 = vperm.xlu2 %5754, %v6918_v29  }
 0x304   : > { %v1634_v30 = vpop.permute.xlu1 %1633  ;;  %v1686_v31 = vpop.permute.xlu2 %1685 }
 0x305   : > { %1968 = vst.msk [vmem:[#allocation6 + $0x70] sm:$0xff] %vm1953_vm1, %v1634_v30 }
 0x306   : > { %1976 = vst.msk [vmem:[#allocation6 + $0xb0] sm:$0xff] %vm1953_vm1, %v1686_v31 }
 0x30a   : > { %1795 = vperm.xlu1 %5753, %v6923_v32   ;;  %1815 = vperm.xlu2 %5754, %v6926_v33  }
 0x30c   : > { %v1647_v34 = vpop.permute.xlu1 %1646 }
 0x30d   : > { %1970 = vst.msk [vmem:[#allocation6 + $0x80] sm:$0xff] %vm1953_vm1, %v1647_v34 }
 0x312   : > { %1808 = vperm.xlu1 %5753, %v6918_v29   ;;  %5756 = vset.pattern.permute.xlu2 %v6820_v61 }
 0x314   : > { %v1705_v35 = vpop.permute.xlu2 %1704 }
 0x315   : > { %1979 = vst.msk [vmem:[#allocation6 + $0xc8] sm:$0xff] %vm1953_vm1, %v1705_v35 }
 0x31a   : > { %5755 = vset.pattern.permute.xlu1 %v6806_v58  ;;  %1834 = vperm.xlu2 %5756, %v6935_v37  }
 0x31c   : > { %v1666_v38 = vpop.permute.xlu1 %1665  ;;  %v1718_v39 = vpop.permute.xlu2 %1717 }
 0x31d   : > { %1973 = vst.msk [vmem:[#allocation6 + $0x98] sm:$0xff] %vm1953_vm1, %v1666_v38 }
 0x31e   : > { %1981 = vst.msk [vmem:[#allocation6 + $0xd8] sm:$0xff] %vm1953_vm1, %v1718_v39  ;;  %v1543_v39 = vpop.permute.xlu0 %1542 }
 0x31f   : > { %1954 = vst.msk [vmem:[#allocation6] sm:$0xff] %vm1953_vm1, %v1543_v39 }
 0x322   : > { %1828 = vperm.xlu1 %5755, %v6935_v37   ;;  %1847 = vperm.xlu2 %5756, %v6941_v40  }
 0x324   : > { %v1679_v41 = vpop.permute.xlu1 %1678 }
 0x325   : > { %1975 = vst.msk [vmem:[#allocation6 + $0xa8] sm:$0xff] %vm1953_vm1, %v1679_v41 }
 0x32a   : > { %1841 = vperm.xlu1 %5755, %v6941_v40   ;;  %5758 = vset.pattern.permute.xlu2 %v6806_v58 }
 0x32c   : > { %v1738_v42 = vpop.permute.xlu2 %1737 }
 0x32d   : > { %1984 = vst.msk [vmem:[#allocation6 + $0xf0] sm:$0xff] %vm1953_vm1, %v1738_v42 }
 0x332   : > { %5757 = vset.pattern.permute.xlu1 %v6820_v61  ;;  %1867 = vperm.xlu2 %5758, %v6949_v43  }
 0x334   : > { %v1699_v44 = vpop.permute.xlu1 %1698  ;;  %v1751_v45 = vpop.permute.xlu2 %1750 }
 0x335   : > { %1978 = vst.msk [vmem:[#allocation6 + $0xc0] sm:$0xff] %vm1953_vm1, %v1699_v44 }
 0x336   : > { %1986 = vst.msk [vmem:[#allocation6 + $0x100] sm:$0xff] %vm1953_vm1, %v1751_v45 }
 0x33a   : > { %1860 = vperm.xlu1 %5757, %v6954_v46   ;;  %1880 = vperm.xlu2 %5758, %v6957_v47  }
 0x33c   : > { %v1712_v48 = vpop.permute.xlu1 %1711 }
 0x33d   : > { %1980 = vst.msk [vmem:[#allocation6 + $0xd0] sm:$0xff] %vm1953_vm1, %v1712_v48 }
 0x342   : > { %1873 = vperm.xlu1 %5757, %v6949_v43   ;;  %5760 = vset.pattern.permute.xlu2 %v6820_v61 }
 0x344   : > { %v1770_v49 = vpop.permute.xlu2 %1769 }
 0x345   : > { %1989 = vst.msk [vmem:[#allocation6 + $0x118] sm:$0xff] %vm1953_vm1, %v1770_v49 }
 0x34a   : > { %5759 = vset.pattern.permute.xlu1 %v6806_v58  ;;  %1899 = vperm.xlu2 %5760, %v6965_v50  }
 0x34c   : > { %v1731_v51 = vpop.permute.xlu1 %1730  ;;  %v1783_v52 = vpop.permute.xlu2 %1782 }
 0x34d   : > { %1983 = vst.msk [vmem:[#allocation6 + $0xe8] sm:$0xff] %vm1953_vm1, %v1731_v51 }
 0x34e   : > { %1991 = vst.msk [vmem:[#allocation6 + $0x128] sm:$0xff] %vm1953_vm1, %v1783_v52 }
 0x352   : > { %1893 = vperm.xlu1 %5759, %v6965_v50   ;;  %1912 = vperm.xlu2 %5760, %v6971_v54  }
 0x354   : > { %v1744_v55 = vpop.permute.xlu1 %1743 }
 0x355   : > { %1985 = vst.msk [vmem:[#allocation6 + $0xf8] sm:$0xff] %vm1953_vm1, %v1744_v55 }
 0x35a   : > { %1906 = vperm.xlu1 %5759, %v6971_v54   ;;  %5763 = vset.pattern.permute.xlu2 %v6806_v58  ;;  %v6988_v58 = vperm.slane %v1531_v36, 7 }
 0x35c   : > { %v1803_v53 = vpop.permute.xlu2 %1802  ;;  %1951 = vperm.xlu0 %5761, %v6988_v58  }
 0x35d   : > { %1994 = vst.msk [vmem:[#allocation6 + $0x140] sm:$0xff] %vm1953_vm1, %v1803_v53 }
 0x362   : > { %5762 = vset.pattern.permute.xlu1 %v6820_v61  ;;  %1932 = vperm.xlu2 %5763, %v6980_v6  }
 0x364   : > { %v1764_v9 = vpop.permute.xlu1 %1763  ;;  %v1816_v11 = vpop.permute.xlu2 %1815  ;;  %5766 = vset.pattern.permute.xlu0 %v7002_v16 }
 0x365   : > { %1988 = vst.msk [vmem:[#allocation6 + $0x110] sm:$0xff] %vm1953_vm1, %v1764_v9 }
 0x366   : > { %1996 = vst.msk [vmem:[#allocation6 + $0x150] sm:$0xff] %vm1953_vm1, %v1816_v11 }
 0x36a   : > { %1925 = vperm.xlu1 %5762, %v6985_v12   ;;  %1945 = vperm.xlu2 %5763, %v6988_v58  }
 0x36c   : > { %v1777_v56 = vpop.permute.xlu1 %1776  ;;  %2046 = vperm.xlu0 %5766, %v6815_v60  }
 0x36d   : > { %1990 = vst.msk [vmem:[#allocation6 + $0x120] sm:$0xff] %vm1953_vm1, %v1777_v56 }
 0x372   : > { %1938 = vperm.xlu1 %5762, %v6980_v6   ;;  %5765 = vset.pattern.permute.xlu2 %v6995_v14 }
 0x374   : > { %v1835_v15 = vpop.permute.xlu2 %1834  ;;  %2106 = vperm.xlu0 %5766, %v6850_v3  }
 0x375   : > { %1999 = vst.msk [vmem:[#allocation6 + $0x168] sm:$0xff] %vm1953_vm1, %v1835_v15 }
 0x37a   : > { %5764 = vset.pattern.permute.xlu1 %v7002_v16  ;;  %2028 = vperm.xlu2 %5765, %v1537_v0  }
 0x37c   : > { %v1796_v18 = vpop.permute.xlu1 %1795  ;;  %v1848_v21 = vpop.permute.xlu2 %1847  ;;  %2166 = vperm.xlu0 %5766, %v6874_v10  }
 0x37d   : > { %1993 = vst.msk [vmem:[#allocation6 + $0x138] sm:$0xff] %vm1953_vm1, %v1796_v18 }
 0x37e   : > { %2001 = vst.msk [vmem:[#allocation6 + $0x178] sm:$0xff] %vm1953_vm1, %v1848_v21 }
 0x382   : > { %2022 = vperm.xlu1 %5764, %v1537_v0   ;;  %2040 = vperm.xlu2 %5765, %v6812_v59  }
 0x384   : > { %v1809_v22 = vpop.permute.xlu1 %1808  ;;  %2226 = vperm.xlu0 %5766, %v6904_v23  }
 0x385   : > { %1995 = vst.msk [vmem:[#allocation6 + $0x148] sm:$0xff] %vm1953_vm1, %v1809_v22 }
 0x38a   : > { %2034 = vperm.xlu1 %5764, %v6812_v59   ;;  %5768 = vset.pattern.permute.xlu2 %v7002_v16 }
 0x38c   : > { %v1868_v57 = vpop.permute.xlu2 %1867  ;;  %2286 = vperm.xlu0 %5766, %v6935_v37  }
 0x38d   : > { %2004 = vst.msk [vmem:[#allocation6 + $0x190] sm:$0xff] %vm1953_vm1, %v1868_v57 }
 0x392   : > { %5767 = vset.pattern.permute.xlu1 %v6995_v14  ;;  %2058 = vperm.xlu2 %5768, %v6827_v62  }
 0x394   : > { %v1829_v24 = vpop.permute.xlu1 %1828  ;;  %v1881_v25 = vpop.permute.xlu2 %1880  ;;  %2346 = vperm.xlu0 %5766, %v6965_v50  }
 0x395   : > { %1998 = vst.msk [vmem:[#allocation6 + $0x160] sm:$0xff] %vm1953_vm1, %v1829_v24 }
 0x396   : > { %2006 = vst.msk [vmem:[#allocation6 + $0x1a0] sm:$0xff] %vm1953_vm1, %v1881_v25 }
 0x39a   : > { %2052 = vperm.xlu1 %5767, %v6815_v60   ;;  %2070 = vperm.xlu2 %5768, %v6840_v1  }
 0x39c   : > { %v1842_v59 = vpop.permute.xlu1 %1841  ;;  %5787 = vset.pattern.permute.xlu0 %v6995_v14 }
 0x39d   : > { %2000 = vst.msk [vmem:[#allocation6 + $0x170] sm:$0xff] %vm1953_vm1, %v1842_v59 }
 0x3a2   : > { %2064 = vperm.xlu1 %5767, %v6827_v62   ;;  %5770 = vset.pattern.permute.xlu2 %v6995_v14 }
 0x3a4   : > { %v1900_v27 = vpop.permute.xlu2 %1899  ;;  %2076 = vperm.xlu0 %5787, %v6840_v1  }
 0x3a5   : > { %2009 = vst.msk [vmem:[#allocation6 + $0x1b8] sm:$0xff] %vm1953_vm1, %v1900_v27 }
 0x3aa   : > { %5769 = vset.pattern.permute.xlu1 %v7002_v16  ;;  %2088 = vperm.xlu2 %5770, %v6834_v63  }
 0x3ac   : > { %v1861_v61 = vpop.permute.xlu1 %1860  ;;  %v1913_v28 = vpop.permute.xlu2 %1912  ;;  %2136 = vperm.xlu0 %5787, %v6865_v7  }
 0x3ad   : > { %2003 = vst.msk [vmem:[#allocation6 + $0x188] sm:$0xff] %vm1953_vm1, %v1861_v61 }
 0x3ae   : > { %2011 = vst.msk [vmem:[#allocation6 + $0x1c8] sm:$0xff] %vm1953_vm1, %v1913_v28 }
 0x3b2   : > { %2082 = vperm.xlu1 %5769, %v6834_v63   ;;  %2100 = vperm.xlu2 %5770, %v6843_v2  }
 0x3b4   : > { %v1874_v62 = vpop.permute.xlu1 %1873  ;;  %2196 = vperm.xlu0 %5787, %v6894_v19  }
 0x3b5   : > { %2005 = vst.msk [vmem:[#allocation6 + $0x198] sm:$0xff] %vm1953_vm1, %v1874_v62 }
 0x3ba   : > { %2094 = vperm.xlu1 %5769, %v6843_v2   ;;  %5772 = vset.pattern.permute.xlu2 %v7002_v16 }
 0x3bc   : > { %v1933_v30 = vpop.permute.xlu2 %1932  ;;  %2256 = vperm.xlu0 %5787, %v6923_v32  }
 0x3bd   : > { %2014 = vst.msk [vmem:[#allocation6 + $0x1e0] sm:$0xff] %vm1953_vm1, %v1933_v30 }
 0x3c2   : > { %5771 = vset.pattern.permute.xlu1 %v6995_v14  ;;  %2118 = vperm.xlu2 %5772, %v6854_v4  }
 0x3c4   : > { %v1894_v63 = vpop.permute.xlu1 %1893  ;;  %v1946_v31 = vpop.permute.xlu2 %1945  ;;  %2316 = vperm.xlu0 %5787, %v6954_v46  }
 0x3c5   : > { %2008 = vst.msk [vmem:[#allocation6 + $0x1b0] sm:$0xff] %vm1953_vm1, %v1894_v63 }
 0x3c6   : > { %2016 = vst.msk [vmem:[#allocation6 + $0x1f0] sm:$0xff] %vm1953_vm1, %v1946_v31 }
 0x3ca   : > { %2112 = vperm.xlu1 %5771, %v6850_v3   ;;  %2130 = vperm.xlu2 %5772, %v6865_v7   ;;  %v1595_v3 = vpop.permute.xlu0 %1594 }
 0x3cb   : > { %1962 = vst.msk [vmem:[#allocation6 + $0x40] sm:$0xff] %vm1953_vm1, %v1595_v3 }
 0x3cc   : > { %v1907_v2 = vpop.permute.xlu1 %1906  ;;  %2376 = vperm.xlu0 %5787, %v6985_v12  }
 0x3cd   : > { %2010 = vst.msk [vmem:[#allocation6 + $0x1c0] sm:$0xff] %vm1953_vm1, %v1907_v2 }
 0x3d2   : > { %2124 = vperm.xlu1 %5771, %v6854_v4   ;;  %5774 = vset.pattern.permute.xlu2 %v6995_v14  ;;  %v1660_v41 = vpop.permute.xlu0 %1659 }
 0x3d3   : > { %1972 = vst.msk [vmem:[#allocation6 + $0x90] sm:$0xff] %vm1953_vm1, %v1660_v41 }
 0x3d4   : > { %v2029_v34 = vpop.permute.xlu2 %2028 }
 0x3d5   : > { %2403 = vst.msk [vmem:[#allocation7 + $0x8] sm:$0xff] %vm1953_vm1, %v2029_v34 }
 0x3da   : > { %5773 = vset.pattern.permute.xlu1 %v7002_v16  ;;  %2148 = vperm.xlu2 %5774, %v6860_v5   ;;  %v1725_v44 = vpop.permute.xlu0 %1724 }
 0x3db   : > { %1982 = vst.msk [vmem:[#allocation6 + $0xe0] sm:$0xff] %vm1953_vm1, %v1725_v44 }
 0x3dc   : > { %v1926_v35 = vpop.permute.xlu1 %1925  ;;  %v2041_v36 = vpop.permute.xlu2 %2040 }
 0x3dd   : > { %2013 = vst.msk [vmem:[#allocation6 + $0x1d8] sm:$0xff] %vm1953_vm1, %v1926_v35 }
 0x3de   : > { %2405 = vst.msk [vmem:[#allocation7 + $0x18] sm:$0xff] %vm1953_vm1, %v2041_v36 }
 0x3e2   : > { %2142 = vperm.xlu1 %5773, %v6860_v5   ;;  %2160 = vperm.xlu2 %5774, %v6867_v8   ;;  %v1790_v48 = vpop.permute.xlu0 %1789 }
 0x3e3   : > { %1992 = vst.msk [vmem:[#allocation6 + $0x130] sm:$0xff] %vm1953_vm1, %v1790_v48 }
 0x3e4   : > { %v1939_v4 = vpop.permute.xlu1 %1938 }
 0x3e5   : > { %2015 = vst.msk [vmem:[#allocation6 + $0x1e8] sm:$0xff] %vm1953_vm1, %v1939_v4 }
 0x3ea   : > { %2154 = vperm.xlu1 %5773, %v6867_v8   ;;  %5776 = vset.pattern.permute.xlu2 %v7002_v16  ;;  %v1855_v49 = vpop.permute.xlu0 %1854 }
 0x3eb   : > { %2002 = vst.msk [vmem:[#allocation6 + $0x180] sm:$0xff] %vm1953_vm1, %v1855_v49 }
 0x3ec   : > { %v2059_v38 = vpop.permute.xlu2 %2058 }
 0x3ed   : > { %2408 = vst.msk [vmem:[#allocation7 + $0x30] sm:$0xff] %vm1953_vm1, %v2059_v38 }
 0x3f2   : > { %5775 = vset.pattern.permute.xlu1 %v6995_v14  ;;  %2178 = vperm.xlu2 %5776, %v6880_v13   ;;  %v1920_v52 = vpop.permute.xlu0 %1919 }
 0x3f3   : > { %2012 = vst.msk [vmem:[#allocation6 + $0x1d0] sm:$0xff] %vm1953_vm1, %v1920_v52 }
 0x3f4   : > { %v2023_v60 = vpop.permute.xlu1 %2022  ;;  %v2071_v5 = vpop.permute.xlu2 %2070 }
 0x3f5   : > { %2402 = vst.msk [vmem:[#allocation7] sm:$0xff] %vm1953_vm1, %v2023_v60 }
 0x3f6   : > { %2410 = vst.msk [vmem:[#allocation7 + $0x40] sm:$0xff] %vm1953_vm1, %v2071_v5 }
 0x3fa   : > { %2172 = vperm.xlu1 %5775, %v6874_v10   ;;  %2190 = vperm.xlu2 %5776, %v6894_v19   ;;  %v1549_v1 = vpop.permute.xlu0 %1548 }
 0x3fb   : > { %1955 = vst.msk [vmem:[#allocation6 + $0x8] sm:$0xff] %vm1953_vm1, %v1549_v1 }
 0x3fc   : > { %v2035_v8 = vpop.permute.xlu1 %2034 }
 0x3fd   : > { %2404 = vst.msk [vmem:[#allocation7 + $0x10] sm:$0xff] %vm1953_vm1, %v2035_v8 }
 0x402   : > { %2184 = vperm.xlu1 %5775, %v6880_v13   ;;  %5778 = vset.pattern.permute.xlu2 %v6995_v14  ;;  %v1627_v53 = vpop.permute.xlu0 %1626 }
 0x403   : > { %1967 = vst.msk [vmem:[#allocation6 + $0x68] sm:$0xff] %vm1953_vm1, %v1627_v53 }
 0x404   : > { %v2089_v42 = vpop.permute.xlu2 %2088 }
 0x405   : > { %2413 = vst.msk [vmem:[#allocation7 + $0x58] sm:$0xff] %vm1953_vm1, %v2089_v42 }
 0x40a   : > { %5777 = vset.pattern.permute.xlu1 %v7002_v16  ;;  %2208 = vperm.xlu2 %5778, %v6889_v17  }
 0x40c   : > { %v2053_v10 = vpop.permute.xlu1 %2052  ;;  %v2101_v45 = vpop.permute.xlu2 %2100 }
 0x40d   : > { %2407 = vst.msk [vmem:[#allocation7 + $0x28] sm:$0xff] %vm1953_vm1, %v2053_v10 }
 0x40e   : > { %2415 = vst.msk [vmem:[#allocation7 + $0x68] sm:$0xff] %vm1953_vm1, %v2101_v45 }
 0x412   : > { %2202 = vperm.xlu1 %5777, %v6889_v17   ;;  %2220 = vperm.xlu2 %5778, %v6896_v20  }
 0x414   : > { %v2065_v13 = vpop.permute.xlu1 %2064 }
 0x415   : > { %2409 = vst.msk [vmem:[#allocation7 + $0x38] sm:$0xff] %vm1953_vm1, %v2065_v13 }
 0x41a   : > { %2214 = vperm.xlu1 %5777, %v6896_v20   ;;  %5780 = vset.pattern.permute.xlu2 %v7002_v16 }
 0x41c   : > { %v2119_v51 = vpop.permute.xlu2 %2118 }
 0x41d   : > { %2418 = vst.msk [vmem:[#allocation7 + $0x80] sm:$0xff] %vm1953_vm1, %v2119_v51 }
 0x422   : > { %5779 = vset.pattern.permute.xlu1 %v6995_v14  ;;  %2238 = vperm.xlu2 %5780, %v6910_v26  }
 0x424   : > { %v2083_v17 = vpop.permute.xlu1 %2082  ;;  %v2131_v55 = vpop.permute.xlu2 %2130 }
 0x425   : > { %2412 = vst.msk [vmem:[#allocation7 + $0x50] sm:$0xff] %vm1953_vm1, %v2083_v17 }
 0x426   : > { %2420 = vst.msk [vmem:[#allocation7 + $0x90] sm:$0xff] %vm1953_vm1, %v2131_v55 }
 0x42a   : > { %2232 = vperm.xlu1 %5779, %v6904_v23   ;;  %2250 = vperm.xlu2 %5780, %v6923_v32   ;;  %v1692_v32 = vpop.permute.xlu0 %1691 }
 0x42b   : > { %1977 = vst.msk [vmem:[#allocation6 + $0xb8] sm:$0xff] %vm1953_vm1, %v1692_v32 }
 0x42c   : > { %v2095_v7 = vpop.permute.xlu1 %2094 }
 0x42d   : > { %2414 = vst.msk [vmem:[#allocation7 + $0x60] sm:$0xff] %vm1953_vm1, %v2095_v7 }
 0x432   : > { %2244 = vperm.xlu1 %5779, %v6910_v26   ;;  %5782 = vset.pattern.permute.xlu2 %v6995_v14  ;;  %v1757_v0 = vpop.permute.xlu0 %1756 }
 0x433   : > { %1987 = vst.msk [vmem:[#allocation6 + $0x108] sm:$0xff] %vm1953_vm1, %v1757_v0 }
 0x434   : > { %v2149_v20 = vpop.permute.xlu2 %2148 }
 0x435   : > { %2423 = vst.msk [vmem:[#allocation7 + $0xa8] sm:$0xff] %vm1953_vm1, %v2149_v20 }
 0x43a   : > { %5781 = vset.pattern.permute.xlu1 %v7002_v16  ;;  %2268 = vperm.xlu2 %5782, %v6918_v29   ;;  %v1822_v11 = vpop.permute.xlu0 %1821 }
 0x43b   : > { %1997 = vst.msk [vmem:[#allocation6 + $0x158] sm:$0xff] %vm1953_vm1, %v1822_v11 }
 0x43c   : > { %v2113_v19 = vpop.permute.xlu1 %2112  ;;  %v2161_v23 = vpop.permute.xlu2 %2160 }
 0x43d   : > { %2417 = vst.msk [vmem:[#allocation7 + $0x78] sm:$0xff] %vm1953_vm1, %v2113_v19 }
 0x43e   : > { %2425 = vst.msk [vmem:[#allocation7 + $0xb8] sm:$0xff] %vm1953_vm1, %v2161_v23 }
 0x442   : > { %2262 = vperm.xlu1 %5781, %v6918_v29   ;;  %2280 = vperm.xlu2 %5782, %v6926_v33   ;;  %v1887_v15 = vpop.permute.xlu0 %1886 }
 0x443   : > { %2007 = vst.msk [vmem:[#allocation6 + $0x1a8] sm:$0xff] %vm1953_vm1, %v1887_v15 }
 0x444   : > { %v2125_v26 = vpop.permute.xlu1 %2124 }
 0x445   : > { %2419 = vst.msk [vmem:[#allocation7 + $0x88] sm:$0xff] %vm1953_vm1, %v2125_v26 }
 0x44a   : > { %2274 = vperm.xlu1 %5781, %v6926_v33   ;;  %5784 = vset.pattern.permute.xlu2 %v7002_v16  ;;  %v1952_v18 = vpop.permute.xlu0 %1951 }
 0x44b   : > { %2017 = vst.msk [vmem:[#allocation6 + $0x1f8] sm:$0xff] %vm1953_vm1, %v1952_v18 }
 0x44c   : > { %v2179_v9 = vpop.permute.xlu2 %2178 }
 0x44d   : > { %2428 = vst.msk [vmem:[#allocation7 + $0xd0] sm:$0xff] %vm1953_vm1, %v2179_v9 }
 0x452   : > { %5783 = vset.pattern.permute.xlu1 %v6995_v14  ;;  %2298 = vperm.xlu2 %5784, %v6941_v40  }
 0x454   : > { %v2143_v29 = vpop.permute.xlu1 %2142  ;;  %v2191_v56 = vpop.permute.xlu2 %2190 }
 0x455   : > { %2422 = vst.msk [vmem:[#allocation7 + $0xa0] sm:$0xff] %vm1953_vm1, %v2143_v29 }
 0x456   : > { %2430 = vst.msk [vmem:[#allocation7 + $0xe0] sm:$0xff] %vm1953_vm1, %v2191_v56 }
 0x45a   : > { %2292 = vperm.xlu1 %5783, %v6935_v37   ;;  %2310 = vperm.xlu2 %5784, %v6954_v46  }
 0x45c   : > { %v2155_v33 = vpop.permute.xlu1 %2154 }
 0x45d   : > { %2424 = vst.msk [vmem:[#allocation7 + $0xb0] sm:$0xff] %vm1953_vm1, %v2155_v33 }
 0x462   : > { %2304 = vperm.xlu1 %5783, %v6941_v40   ;;  %5786 = vset.pattern.permute.xlu2 %v6995_v14  ;;  %v2047_v40 = vpop.permute.xlu0 %2046 }
 0x463   : > { %2406 = vst.msk [vmem:[#allocation7 + $0x20] sm:$0xff] %vm1953_vm1, %v2047_v40 }
 0x464   : > { %v2209_v21 = vpop.permute.xlu2 %2208 }
 0x465   : > { %2433 = vst.msk [vmem:[#allocation7 + $0xf8] sm:$0xff] %vm1953_vm1, %v2209_v21 }
 0x46a   : > { %5785 = vset.pattern.permute.xlu1 %v7002_v16  ;;  %2328 = vperm.xlu2 %5786, %v6949_v43   ;;  %v2107_v24 = vpop.permute.xlu0 %2106 }
 0x46b   : > { %2416 = vst.msk [vmem:[#allocation7 + $0x70] sm:$0xff] %vm1953_vm1, %v2107_v24 }
 0x46c   : > { %v2173_v37 = vpop.permute.xlu1 %2172  ;;  %v2221_v22 = vpop.permute.xlu2 %2220 }
 0x46d   : > { %2427 = vst.msk [vmem:[#allocation7 + $0xc8] sm:$0xff] %vm1953_vm1, %v2173_v37 }
 0x46e   : > { %2435 = vst.msk [vmem:[#allocation7 + $0x108] sm:$0xff] %vm1953_vm1, %v2221_v22 }
 0x472   : > { %2322 = vperm.xlu1 %5785, %v6949_v43   ;;  %2340 = vperm.xlu2 %5786, %v6957_v47   ;;  %v2167_v59 = vpop.permute.xlu0 %2166 }
 0x473   : > { %2426 = vst.msk [vmem:[#allocation7 + $0xc0] sm:$0xff] %vm1953_vm1, %v2167_v59 }
 0x474   : > { %v2185_v46 = vpop.permute.xlu1 %2184 }
 0x475   : > { %2429 = vst.msk [vmem:[#allocation7 + $0xd8] sm:$0xff] %vm1953_vm1, %v2185_v46 }
 0x47a   : > { %2334 = vperm.xlu1 %5785, %v6957_v47   ;;  %5789 = vset.pattern.permute.xlu2 %v7002_v16  ;;  %v2227_v27 = vpop.permute.xlu0 %2226 }
 0x47b   : > { %2436 = vst.msk [vmem:[#allocation7 + $0x110] sm:$0xff] %vm1953_vm1, %v2227_v27 }
 0x47c   : > { %v2239_v57 = vpop.permute.xlu2 %2238 }
 0x47d   : > { %2438 = vst.msk [vmem:[#allocation7 + $0x120] sm:$0xff] %vm1953_vm1, %v2239_v57 }
 0x482   : > { %5788 = vset.pattern.permute.xlu1 %v6995_v14  ;;  %2358 = vperm.xlu2 %5789, %v6971_v54   ;;  %v2287_v28 = vpop.permute.xlu0 %2286 }
 0x483   : > { %2446 = vst.msk [vmem:[#allocation7 + $0x160] sm:$0xff] %vm1953_vm1, %v2287_v28 }
 0x484   : > { %v2203_v43 = vpop.permute.xlu1 %2202  ;;  %v2251_v25 = vpop.permute.xlu2 %2250 }
 0x485   : > { %2432 = vst.msk [vmem:[#allocation7 + $0xf0] sm:$0xff] %vm1953_vm1, %v2203_v43 }
 0x486   : > { %2440 = vst.msk [vmem:[#allocation7 + $0x130] sm:$0xff] %vm1953_vm1, %v2251_v25 }
 0x48a   : > { %2352 = vperm.xlu1 %5788, %v6965_v50   ;;  %2370 = vperm.xlu2 %5789, %v6985_v12   ;;  %v2347_v62 = vpop.permute.xlu0 %2346 }
 0x48b   : > { %2456 = vst.msk [vmem:[#allocation7 + $0x1b0] sm:$0xff] %vm1953_vm1, %v2347_v62 }
 0x48c   : > { %v2215_v47 = vpop.permute.xlu1 %2214 }
 0x48d   : > { %2434 = vst.msk [vmem:[#allocation7 + $0x100] sm:$0xff] %vm1953_vm1, %v2215_v47 }
 0x492   : > { %2364 = vperm.xlu1 %5788, %v6971_v54   ;;  %5791 = vset.pattern.permute.xlu2 %v6995_v14 }
 0x494   : > { %v2269_v61 = vpop.permute.xlu2 %2268 }
 0x495   : > { %2443 = vst.msk [vmem:[#allocation7 + $0x148] sm:$0xff] %vm1953_vm1, %v2269_v61 }
 0x49a   : > { %5790 = vset.pattern.permute.xlu1 %v7002_v16  ;;  %2388 = vperm.xlu2 %5791, %v6980_v6   ;;  %v2077_v16 = vpop.permute.xlu0 %2076 }
 0x49b   : > { %2411 = vst.msk [vmem:[#allocation7 + $0x48] sm:$0xff] %vm1953_vm1, %v2077_v16 }
 0x49c   : > { %v2233_v50 = vpop.permute.xlu1 %2232  ;;  %v2281_v12 = vpop.permute.xlu2 %2280 }
 0x49d   : > { %2437 = vst.msk [vmem:[#allocation7 + $0x118] sm:$0xff] %vm1953_vm1, %v2233_v50 }
 0x49e   : > { %2445 = vst.msk [vmem:[#allocation7 + $0x158] sm:$0xff] %vm1953_vm1, %v2281_v12 }
 0x4a2   : > { %2382 = vperm.xlu1 %5790, %v6980_v6   ;;  %2400 = vperm.xlu2 %5791, %v6988_v58   ;;  %v2137_v31 = vpop.permute.xlu0 %2136 }
 0x4a3   : > { %2421 = vst.msk [vmem:[#allocation7 + $0x98] sm:$0xff] %vm1953_vm1, %v2137_v31 }
 0x4a4   : > { %v2245_v54 = vpop.permute.xlu1 %2244 }
 0x4a5   : > { %2439 = vst.msk [vmem:[#allocation7 + $0x128] sm:$0xff] %vm1953_vm1, %v2245_v54 }
 0x4aa   : > { %2394 = vperm.xlu1 %5790, %v6988_v58   ;;  %v2197_v2 = vpop.permute.xlu0 %2196 }
 0x4ab   : > { %2431 = vst.msk [vmem:[#allocation7 + $0xe8] sm:$0xff] %vm1953_vm1, %v2197_v2 }
 0x4ac   : > { %v2299_v14 = vpop.permute.xlu2 %2298 }
 0x4ad   : > { %2448 = vst.msk [vmem:[#allocation7 + $0x170] sm:$0xff] %vm1953_vm1, %v2299_v14 }
 0x4b2   : > { %v2257_v34 = vpop.permute.xlu0 %2256 }
 0x4b3   : > { %2441 = vst.msk [vmem:[#allocation7 + $0x138] sm:$0xff] %vm1953_vm1, %v2257_v34 }
 0x4b4   : > { %v2263_v30 = vpop.permute.xlu1 %2262  ;;  %v2311_v63 = vpop.permute.xlu2 %2310 }
 0x4b5   : > { %2442 = vst.msk [vmem:[#allocation7 + $0x140] sm:$0xff] %vm1953_vm1, %v2263_v30 }
 0x4b6   : > { %2450 = vst.msk [vmem:[#allocation7 + $0x180] sm:$0xff] %vm1953_vm1, %v2311_v63 }
 0x4ba   : > { %v2317_v4 = vpop.permute.xlu0 %2316 }
 0x4bb   : > { %2451 = vst.msk [vmem:[#allocation7 + $0x188] sm:$0xff] %vm1953_vm1, %v2317_v4 }
 0x4bc   : > { %v2275_v6 = vpop.permute.xlu1 %2274 }
 0x4bd   : > { %2444 = vst.msk [vmem:[#allocation7 + $0x150] sm:$0xff] %vm1953_vm1, %v2275_v6 }
 0x4c2   : > { %v2377_v39 = vpop.permute.xlu0 %2376 }
 0x4c3   : > { %2461 = vst.msk [vmem:[#allocation7 + $0x1d8] sm:$0xff] %vm1953_vm1, %v2377_v39 }
 0x4c4   : > { %v2329_v58 = vpop.permute.xlu2 %2328 }
 0x4c5   : > { %2453 = vst.msk [vmem:[#allocation7 + $0x198] sm:$0xff] %vm1953_vm1, %v2329_v58 }
 0x4cc   : > { %v2293_v35 = vpop.permute.xlu1 %2292  ;;  %v2341_v36 = vpop.permute.xlu2 %2340 }
 0x4cd   : > { %2447 = vst.msk [vmem:[#allocation7 + $0x168] sm:$0xff] %vm1953_vm1, %v2293_v35 }
 0x4ce   : > { %2455 = vst.msk [vmem:[#allocation7 + $0x1a8] sm:$0xff] %vm1953_vm1, %v2341_v36 }
 0x4d4   : > { %v2305_v38 = vpop.permute.xlu1 %2304 }
 0x4d5   : > { %2449 = vst.msk [vmem:[#allocation7 + $0x178] sm:$0xff] %vm1953_vm1, %v2305_v38 }
 0x4dc   : > { %v2359_v60 = vpop.permute.xlu2 %2358 }
 0x4dd   : > { %2458 = vst.msk [vmem:[#allocation7 + $0x1c0] sm:$0xff] %vm1953_vm1, %v2359_v60 }
 0x4e4   : > { %v2323_v5 = vpop.permute.xlu1 %2322  ;;  %v2371_v3 = vpop.permute.xlu2 %2370 }
 0x4e5   : > { %2452 = vst.msk [vmem:[#allocation7 + $0x190] sm:$0xff] %vm1953_vm1, %v2323_v5 }
 0x4e6   : > { %2460 = vst.msk [vmem:[#allocation7 + $0x1d0] sm:$0xff] %vm1953_vm1, %v2371_v3 }
 0x4ec   : > { %v2335_v8 = vpop.permute.xlu1 %2334 }
 0x4ed   : > { %2454 = vst.msk [vmem:[#allocation7 + $0x1a0] sm:$0xff] %vm1953_vm1, %v2335_v8 }
 0x4f4   : > { %v2389_v41 = vpop.permute.xlu2 %2388 }
 0x4f5   : > { %2463 = vst.msk [vmem:[#allocation7 + $0x1e8] sm:$0xff] %vm1953_vm1, %v2389_v41 }
 0x4fc   : > { %v2353_v42 = vpop.permute.xlu1 %2352  ;;  %v2401_v44 = vpop.permute.xlu2 %2400 }
 0x4fd   : > { %2457 = vst.msk [vmem:[#allocation7 + $0x1b8] sm:$0xff] %vm1953_vm1, %v2353_v42 }
 0x4fe   : > { %2465 = vst.msk [vmem:[#allocation7 + $0x1f8] sm:$0xff] %vm1953_vm1, %v2401_v44 }
 0x504   : > { %v2365_v10 = vpop.permute.xlu1 %2364 }
 0x505   : > { %2459 = vst.msk [vmem:[#allocation7 + $0x1c8] sm:$0xff] %vm1953_vm1, %v2365_v10 }
 0x514   : > { %v2383_v45 = vpop.permute.xlu1 %2382 }
 0x515   : > { %2462 = vst.msk [vmem:[#allocation7 + $0x1e0] sm:$0xff] %vm1953_vm1, %v2383_v45 }
 0x51c   : > { %v2395_v48 = vpop.permute.xlu1 %2394 }
 0x51d   : > { %2464 = vst.msk [vmem:[#allocation7 + $0x1f0] sm:$0xff] %vm1953_vm1, %v2395_v48 }
 0x51e PF: > { %v2963_v13 = vld [vmem:[#allocation6 + $0x20] sm:$0xff]  ;;  %v2961_v49 = vld [vmem:[#allocation6 + $0x10] sm:$0xff]  ;;  %vm2484_vm2 = vcmask 1043456   ;;  %v6270_v52 = vmov 0   ;;  %v2467_v1 = vld [vmem:[#allocation5 + $0x8] sm:$0xff]  ;;  %vm2477_vm3 = vcmask 64512  }
 0x51f   : > { %v2959_v51 = vld [vmem:[#allocation6] sm:$0xff]  ;;  %5794 = vset.pattern.permute.xlu2 %v6270_v52  ;;  %5793 = vset.pattern.permute.xlu1 %v6270_v52  ;;  %v2472_v17 = vld [vmem:[%s6688_s11] sm:$0xf]  ;;  %v2964_v53 = vld [vmem:[#allocation6 + $0x28] sm:$0xff]  ;;  %s8779_s2 = sld [smem:[#allocation42_spill]] }
 0x520   : > { %v2466_v55 = vld [vmem:[#allocation5] sm:$0xff]  ;;  %5792 = vset.pattern.permute.xlu0 %v6270_v52  ;;  %3109 = vperm.xlu2 %5794, %v2963_v13   ;;  %v2486_v7 = vsel %vm2484_vm2, %v2472_v17, 0  ;;  %v2962_v19 = vld [vmem:[#allocation6 + $0x18] sm:$0xff]  ;;  %v2960_v23 = vld [vmem:[#allocation6 + $0x8] sm:$0xff]  ;;  %s8786_s14 = sld [smem:[#allocation43_spill]] }
 0x521   : > { %3099 = vperm.xlu1 %5793, %v2961_v49   ;;  %3089 = vperm.xlu0 %5792, %v2959_v51   ;;  %v2470_v20 = vpack.c.bf16 %v2467_v1, %v2466_v55  ;;  %v2967_v32 = vld [vmem:[#allocation6 + $0x40] sm:$0xff]  ;;  %v2966_v26 = vld [vmem:[#allocation6 + $0x38] sm:$0xff]  ;;  %v2965_v0 = vld [vmem:[#allocation6 + $0x30] sm:$0xff] }
 0x522   : > { %2495 = vmatpush.bf16.msra.mxu0 %v2486_v7  ;;  %v2468_v9 = vld [vmem:[#allocation5 + $0x10] sm:$0xff]  ;;  %v2469_v11 = vld [vmem:[#allocation5 + $0x18] sm:$0xff]  ;;  %v2968_v33 = vld [vmem:[#allocation6 + $0x48] sm:$0xff] }
 0x523   : > { %v2471_v29 = vpack.c.bf16 %v2469_v11, %v2468_v9  ;;  %v2970_v56 = vld [vmem:[#allocation6 + $0x58] sm:$0xff]  ;;  %v2969_v15 = vld [vmem:[#allocation6 + $0x50] sm:$0xff]  ;;  %v2972_v21 = vld [vmem:[#allocation6 + $0x68] sm:$0xff] }
 0x524   : > { %v2973_v18 = vld [vmem:[#allocation6 + $0x70] sm:$0xff]  ;;  %v2971_v37 = vld [vmem:[#allocation6 + $0x60] sm:$0xff]  ;;  %v2976_v22 = vld [vmem:[#allocation6 + $0x88] sm:$0xff] }
 0x525   : > { %5433 = vmatmul.msk.bf16.vlgmr.msra.gmra.mxu0 %vm2477_vm3, %v2470_v20  ;;  %v2975_v40 = vld [vmem:[#allocation6 + $0x80] sm:$0xff]  ;;  %v2974_v46 = vld [vmem:[#allocation6 + $0x78] sm:$0xff]  ;;  %v2977_v43 = vld [vmem:[#allocation6 + $0x90] sm:$0xff] }
 0x526   : > { %v2979_v57 = vld [vmem:[#allocation6 + $0xa0] sm:$0xff]  ;;  %v2978_v24 = vld [vmem:[#allocation6 + $0x98] sm:$0xff]  ;;  %v2981_v59 = vld [vmem:[#allocation6 + $0xb0] sm:$0xff] }
 0x527   : > { %v2982_v25 = vld [vmem:[#allocation6 + $0xb8] sm:$0xff]  ;;  %v2980_v47 = vld [vmem:[#allocation6 + $0xa8] sm:$0xff]  ;;  %v2985_v27 = vld [vmem:[#allocation6 + $0xd0] sm:$0xff] }
 0x528   : > { %3114 = vperm.xlu2 %5794, %v2964_v53   ;;  %v2984_v61 = vld [vmem:[#allocation6 + $0xc8] sm:$0xff]  ;;  %v2983_v28 = vld [vmem:[#allocation6 + $0xc0] sm:$0xff]  ;;  %v2986_v62 = vld [vmem:[#allocation6 + $0xd8] sm:$0xff] }
 0x529   : > { %3104 = vperm.xlu1 %5793, %v2962_v19   ;;  %3094 = vperm.xlu0 %5792, %v2960_v23   ;;  %v2988_v50 = vld [vmem:[#allocation6 + $0xe8] sm:$0xff]  ;;  %v2987_v12 = vld [vmem:[#allocation6 + $0xe0] sm:$0xff]  ;;  %v2990_v14 = vld [vmem:[#allocation6 + $0xf8] sm:$0xff] }
 0x52a   : > { %v2991_v54 = vld [vmem:[#allocation6 + $0x100] sm:$0xff]  ;;  %v2989_v16 = vld [vmem:[#allocation6 + $0xf0] sm:$0xff]  ;;  %v5547_v30 = vld [vmem:[%s6701_s24 + $0x38] sm:$0xff] }
 0x52b   : > { %4519 = vmatpush.bf16.msra.mxu1 %v5547_v30  ;;  %v5546_v63 = vld [vmem:[%s6701_s24 + $0x30] sm:$0xff]  ;;  %5583 = vmatpush.bf16.msra.mxu3 %v5547_v30  ;;  %v2994_v31 = vld [vmem:[#allocation6 + $0x118] sm:$0xff]  ;;  %v2992_v2 = vld [vmem:[#allocation6 + $0x108] sm:$0xff] }
 0x52c   : > { %v2993_v6 = vld [vmem:[#allocation6 + $0x110] sm:$0xff]  ;;  %v5545_v58 = vld [vmem:[%s6701_s24 + $0x28] sm:$0xff]  ;;  %v5544_v35 = vld [vmem:[%s6701_s24 + $0x20] sm:$0xff] }
 0x52d   : > { %v2997_v36 = vld [vmem:[#allocation6 + $0x130] sm:$0xff]  ;;  %v2996_v4 = vld [vmem:[#allocation6 + $0x128] sm:$0xff]  ;;  %v2995_v38 = vld [vmem:[#allocation6 + $0x120] sm:$0xff] }
 0x52e   : > { %v5543_v60 = vld [vmem:[%s6701_s24 + $0x18] sm:$0xff]  ;;  %v3000_v5 = vld [vmem:[#allocation6 + $0x148] sm:$0xff]  ;;  %v2999_v3 = vld [vmem:[#allocation6 + $0x140] sm:$0xff] }
 0x52f   : > { %4520 = vmatpush.bf16.msra.mxu1 %v5546_v63  ;;  %5584 = vmatpush.bf16.msra.mxu3 %v5546_v63  ;;  %v2998_v8 = vld [vmem:[#allocation6 + $0x138] sm:$0xff]  ;;  %v5542_v41 = vld [vmem:[%s6701_s24 + $0x10] sm:$0xff]  ;;  %v5541_v44 = vld [vmem:[%s6701_s24 + $0x8] sm:$0xff] }
 0x530   : > { %3129 = vperm.xlu2 %5794, %v2967_v32   ;;  %v3003_v10 = vld [vmem:[#allocation6 + $0x160] sm:$0xff]  ;;  %v3002_v45 = vld [vmem:[#allocation6 + $0x158] sm:$0xff]  ;;  %v3001_v48 = vld [vmem:[#allocation6 + $0x150] sm:$0xff] }
 0x531   : > { %3124 = vperm.xlu1 %5793, %v2966_v26   ;;  %3119 = vperm.xlu0 %5792, %v2965_v0   ;;  %v5540_v13 = vld [vmem:[%s6701_s24] sm:$0xff]  ;;  %v5538_v17 = vld [vmem:[#allocation2] sm:$0xff]  ;;  %v3006_v55 = vld [vmem:[#allocation6 + $0x178] sm:$0xff] }
 0x532   : > { %v3005_v1 = vld [vmem:[#allocation6 + $0x170] sm:$0xff]  ;;  %v3004_v7 = vld [vmem:[#allocation6 + $0x168] sm:$0xff]  ;;  %v3007_v26 = vld [vmem:[#allocation6 + $0x180] sm:$0xff] }
 0x533   : > { %4521 = vmatpush.bf16.msra.mxu1 %v5545_v58  ;;  %5585 = vmatpush.bf16.msra.mxu3 %v5545_v58  ;;  %v3009_v23 = vld [vmem:[#allocation6 + $0x190] sm:$0xff]  ;;  %v3008_v32 = vld [vmem:[#allocation6 + $0x188] sm:$0xff] }
 0x534   : > { %v7233_v0 = vld [vmem:[%s1115_s5] ss:$0 sm:$0xff]  ;;  %s8776_s5 = sld [smem:[#allocation29_spill]] }
 0x535   : > { %5434 = vmatmul.msk.bf16.gmra.mxu0 %vm2477_vm3, %v2471_v29  ;;  %v3017_v58 = vld [vmem:[#allocation6 + $0x1d0] sm:$0xff] }
 0x537   : > { %4522 = vmatpush.bf16.msra.mxu1 %v5544_v35  ;;  %5586 = vmatpush.bf16.msra.mxu3 %v5544_v35  ;;  %v3016_v35 = vld [vmem:[#allocation6 + $0x1c8] sm:$0xff] }
 0x538   : > { %3144 = vperm.xlu2 %5794, %v2970_v56  }
 0x539   : > { %3139 = vperm.xlu1 %5793, %v2969_v15   ;;  %3134 = vperm.xlu0 %5792, %v2968_v33  }
 0x53a   : > { %s5435_s23 = sshll.u32 %s8776_s5, 5 }
 0x53b   : > { %4523 = vmatpush.bf16.msra.mxu1 %v5543_v60  ;;  %5587 = vmatpush.bf16.msra.mxu3 %v5543_v60  ;;  %s7282_s15 = scalar_lea.vmem [#allocation3], %s5435_s23 }
 0x53f   : > { %4524 = vmatpush.bf16.msra.mxu1 %v5542_v41  ;;  %5588 = vmatpush.bf16.msra.mxu3 %v5542_v41 }
 0x540   : > { %3159 = vperm.xlu2 %5794, %v2973_v18   ;;  %v3012_v18 = vld [vmem:[#allocation6 + $0x1a8] sm:$0xff] }
 0x541   : > { %3154 = vperm.xlu1 %5793, %v2972_v21   ;;  %3149 = vperm.xlu0 %5792, %v2971_v37   ;;  %v3011_v21 = vld [vmem:[#allocation6 + $0x1a0] sm:$0xff]  ;;  %v3010_v37 = vld [vmem:[#allocation6 + $0x198] sm:$0xff] }
 0x543   : > { %4525 = vmatpush.bf16.msra.mxu1 %v5541_v44  ;;  %5589 = vmatpush.bf16.msra.mxu3 %v5541_v44 }
 0x547   : > { %4526 = vmatpush.bf16.msra.mxu1 %v5540_v13  ;;  %5590 = vmatpush.bf16.msra.mxu3 %v5540_v13 }
 0x548   : > { %3174 = vperm.xlu2 %5794, %v2976_v22  }
 0x549   : > { %3169 = vperm.xlu1 %5793, %v2975_v40   ;;  %3164 = vperm.xlu0 %5792, %v2974_v46  }
 0x54a   : > { %4527 = vmatmul.bf16.vlgmr.msra.gmra.mxu1 %v5538_v17 }
 0x550   : > { %3189 = vperm.xlu2 %5794, %v2979_v57  }
 0x551   : > { %3184 = vperm.xlu1 %5793, %v2978_v24   ;;  %3179 = vperm.xlu0 %5792, %v2977_v43  }
 0x558   : > { %3204 = vperm.xlu2 %5794, %v2982_v25  }
 0x559   : > { %3199 = vperm.xlu1 %5793, %v2981_v59   ;;  %3194 = vperm.xlu0 %5792, %v2980_v47   ;;  %v3015_v59 = vld [vmem:[#allocation6 + $0x1c0] sm:$0xff]  ;;  %v3014_v47 = vld [vmem:[#allocation6 + $0x1b8] sm:$0xff] }
 0x560   : > { %3219 = vperm.xlu2 %5794, %v2985_v27   ;;  %v3013_v27 = vld [vmem:[#allocation6 + $0x1b0] sm:$0xff] }
 0x561   : > { %3214 = vperm.xlu1 %5793, %v2984_v61   ;;  %3209 = vperm.xlu0 %5792, %v2983_v28  }
 0x568   : > { %3234 = vperm.xlu2 %5794, %v2988_v50  }
 0x569   : > { %3229 = vperm.xlu1 %5793, %v2987_v12   ;;  %3224 = vperm.xlu0 %5792, %v2986_v62  }
 0x570   : > { %3249 = vperm.xlu2 %5794, %v2991_v54  }
 0x571   : > { %3244 = vperm.xlu1 %5793, %v2990_v14   ;;  %3239 = vperm.xlu0 %5792, %v2989_v16  }
 0x578   : > { %3264 = vperm.xlu2 %5794, %v2994_v31  }
 0x579   : > { %3259 = vperm.xlu1 %5793, %v2993_v6   ;;  %3254 = vperm.xlu0 %5792, %v2992_v2   ;;  %v3018_v2 = vld [vmem:[#allocation6 + $0x1d8] sm:$0xff] }
 0x57a   : > { %v7205_v34 = vpop.permute.xlu2 %3109 }
 0x580   : > { %3279 = vperm.xlu2 %5794, %v2997_v36  }
 0x581   : > { %3274 = vperm.xlu1 %5793, %v2996_v4   ;;  %3269 = vperm.xlu0 %5792, %v2995_v38  }
 0x582   : > { %v7208_v39 = vpop.permute.xlu2 %3114 }
 0x588   : > { %3294 = vperm.xlu2 %5794, %v3000_v5  }
 0x589   : > { %3289 = vperm.xlu1 %5793, %v2999_v3   ;;  %3284 = vperm.xlu0 %5792, %v2998_v8  }
 0x58a   : > { %v7212_v42 = vpop.permute.xlu2 %3129 }
 0x590   : > { %3309 = vperm.xlu2 %5794, %v3003_v10  }
 0x591   : > { %3304 = vperm.xlu1 %5793, %v3002_v45   ;;  %3299 = vperm.xlu0 %5792, %v3001_v48  }
 0x592   : > { %v7216_v49 = vpop.permute.xlu2 %3144 }
 0x593   : > { %v7218_v51 = vpop.permute.xlu1 %3099  ;;  %v7220_v52 = vpop.permute.xlu0 %3089 }
 0x598   : > { %3324 = vperm.xlu2 %5794, %v3006_v55   ;;  %v3021_v55 = vld [vmem:[#allocation6 + $0x1f0] sm:$0xff] }
 0x599   : > { %3319 = vperm.xlu1 %5793, %v3005_v1   ;;  %3314 = vperm.xlu0 %5792, %v3004_v7   ;;  %v3020_v1 = vld [vmem:[#allocation6 + $0x1e8] sm:$0xff]  ;;  %v3019_v7 = vld [vmem:[#allocation6 + $0x1e0] sm:$0xff] }
 0x59a   : > { %v7222_v20 = vpop.permute.xlu2 %3159 }
 0x59b   : > { %v7224_v53 = vpop.permute.xlu1 %3104  ;;  %v7226_v19 = vpop.permute.xlu0 %3094 }
 0x5a0   : > { %3339 = vperm.xlu2 %5794, %v3009_v23  }
 0x5a1   : > { %3334 = vperm.xlu1 %5793, %v3008_v32   ;;  %3329 = vperm.xlu0 %5792, %v3007_v26   ;;  %v2565_v32 = vld [vmem:[%s7282_s15] sm:$0xff] }
 0x5a2   : > { %v2497_v9 = vpop.f32.mrf.mxu0  ;;  %v7235_v11 = vpop.permute.xlu2 %3174 }
 0x5a3   : > { %8775 = vst [vmem:[#allocation46_spill] sm:$0xff] %v7235_v11  ;;  %v7238_v29 = vadd.f32 %v7233_v0, %v2497_v9  ;;  %v7240_v56 = vpop.permute.xlu1 %3124  ;;  %v7242_v15 = vpop.permute.xlu0 %3119  ;;  %v2575_v11 = vld [vmem:[%s8786_s14 + $0x20] sm:$0xff] }
 0x5a5   : > { %v2511_v33 = vmin.f32 %v7238_v29, 20.0  ;;  %vm2507_vm5 = vcmp.gt.f32.partialorder %v7238_v29, 20.0 }
 0x5a7   : > { %v2515_v22 = vmul.f32 1.442695, %v2511_v33 }
 0x5a8   : > { %3354 = vperm.xlu2 %5794, %v3012_v18  }
 0x5a9   : > { %5797 = vpow2.f32 %v2515_v22  ;;  %3349 = vperm.xlu1 %5793, %v3011_v21   ;;  %3344 = vperm.xlu0 %5792, %v3010_v37  }
 0x5aa   : > { %v2499_v40 = vpop.f32.mrf.mxu0  ;;  %v7245_v46 = vpop.permute.xlu2 %3189 }
 0x5ab   : > { %v7248_v57 = vadd.f32 %v7233_v0, %v2499_v40  ;;  %v7250_v24 = vpop.permute.xlu1 %3139  ;;  %v7252_v43 = vpop.permute.xlu0 %3134 }
 0x5ad   : > { %v2512_v25 = vmin.f32 %v7248_v57, 20.0  ;;  %vm2508_vm7 = vcmp.gt.f32.partialorder %v7248_v57, 20.0 }
 0x5af   : > { %v5798_v61 = vpop.eup %5797  ;;  %v2517_v28 = vmul.f32 1.442695, %v2512_v25 }
 0x5b0   : > { %v2523_v50 = vadd.f32 1.0, %v5798_v61  ;;  %v2526_v12 = vmul.f32 -0.5, %v5798_v61  ;;  %3369 = vperm.xlu2 %5794, %v3015_v59   ;;  %v2529_v31 = vand.u32 2147483647, %v5798_v61 }
 0x5b1   : > { %5799 = vpow2.f32 %v2517_v28  ;;  %3364 = vperm.xlu1 %5793, %v3014_v47   ;;  %3359 = vperm.xlu0 %5792, %v3013_v27   ;;  %v3664_v28 = vld [vmem:[#allocation7 + $0x8] sm:$0xff] }
 0x5b2   : > { %5801 = vlog2.f32 %v2523_v50  ;;  %v2502_v62 = vpop.f32.mrf.mxu0  ;;  %v7255_v54 = vpop.permute.xlu2 %3204  ;;  %v2527_v63 = vadd.f32 1.0, %v2526_v12  ;;  %vm7265_vm4 = vcmp.lt.f32.partialorder %v2529_v31, 0.0004427343  ;;  %v3663_v12 = vld [vmem:[#allocation7] sm:$0xff] }
 0x5b3   : > { %v7258_v14 = vadd.f32 %v7233_v0, %v2502_v62  ;;  %v7260_v16 = vpop.permute.xlu1 %3154  ;;  %v7262_v30 = vpop.permute.xlu0 %3149  ;;  %v3022_v62 = vld [vmem:[#allocation6 + $0x1f8] sm:$0xff] }
 0x5b4   : > { %v2528_v60 = vmul.f32 %v5798_v61, %v2527_v63 }
 0x5b5   : > { %v2513_v6 = vmin.f32 %v7258_v14, 20.0  ;;  %vm2509_vm8 = vcmp.gt.f32.partialorder %v7258_v14, 20.0 }
 0x5b7   : > { %v5800_v36 = vpop.eup %5799  ;;  %v2519_v4 = vmul.f32 1.442695, %v2513_v6 }
 0x5b8   : > { %v5802_v38 = vpop.eup %5801  ;;  %v2532_v5 = vadd.f32 1.0, %v5800_v36  ;;  %v2535_v3 = vmul.f32 -0.5, %v5800_v36  ;;  %3384 = vperm.xlu2 %5794, %v3018_v2   ;;  %v2538_v17 = vand.u32 2147483647, %v5800_v36  ;;  %v7311_v2 = vld [vmem:[%s8779_s2 + $0x8] sm:$0xff] }
 0x5b9   : > { %v2525_v8 = vmul.f32 0.6931472, %v5802_v38  ;;  %3379 = vperm.xlu1 %5793, %v3017_v58   ;;  %3374 = vperm.xlu0 %5792, %v3016_v35  }
 0x5ba   : > { %5803 = vlog2.f32 %v2532_v5  ;;  %v7270_v44 = vpop.permute.xlu2 %3219  ;;  %v2536_v10 = vadd.f32 1.0, %v2535_v3  ;;  %vm2539_vm6 = vcmp.lt.f32.partialorder %v2538_v17, 0.0004427343  ;;  %v2504_v27 = vpop.f32.mrf.mxu0 }
 0x5bb   : > { %5805 = vpow2.f32 %v2519_v4  ;;  %v7272_v45 = vpop.permute.xlu1 %3169  ;;  %v7274_v48 = vpop.permute.xlu0 %3164  ;;  %v2531_v13 = vsel %vm7265_vm4, %v2528_v60, %v2525_v8  ;;  %v7306_v31 = vadd.f32 %v7233_v0, %v2504_v27  ;;  %vm4831_vm4 = vcmask 1041409  }
 0x5bc   : > { %v7280_v23 = vsel %vm2507_vm5, %v7238_v29, %v2531_v13  ;;  %v2537_v26 = vmul.f32 %v5800_v36, %v2536_v10  ;;  %v2566_v29 = vld [vmem:[%s7282_s15 + $0x8] sm:$0xff] }
 0x5bd   : > { %v7289_v21 = vmul.f32 %v2565_v32, %v7280_v23  ;;  %v8705_v6 = vperm.slane %v7280_v23, 0  ;;  %v2640_v36 = vrot.slane %v7280_v23, 2  ;;  %v2514_v10 = vmin.f32 %v7306_v31, 20.0 }
 0x5be   : > { %v2641_v17 = vrot.slane %v7280_v23, 3  ;;  %v2644_v32 = vrot.slane %v7280_v23, 6  ;;  %vm2510_vm11 = vcmp.gt.f32.partialorder %v7306_v31, 20.0 }
 0x5bf   : > { %v2933_v50 = vrot.slane %v7289_v21, 3  ;;  %v2935_v63 = vrot.slane %v7289_v21, 5  ;;  %v2934_v58 = vrot.slane %v7289_v21, 4  ;;  %v2936_v38 = vrot.slane %v7289_v21, 6 }
 0x5c0   : > { %v5804_v9 = vpop.eup %5803  ;;  %3399 = vperm.xlu2 %5794, %v3021_v55   ;;  %v2732_v13 = vmul.f32 %v8705_v6, %v7311_v2  ;;  %v2937_v55 = vrot.slane %v7289_v21, 7  ;;  %v7366_v6 = vld [vmem:[%s8779_s2] sm:$0xff] }
 0x5c1   : > { %v7285_v33 = vpop.eup %5805  ;;  %v2534_v18 = vmul.f32 0.6931472, %v5804_v9  ;;  %3394 = vperm.xlu1 %5793, %v3020_v1   ;;  %3389 = vperm.xlu0 %5792, %v3019_v7   ;;  %v3026_v4 = vperm.slane %v2933_v50, 0  ;;  %v7322_v3 = vperm.slane %v2935_v63, 0  ;;  %v2643_v7 = vrot.slane %v7280_v23, 5 }
 0x5c2   : > { %v3235_v37 = vpop.permute.xlu2 %3234  ;;  %v2541_v47 = vadd.f32 1.0, %v7285_v33  ;;  %v2544_v35 = vmul.f32 -0.5, %v7285_v33  ;;  %v2547_v0 = vand.u32 2147483647, %v7285_v33  ;;  %v7340_v9 = vperm.slane %v2934_v58, 0 }
 0x5c3   : > { %v2540_v22 = vsel %vm2539_vm6, %v2537_v26, %v2534_v18  ;;  %v7292_v40 = vpop.permute.xlu1 %3184  ;;  %v7294_v25 = vpop.permute.xlu0 %3179  ;;  %v7346_v27 = vmul.f32 %v7240_v56, %v3026_v4  ;;  %v3029_v50 = vperm.slane %v2936_v38, 0  ;;  %v7354_v63 = vmul.f32 %v7242_v15, %v3026_v4 }
 0x5c4   : > { %v7297_v59 = vsel %vm2508_vm7, %v7248_v57, %v2540_v22  ;;  %5807 = vlog2.f32 %v2541_v47  ;;  %v2545_v18 = vadd.f32 1.0, %v2544_v35  ;;  %v7343_v22 = vperm.slane %v2640_v36, 0 }
 0x5c5   : > { %v7301_v61 = vmul.f32 %v2566_v29, %v7297_v59  ;;  %v3667_v29 = vld [vmem:[#allocation7 + $0x20] sm:$0xff]  ;;  %vm7348_vm9 = vcmp.lt.f32.partialorder %v2547_v0, 0.0004427343  ;;  %v2797_v56 = vmul.f32 1.442695, %v2732_v13  ;;  %v7362_v36 = vperm.slane %v2937_v55, 0 }
 0x5c6   : > { %v2521_v38 = vmul.f32 1.442695, %v2514_v10  ;;  %v2546_v4 = vmul.f32 %v7285_v33, %v2545_v18  ;;  %v2735_v13 = vmul.f32 %v7343_v22, %v7366_v6  ;;  %v7375_v55 = vmul.f32 %v7252_v43, %v7340_v9  ;;  %v3669_v43 = vld [vmem:[#allocation7 + $0x30] sm:$0xff] }
 0x5c7   : > { %v2943_v57 = vrot.slane %v7301_v61, 6  ;;  %v2939_v26 = vrot.slane %v7301_v61, 2  ;;  %v2942_v58 = vrot.slane %v7301_v61, 5  ;;  %v2938_v0 = vrot.slane %v7301_v61, 1 }
 0x5c8   : > { %3734 = vperm.xlu2 %5794, %v3664_v28   ;;  %v2940_v28 = vrot.slane %v7301_v61, 3  ;;  %v7378_v10 = vmul.f32 %v7260_v16, %v3029_v50  ;;  %5809 = vpow2.f32 %v2797_v56  ;;  %v8785_v16 = vperm.slane %v7301_v61, 0 }
 0x5c9   : > { %3729 = vperm.xlu1 %5793, %v3663_v12   ;;  %3404 = vperm.xlu0 %5792, %v3022_v62   ;;  %v7318_v60 = vperm.slane %v2943_v57, 0  ;;  %v3666_v12 = vld [vmem:[#allocation7 + $0x18] sm:$0xff]  ;;  %v3665_v62 = vld [vmem:[#allocation7 + $0x10] sm:$0xff]  ;;  %v7358_v57 = vmul.f32 %v7250_v24, %v7322_v3  ;;  %v7385_v33 = vperm.slane %v2942_v58, 0  ;;  %5811 = vpow2.f32 %v2521_v38 }
 0x5ca   : > { %v7320_v5 = vpop.permute.xlu2 %3249  ;;  %v5808_v47 = vpop.eup %5807  ;;  %v5539_v24 = vld [vmem:[#allocation2 + $0x8] sm:$0xff]  ;;  %v3034_v35 = vperm.slane %v2940_v28, 0  ;;  %v2932_v28 = vrot.slane %v7289_v21, 2 }
 0x5cb   : > { %v7324_v8 = vpop.permute.xlu1 %3199  ;;  %v7326_v41 = vpop.permute.xlu0 %3194  ;;  %v7335_v1 = vmul.f32 %v3235_v37, %v7318_v60  ;;  %v2543_v15 = vmul.f32 0.6931472, %v5808_v47  ;;  %8784 = vst [vmem:[#allocation49_spill] sm:$0xff] %v7385_v33  ;;  %4532 = vmatmul.bf16.vlgmr.msra.gmra.mxu3 %v5539_v24  ;;  %v3670_v24 = vld [vmem:[#allocation7 + $0x38] sm:$0xff]  ;;  %v7421_v37 = vmul.f32 %v7270_v44, %v7385_v33 }
 0x5cc   : > { %v7449_v33 = vperm.slane %v2932_v28, 0 }
 0x5cd   : > { %8780 = vst [vmem:[#allocation47_spill] sm:$0xff] %v7335_v1  ;;  %v7368_v1 = vperm.slane %v2939_v26, 0  ;;  %v7381_v26 = vmul.f32 %v7262_v30, %v3029_v50  ;;  %v7400_v30 = vmul.f32 %v7274_v48, %v7362_v36  ;;  %v3032_v50 = vperm.slane %v2938_v0, 0  ;;  %v3668_v48 = vld [vmem:[#allocation7 + $0x28] sm:$0xff] }
 0x5ce   : > { %v2549_v58 = vsel %vm7348_vm9, %v2546_v4, %v2543_v15  ;;  %v7414_v0 = vperm.slane %v2643_v7, 0  ;;  %8790 = vst [vmem:[#allocation52_spill] sm:$0xff] %v7421_v37  ;;  %v2572_v15 = vld [vmem:[%s8786_s14 + $0x8] sm:$0xff]  ;;  %v7424_v4 = vperm.slane %v2644_v32, 0  ;;  %v2567_v7 = vld [vmem:[%s7282_s15 + $0x10] sm:$0xff]  ;;  %v5810_v56 = vpop.eup %5809 }
 0x5cf   : > { %v7438_v32 = vmul.f32 %v7292_v40, %v3032_v50  ;;  %v7445_v37 = vpop.eup %5811 }
 0x5d0   : > { %3749 = vperm.xlu2 %5794, %v3667_v29   ;;  %v2741_v44 = vmul.f32 %v7414_v0, %v7366_v6 }
 0x5d1   : > { %3744 = vperm.xlu1 %5793, %v3666_v12   ;;  %3739 = vperm.xlu0 %5792, %v3665_v62   ;;  %v7396_v12 = vmul.f32 %v7272_v45, %v8785_v16  ;;  %v7404_v62 = vmul.f32 %v7245_v46, %v7368_v1  ;;  %v2803_v45 = vmul.f32 1.442695, %v2735_v13  ;;  %v7410_v16 = vmul.f32 %v7255_v54, %v3034_v35 }
 0x5d2   : > { %v7383_v29 = vpop.permute.xlu2 %3264  ;;  %v8789_v46 = vperm.slane %v7280_v23, 0  ;;  %v2639_v54 = vrot.slane %v7280_v23, 1 }
 0x5d3   : > { %8783 = vst [vmem:[#allocation48_spill] sm:$0xff] %v7383_v29  ;;  %v7387_v18 = vpop.permute.xlu1 %3214  ;;  %v7389_v47 = vpop.permute.xlu0 %3209  ;;  %v7412_v29 = vperm.slane %v2641_v17, 0  ;;  %5813 = vpow2.f32 %v2803_v45  ;;  %v7430_v17 = vsel %vm2509_vm8, %v7258_v14, %v2549_v58  ;;  %v8791_v45 = vperm.slane %v7289_v21, 0 }
 0x5d4   : > { %8787 = vst [vmem:[#allocation50_spill] sm:$0xff] %v7404_v62  ;;  %v2731_v38 = vmul.f32 %v8789_v46, %v7366_v6  ;;  %v2744_v58 = vmul.f32 %v7424_v4, %v7311_v2 }
 0x5d5   : > { %8788 = vst [vmem:[#allocation51_spill] sm:$0xff] %v7410_v16  ;;  %v2738_v13 = vmul.f32 %v7412_v29, %v7311_v2  ;;  %v3408_v14 = vmul.f32 %v7226_v19, %v8791_v45  ;;  %v2815_v16 = vmul.f32 1.442695, %v2741_v44  ;;  %v7458_v19 = vmul.f32 %v7324_v8, %v3034_v35  ;;  %v3673_v35 = vld [vmem:[#allocation7 + $0x50] sm:$0xff]  ;;  %v3672_v44 = vld [vmem:[#allocation7 + $0x48] sm:$0xff] }
 0x5d6   : > { %v2795_v46 = vmul.f32 1.442695, %v2731_v38  ;;  %v3472_v38 = vmul.f32 %v5810_v56, %v2572_v15  ;;  %v2944_v56 = vrot.slane %v7301_v61, 7  ;;  %v7470_v8 = vmul.f32 %v7326_v41, %v7368_v1  ;;  %v2571_v41 = vld [vmem:[%s8786_s14] sm:$0xff] }
 0x5d7   : > { %v2809_v40 = vmul.f32 1.442695, %v2738_v13 }
 0x5d8   : > { %3764 = vperm.xlu2 %5794, %v3670_v24   ;;  %v2668_v24 = vperm.slane %v2639_v54, 0  ;;  %5815 = vpow2.f32 %v2795_v46  ;;  %v3536_v15 = vadd.f32 %v3472_v38, %v3408_v14  ;;  %8795 = vst [vmem:[#allocation56_spill] sm:$0xff] %v7470_v8  ;;  %v3671_v46 = vld [vmem:[#allocation7 + $0x40] sm:$0xff] }
 0x5d9   : > { %3759 = vperm.xlu1 %5793, %v3669_v43   ;;  %3754 = vperm.xlu0 %5792, %v3668_v48   ;;  %v7452_v43 = vmul.f32 %v2567_v7, %v7430_v17  ;;  %v7455_v48 = vmul.f32 %v7294_v25, %v3032_v50  ;;  %v5814_v25 = vpop.eup %5813  ;;  %5817 = vpow2.f32 %v2809_v40  ;;  %v2821_v50 = vmul.f32 1.442695, %v2744_v58 }
 0x5da   : > { %v7447_v62 = vpop.permute.xlu2 %3279  ;;  %v2734_v13 = vmul.f32 %v2668_v24, %v7311_v2  ;;  %3600 = vst [vmem:[%s6709_s27 + $0x8] sm:$0xff] %v3536_v15  ;;  %v3475_v14 = vmul.f32 %v5814_v25, %v2575_v11  ;;  %5819 = vpow2.f32 %v2815_v16  ;;  %v2733_v38 = vmul.f32 %v2668_v24, %v7366_v6  ;;  %v2578_v25 = vld [vmem:[%s8786_s14 + $0x38] sm:$0xff] }
 0x5db   : > { %8792 = vst [vmem:[#allocation53_spill] sm:$0xff] %v7447_v62  ;;  %v3230_v45 = vpop.permute.xlu1 %3229  ;;  %v7460_v54 = vpop.permute.xlu0 %3224  ;;  %5821 = vpow2.f32 %v2821_v50  ;;  %v2931_v58 = vrot.slane %v7289_v21, 1  ;;  %v3038_v40 = vperm.slane %v2944_v56, 0  ;;  %v7484_v24 = vadd.f32 1.0, %v7445_v37 }
 0x5dc   : > { %8793 = vst [vmem:[#allocation54_spill] sm:$0xff] %v7460_v54  ;;  %v7464_v28 = vmul.f32 %v3230_v45, %v7318_v60  ;;  %v3411_v60 = vmul.f32 %v7205_v34, %v7449_v33  ;;  %v2801_v1 = vmul.f32 1.442695, %v2734_v13  ;;  %v2799_v7 = vmul.f32 1.442695, %v2733_v38  ;;  %v2584_v45 = vld [vmem:[%s8786_s14 + $0x68] sm:$0xff] }
 0x5dd   : > { %v8796_v34 = vperm.slane %v7297_v59, 0  ;;  %v2736_v56 = vmul.f32 %v7343_v22, %v7311_v2  ;;  %v7492_v50 = vmul.f32 -0.5, %v7445_v37  ;;  %v3024_v22 = vperm.slane %v2931_v58, 0  ;;  %v3675_v58 = vld [vmem:[#allocation7 + $0x60] sm:$0xff] }
 0x5de   : > { %8794 = vst [vmem:[#allocation55_spill] sm:$0xff] %v7464_v28  ;;  %v3539_v15 = vadd.f32 %v3475_v14, %v3411_v60  ;;  %v5816_v16 = vpop.eup %5815  ;;  %5823 = vpow2.f32 %v2801_v1  ;;  %v2581_v60 = vld [vmem:[%s8786_s14 + $0x50] sm:$0xff]  ;;  %v8798_v1 = vperm.slane %v7289_v21, 0  ;;  %v2945_v21 = vrot.slane %v7452_v43, 1 }
 0x5df   : > { %v2747_v11 = vmul.f32 %v8796_v34, %v7366_v6  ;;  %v3471_v14 = vmul.f32 %v5816_v16, %v2571_v41  ;;  %5825 = vpow2.f32 %v2799_v7  ;;  %v2805_v62 = vmul.f32 1.442695, %v2736_v56  ;;  %v3676_v16 = vld [vmem:[#allocation7 + $0x68] sm:$0xff] }
 0x5e0   : > { %3779 = vperm.xlu2 %5794, %v3673_v35   ;;  %v2737_v35 = vmul.f32 %v7412_v29, %v7366_v6  ;;  %3603 = vst [vmem:[%s6709_s27 + $0x20] sm:$0xff] %v3539_v15  ;;  %v3407_v29 = vmul.f32 %v7220_v52, %v8798_v1  ;;  %v2574_v1 = vld [vmem:[%s8786_s14 + $0x18] sm:$0xff] }
 0x5e1   : > { %3774 = vperm.xlu1 %5793, %v3672_v44   ;;  %3769 = vperm.xlu0 %5792, %v3671_v46   ;;  %v2827_v44 = vmul.f32 1.442695, %v2747_v11  ;;  %v5818_v46 = vpop.eup %5817 }
 0x5e2   : > { %v7494_v13 = vpop.permute.xlu2 %3294  ;;  %v2807_v28 = vmul.f32 1.442695, %v2737_v35  ;;  %v5820_v8 = vpop.eup %5819  ;;  %v3478_v41 = vmul.f32 %v5818_v46, %v2578_v25  ;;  %v3535_v52 = vadd.f32 %v3471_v14, %v3407_v29  ;;  %v3674_v35 = vld [vmem:[#allocation7 + $0x58] sm:$0xff] }
 0x5e3   : > { %8797 = vst [vmem:[#allocation57_spill] sm:$0xff] %v7494_v13  ;;  %v3245_v38 = vpop.permute.xlu1 %3244  ;;  %v3240_v34 = vpop.permute.xlu0 %3239  ;;  %v3481_v54 = vmul.f32 %v5820_v8, %v2581_v60  ;;  %5827 = vpow2.f32 %v2827_v44  ;;  %v3410_v8 = vmul.f32 %v7224_v53, %v3024_v22  ;;  %v2642_v60 = vrot.slane %v7280_v23, 4 }
 0x5e4   : > { %v7503_v13 = vmul.f32 %v3245_v38, %v3038_v40  ;;  %v7505_v7 = vmul.f32 %v3240_v34, %v3038_v40  ;;  %v5822_v11 = vpop.eup %5821  ;;  %v3542_v56 = vadd.f32 %v3478_v41, %v7346_v27  ;;  %v2573_v38 = vld [vmem:[%s8786_s14 + $0x10] sm:$0xff]  ;;  %5829 = vpow2.f32 %v2807_v28  ;;  %3599 = vst [vmem:[%s6709_s27] sm:$0xff] %v3535_v52 }
 0x5e5   : > { %v3484_v15 = vmul.f32 %v5822_v11, %v2584_v45  ;;  %v2646_v40 = vrot.slane %v7297_v59, 1  ;;  %v5824_v25 = vpop.eup %5823  ;;  %v3545_v46 = vadd.f32 %v3481_v54, %v7358_v57  ;;  %5831 = vpow2.f32 %v2805_v62  ;;  %v2587_v54 = vld [vmem:[%s8786_s14 + $0x80] sm:$0xff] }
 0x5e6   : > { %8799 = vst [vmem:[#allocation58_spill] sm:$0xff] %v7505_v7  ;;  %v5826_v14 = vpop.eup %5825  ;;  %v3474_v28 = vmul.f32 %v5824_v25, %v2574_v1  ;;  %v2648_v44 = vrot.slane %v7297_v59, 3  ;;  %v2947_v57 = vrot.slane %v7452_v43, 3  ;;  %v3409_v53 = vmul.f32 %v7218_v51, %v3024_v22 }
 0x5e7   : > { %3606 = vst [vmem:[%s6709_s27 + $0x38] sm:$0xff] %v3542_v56  ;;  %v3548_v27 = vadd.f32 %v3484_v15, %v7378_v10  ;;  %v7518_v45 = vperm.slane %v2646_v40, 0  ;;  %v3473_v62 = vmul.f32 %v5826_v14, %v2573_v38  ;;  %v2671_v34 = vperm.slane %v2642_v60, 0  ;;  %v2577_v15 = vld [vmem:[%s8786_s14 + $0x30] sm:$0xff] }
 0x5e8   : > { %3794 = vperm.xlu2 %5794, %v3676_v16   ;;  %3609 = vst [vmem:[%s6709_s27 + $0x50] sm:$0xff] %v3545_v46  ;;  %v3538_v10 = vadd.f32 %v3474_v28, %v3410_v8  ;;  %v7531_v11 = vperm.slane %v2648_v44, 0  ;;  %v2743_v16 = vmul.f32 %v7424_v4, %v7366_v6  ;;  %v2948_v51 = vrot.slane %v7452_v43, 4  ;;  %v3679_v60 = vld [vmem:[#allocation7 + $0x80] sm:$0xff] }
 0x5e9   : > { %3789 = vperm.xlu1 %5793, %v3675_v58   ;;  %3784 = vperm.xlu0 %5792, %v3674_v35   ;;  %3612 = vst [vmem:[%s6709_s27 + $0x68] sm:$0xff] %v3548_v27  ;;  %v2750_v41 = vmul.f32 %v7518_v45, %v7311_v2  ;;  %v5828_v52 = vpop.eup %5827  ;;  %v3537_v58 = vadd.f32 %v3473_v62, %v3409_v53  ;;  %v2576_v35 = vld [vmem:[%s8786_s14 + $0x28] sm:$0xff]  ;;  %5833 = vlog2.f32 %v7484_v24  ;;  %v2649_v46 = vrot.slane %v7297_v59, 4  ;;  %v3677_v62 = vld [vmem:[#allocation7 + $0x70] sm:$0xff] }
 0x5ea   : > { %v7525_v29 = vpop.permute.xlu2 %3309  ;;  %v2740_v56 = vmul.f32 %v2671_v34, %v7311_v2  ;;  %v2739_v38 = vmul.f32 %v2671_v34, %v7366_v6  ;;  %v5830_v40 = vpop.eup %5829  ;;  %3602 = vst [vmem:[%s6709_s27 + $0x18] sm:$0xff] %v3538_v10  ;;  %v3487_v25 = vmul.f32 %v5828_v52, %v2587_v54  ;;  %v3412_v4 = vmul.f32 %v7208_v39, %v7449_v33  ;;  %v3678_v53 = vld [vmem:[#allocation7 + $0x78] sm:$0xff] }
 0x5eb   : > { %v7536_v22 = vpop.permute.xlu1 %3259  ;;  %v7538_v1 = vpop.permute.xlu0 %3254  ;;  %3601 = vst [vmem:[%s6709_s27 + $0x10] sm:$0xff] %v3537_v58  ;;  %v3477_v14 = vmul.f32 %v5830_v40, %v2577_v15  ;;  %v2833_v27 = vmul.f32 1.442695, %v2750_v41  ;;  %v2753_v44 = vmul.f32 %v7531_v11, %v7366_v6  ;;  %v2819_v39 = vmul.f32 1.442695, %v2743_v16 }
 0x5ec   : > { %v5832_v8 = vpop.eup %5831  ;;  %v2813_v28 = vmul.f32 1.442695, %v2740_v56  ;;  %v3551_v24 = vadd.f32 %v3487_v25, %v7396_v12  ;;  %v2811_v34 = vmul.f32 1.442695, %v2739_v38  ;;  %v2742_v15 = vmul.f32 %v7414_v0, %v7311_v2 }
 0x5ed   : > { %v3476_v54 = vmul.f32 %v5832_v8, %v2576_v35  ;;  %v3541_v33 = vadd.f32 %v3477_v14, %v7354_v63  ;;  %5835 = vpow2.f32 %v2833_v27  ;;  %v2839_v10 = vmul.f32 1.442695, %v2753_v44 }
 0x5ee   : > { %v2554_v41 = vadd.f32 1.0, %v7492_v50  ;;  %3615 = vst [vmem:[%s6709_s27 + $0x80] sm:$0xff] %v3551_v24  ;;  %5837 = vpow2.f32 %v2813_v28  ;;  %v7557_v58 = vperm.slane %v2649_v46, 0  ;;  %v8800_v12 = vrot.slane %v7301_v61, 4  ;;  %v3682_v24 = vld [vmem:[#allocation7 + $0x98] sm:$0xff] }
 0x5ef   : > { %v3540_v52 = vadd.f32 %v3476_v54, %v3412_v4  ;;  %3605 = vst [vmem:[%s6709_s27 + $0x30] sm:$0xff] %v3541_v33  ;;  %5839 = vpow2.f32 %v2811_v34  ;;  %v2817_v63 = vmul.f32 1.442695, %v2742_v15  ;;  %v2645_v0 = vrot.slane %v7280_v23, 7  ;;  %v5834_v50 = vpop.eup %5833  ;;  %v2579_v54 = vld [vmem:[%s8786_s14 + $0x40] sm:$0xff]  ;;  %v3680_v15 = vld [vmem:[#allocation7 + $0x88] sm:$0xff] }
 0x5f0   : > { %3809 = vperm.xlu2 %5794, %v3679_v60   ;;  %v7561_v35 = vperm.slane %v8800_v12, 0  ;;  %v8801_v16 = vperm.slane %v7452_v43, 0  ;;  %5841 = vpow2.f32 %v2839_v10  ;;  %v2756_v40 = vmul.f32 %v7557_v58, %v7311_v2  ;;  %v2590_v60 = vld [vmem:[%s8786_s14 + $0x98] sm:$0xff]  ;;  %v3681_v10 = vld [vmem:[#allocation7 + $0x90] sm:$0xff] }
 0x5f1   : > { %3804 = vperm.xlu1 %5793, %v3678_v53   ;;  %3799 = vperm.xlu0 %5792, %v3677_v62   ;;  %3604 = vst [vmem:[%s6709_s27 + $0x28] sm:$0xff] %v3540_v52  ;;  %v2653_v25 = vrot.slane %v7430_v17, 1  ;;  %v8802_v4 = vand.u32 2147483647, %v7445_v37  ;;  %5843 = vpow2.f32 %v2819_v39  ;;  %v2674_v14 = vperm.slane %v2645_v0, 0  ;;  %v2580_v53 = vld [vmem:[%s8786_s14 + $0x48] sm:$0xff] }
 0x5f2   : > { %v7568_v56 = vmul.f32 %v7320_v5, %v8801_v16  ;;  %v7570_v38 = vpop.permute.xlu2 %3324  ;;  %v7584_v5 = vperm.slane %v2945_v21, 0  ;;  %v7592_v27 = vmul.f32 %v7445_v37, %v2554_v41  ;;  %v7596_v28 = vperm.slane %v2947_v57, 0  ;;  %v2593_v41 = vld [vmem:[%s8786_s14 + $0xb0] sm:$0xff]  ;;  %v2583_v16 = vld [vmem:[%s8786_s14 + $0x60] sm:$0xff] }
 0x5f3   : > { %vm7578_vm10 = vcmp.lt.f32.partialorder %v8802_v4, 0.0004427343  ;;  %v7586_v46 = vpop.permute.xlu1 %3274  ;;  %v7588_v8 = vpop.permute.xlu0 %3269  ;;  %v7598_v44 = vperm.slane %v2948_v51, 0  ;;  %5845 = vpow2.f32 %v2817_v63  ;;  %v7601_v62 = vmul.f32 0.6931472, %v5834_v50 }
 0x5f4   : > { %v5836_v21 = vpop.eup %5835  ;;  %v2845_v34 = vmul.f32 1.442695, %v2756_v40  ;;  %v2746_v39 = vmul.f32 %v2674_v14, %v7311_v2  ;;  %v2745_v37 = vmul.f32 %v2674_v14, %v7366_v6  ;;  %v7607_v51 = vperm.slane %v2653_v25, 0 }
 0x5f5   : > { %v5838_v33 = vpop.eup %5837  ;;  %v3490_v57 = vmul.f32 %v5836_v21, %v2590_v60  ;;  %v2749_v52 = vmul.f32 %v7518_v45, %v7366_v6  ;;  %v8805_v12 = vperm.slane %v7297_v59, 0  ;;  %v3415_v45 = vmul.f32 %v7212_v42, %v7340_v9  ;;  %v2582_v21 = vld [vmem:[%s8786_s14 + $0x58] sm:$0xff] }
 0x5f6   : > { %v5840_v0 = vpop.eup %5839  ;;  %v3480_v50 = vmul.f32 %v5838_v33, %v2580_v53  ;;  %5847 = vpow2.f32 %v2845_v34  ;;  %v2825_v40 = vmul.f32 1.442695, %v2746_v39  ;;  %v2823_v4 = vmul.f32 1.442695, %v2745_v37 }
 0x5f7   : > { %v2748_v63 = vmul.f32 %v8805_v12, %v7311_v2  ;;  %v5842_v60 = vpop.eup %5841  ;;  %v3554_v25 = vadd.f32 %v3490_v57, %v7438_v32  ;;  %v3479_v14 = vmul.f32 %v5840_v0, %v2579_v54  ;;  %v2765_v12 = vmul.f32 %v7607_v51, %v7366_v6  ;;  %v3685_v0 = vld [vmem:[#allocation7 + $0xb0] sm:$0xff] }
 0x5f8   : > { %3824 = vperm.xlu2 %5794, %v3682_v24   ;;  %v5844_v7 = vpop.eup %5843  ;;  %v3544_v53 = vadd.f32 %v3480_v50, %v7375_v55  ;;  %v3493_v34 = vmul.f32 %v5842_v60, %v2593_v41  ;;  %v3418_v24 = vmul.f32 %v7216_v49, %v7322_v3  ;;  %5849 = vpow2.f32 %v2825_v40  ;;  %v2596_v3 = vld [vmem:[%s8786_s14 + $0xc8] sm:$0xff]  ;;  %v2586_v50 = vld [vmem:[%s8786_s14 + $0x78] sm:$0xff] }
 0x5f9   : > { %3819 = vperm.xlu1 %5793, %v3681_v10   ;;  %3814 = vperm.xlu0 %5792, %v3680_v15   ;;  %v5846_v32 = vpop.eup %5845  ;;  %3618 = vst [vmem:[%s6709_s27 + $0x98] sm:$0xff] %v3554_v25  ;;  %v3543_v42 = vadd.f32 %v3479_v14, %v3415_v45  ;;  %v3483_v9 = vmul.f32 %v5844_v7, %v2583_v16  ;;  %5851 = vpow2.f32 %v2823_v4  ;;  %v2831_v54 = vmul.f32 1.442695, %v2749_v52 }
 0x5fa   : > { %v7625_v39 = vpop.permute.xlu2 %3339  ;;  %3608 = vst [vmem:[%s6709_s27 + $0x48] sm:$0xff] %v3544_v53  ;;  %v3557_v55 = vadd.f32 %v3493_v34, %v7458_v19  ;;  %v3482_v49 = vmul.f32 %v5846_v32, %v2582_v21  ;;  %v2863_v10 = vmul.f32 1.442695, %v2765_v12  ;;  %v2829_v15 = vmul.f32 1.442695, %v2748_v63  ;;  %v2605_v53 = vld [vmem:[%s8786_s14 + $0x110] sm:$0xff] }
 0x5fb   : > { %v7628_v37 = vpop.permute.xlu1 %3289  ;;  %v7630_v33 = vpop.permute.xlu0 %3284  ;;  %v2558_v7 = vsel %vm7578_vm10, %v7592_v27, %v7601_v62  ;;  %v3432_v57 = vmul.f32 %v7387_v18, %v7561_v35  ;;  %3607 = vst [vmem:[%s6709_s27 + $0x40] sm:$0xff] %v3543_v42  ;;  %v3547_v41 = vadd.f32 %v3483_v9, %v7381_v26  ;;  %v3421_v19 = vmul.f32 %v7222_v20, %v7362_v36  ;;  %v3684_v18 = vld [vmem:[#allocation7 + $0xa8] sm:$0xff]  ;;  %v3683_v62 = vld [vmem:[#allocation7 + $0xa0] sm:$0xff] }
 0x5fc   : > { %v5848_v52 = vpop.eup %5847  ;;  %3621 = vst [vmem:[%s6709_s27 + $0xb0] sm:$0xff] %v3557_v55  ;;  %v3546_v63 = vadd.f32 %v3482_v49, %v3418_v24  ;;  %5853 = vpow2.f32 %v2863_v10  ;;  %v2647_v23 = vrot.slane %v7297_v59, 2  ;;  %v2755_v27 = vmul.f32 %v7557_v58, %v7366_v6  ;;  %v2585_v26 = vld [vmem:[%s8786_s14 + $0x70] sm:$0xff] }
 0x5fd   : > { %3611 = vst [vmem:[%s6709_s27 + $0x60] sm:$0xff] %v3547_v41  ;;  %v3496_v16 = vmul.f32 %v5848_v52, %v2596_v3  ;;  %5855 = vpow2.f32 %v2831_v54  ;;  %v2754_v20 = vmul.f32 %v7531_v11, %v7311_v2  ;;  %v2683_v36 = vperm.slane %v7430_v17, 0  ;;  %v2589_v55 = vld [vmem:[%s8786_s14 + $0x90] sm:$0xff] }
 0x5fe   : > { %v5850_v40 = vpop.eup %5849  ;;  %3610 = vst [vmem:[%s6709_s27 + $0x58] sm:$0xff] %v3546_v63  ;;  %5857 = vpow2.f32 %v2829_v15  ;;  %v2677_v4 = vperm.slane %v2647_v23, 0  ;;  %v2843_v60 = vmul.f32 1.442695, %v2755_v27  ;;  %v2650_v25 = vrot.slane %v7297_v59, 5  ;;  %v3688_v23 = vld [vmem:[#allocation7 + $0xc8] sm:$0xff] }
 0x5ff   : > { %v5852_v58 = vpop.eup %5851  ;;  %v3560_v45 = vadd.f32 %v3496_v16, %v3432_v57  ;;  %v3486_v14 = vmul.f32 %v5850_v40, %v2586_v50  ;;  %v2841_v21 = vmul.f32 1.442695, %v2754_v20  ;;  %v2764_v11 = vmul.f32 %v2683_v36, %v7311_v2  ;;  %v2595_v20 = vld [vmem:[%s8786_s14 + $0xc0] sm:$0xff] }
 0x600   : > { %3839 = vperm.xlu2 %5794, %v3685_v0   ;;  %v3485_v12 = vmul.f32 %v5852_v58, %v2585_v26  ;;  %v2752_v34 = vmul.f32 %v2677_v4, %v7311_v2  ;;  %v2751_v24 = vmul.f32 %v2677_v4, %v7366_v6  ;;  %5859 = vpow2.f32 %v2843_v60  ;;  %v2594_v60 = vld [vmem:[%s8786_s14 + $0xb8] sm:$0xff] }
 0x601   : > { %3834 = vperm.xlu1 %5793, %v3684_v18   ;;  %3829 = vperm.xlu0 %5792, %v3683_v62   ;;  %v7666_v32 = vsel %vm2510_vm11, %v7306_v31, %v2558_v7  ;;  %v3441_v42 = vmul.f32 %v7536_v22, %v7584_v5  ;;  %3624 = vst [vmem:[%s6709_s27 + $0xc8] sm:$0xff] %v3560_v45  ;;  %5861 = vpow2.f32 %v2841_v21  ;;  %v2950_v3 = vrot.slane %v7452_v43, 6  ;;  %v2588_v22 = vld [vmem:[%s8786_s14 + $0x88] sm:$0xff]  ;;  %v8807_v62 = vld [vmem:[#allocation46_spill] sm:$0xff] }
 0x602   : > { %v7670_v9 = vpop.permute.xlu2 %3354  ;;  %v3550_v54 = vadd.f32 %v3486_v14, %v7400_v30  ;;  %v5854_v49 = vpop.eup %5853  ;;  %v2946_v10 = vrot.slane %v7452_v43, 2  ;;  %v3549_v7 = vadd.f32 %v3485_v12, %v3421_v19  ;;  %v2680_v57 = vperm.slane %v2650_v25, 0 }
 0x603   : > { %v7677_v15 = vpop.permute.xlu1 %3304  ;;  %v7679_v31 = vpop.permute.xlu0 %3299  ;;  %v3431_v30 = vmul.f32 %v7389_v47, %v7561_v35  ;;  %v3505_v52 = vmul.f32 %v5854_v49, %v2605_v53  ;;  %v2837_v0 = vmul.f32 1.442695, %v2752_v34  ;;  %v2861_v63 = vmul.f32 1.442695, %v2764_v11  ;;  %v3687_v47 = vld [vmem:[#allocation7 + $0xc0] sm:$0xff]  ;;  %v3686_v35 = vld [vmem:[#allocation7 + $0xb8] sm:$0xff] }
 0x604   : > { %v5856_v41 = vpop.eup %5855  ;;  %3614 = vst [vmem:[%s6709_s27 + $0x78] sm:$0xff] %v3550_v54  ;;  %v8806_v18 = vperm.slane %v7301_v61, 0  ;;  %v2660_v16 = vrot.slane %v7666_v32, 1  ;;  %v2835_v26 = vmul.f32 1.442695, %v2751_v24  ;;  %v2758_v25 = vmul.f32 %v2680_v57, %v7311_v2  ;;  %v2568_v11 = vld [vmem:[%s7282_s15 + $0x18] sm:$0xff] }
 0x605   : > { %v5858_v50 = vpop.eup %5857  ;;  %3613 = vst [vmem:[%s6709_s27 + $0x70] sm:$0xff] %v3549_v7  ;;  %v3489_v27 = vmul.f32 %v5856_v41, %v2589_v55  ;;  %v3569_v40 = vadd.f32 %v3505_v52, %v3441_v42  ;;  %5863 = vpow2.f32 %v2837_v0  ;;  %v2757_v45 = vmul.f32 %v2680_v57, %v7366_v6  ;;  %v2592_v55 = vld [vmem:[%s8786_s14 + $0xa8] sm:$0xff]  ;;  %v8808_v0 = vld [vmem:[#allocation51_spill] sm:$0xff] }
 0x606   : > { %v3424_v19 = vmul.f32 %v8807_v62, %v8806_v18  ;;  %v3488_v4 = vmul.f32 %v5858_v50, %v2588_v22  ;;  %v5860_v58 = vpop.eup %5859  ;;  %5865 = vpow2.f32 %v2835_v26  ;;  %v2766_v14 = vmul.f32 %v7607_v51, %v7311_v2  ;;  %v2604_v62 = vld [vmem:[%s8786_s14 + $0x108] sm:$0xff] }
 0x607   : > { %v3553_v61 = vadd.f32 %v3489_v27, %v7455_v48  ;;  %v5862_v21 = vpop.eup %5861  ;;  %3633 = vst [vmem:[%s6709_s27 + $0x110] sm:$0xff] %v3569_v40  ;;  %v3495_v53 = vmul.f32 %v5860_v58, %v2595_v20  ;;  %5867 = vpow2.f32 %v2861_v63  ;;  %v2849_v34 = vmul.f32 1.442695, %v2758_v25  ;;  %v3697_v20 = vld [vmem:[#allocation7 + $0x110] sm:$0xff]  ;;  %v8811_v25 = vld [vmem:[#allocation54_spill] sm:$0xff] }
 0x608   : > { %3854 = vperm.xlu2 %5794, %v3688_v23   ;;  %v3552_v12 = vadd.f32 %v3488_v4, %v3424_v19  ;;  %v3494_v48 = vmul.f32 %v5862_v21, %v2594_v60  ;;  %v2847_v24 = vmul.f32 1.442695, %v2757_v45  ;;  %v2865_v42 = vmul.f32 1.442695, %v2766_v14  ;;  %v8810_v60 = vld [vmem:[#allocation49_spill] sm:$0xff]  ;;  %v3689_v58 = vld [vmem:[#allocation7 + $0xd0] sm:$0xff] }
 0x609   : > { %3849 = vperm.xlu1 %5793, %v3687_v47   ;;  %3844 = vperm.xlu0 %5792, %v3686_v35   ;;  %3617 = vst [vmem:[%s6709_s27 + $0x90] sm:$0xff] %v3553_v61  ;;  %v2763_v51 = vmul.f32 %v2683_v36, %v7366_v6  ;;  %v3559_v49 = vadd.f32 %v3495_v53, %v3431_v30  ;;  %5869 = vpow2.f32 %v2849_v34  ;;  %v2654_v7 = vrot.slane %v7430_v17, 2  ;;  %v2591_v36 = vld [vmem:[%s8786_s14 + $0xa0] sm:$0xff]  ;;  %v2598_v45 = vld [vmem:[%s8786_s14 + $0xd8] sm:$0xff] }
 0x60a   : > { %v7703_v54 = vpop.permute.xlu2 %3369  ;;  %3616 = vst [vmem:[%s6709_s27 + $0x88] sm:$0xff] %v3552_v12  ;;  %v2655_v22 = vrot.slane %v7430_v17, 3  ;;  %v7710_v57 = vmul.f32 %v2568_v11, %v7666_v32  ;;  %v3558_v63 = vadd.f32 %v3494_v48, %v8808_v0  ;;  %5871 = vpow2.f32 %v2847_v24  ;;  %v8812_v12 = vld [vmem:[#allocation56_spill] sm:$0xff]  ;;  %v2597_v48 = vld [vmem:[%s8786_s14 + $0xd0] sm:$0xff] }
 0x60b   : > { %v7712_v41 = vpop.permute.xlu1 %3319  ;;  %v7714_v52 = vpop.permute.xlu0 %3314  ;;  %v2859_v50 = vmul.f32 1.442695, %v2763_v51  ;;  %v8809_v30 = vperm.slane %v7452_v43, 0  ;;  %v7721_v18 = vperm.slane %v2660_v16, 0  ;;  %3623 = vst [vmem:[%s6709_s27 + $0xc0] sm:$0xff] %v3559_v49  ;;  %5873 = vpow2.f32 %v2865_v42  ;;  %v3690_v16 = vld [vmem:[#allocation7 + $0xd8] sm:$0xff] }
 0x60c   : > { %v5864_v23 = vpop.eup %5863  ;;  %v2685_v19 = vperm.slane %v2654_v7, 0  ;;  %3622 = vst [vmem:[%s6709_s27 + $0xb8] sm:$0xff] %v3558_v63  ;;  %v2686_v35 = vperm.slane %v2655_v22, 0  ;;  %v2658_v40 = vrot.slane %v7430_v17, 6  ;;  %v2952_v11 = vrot.slane %v7710_v57, 1  ;;  %v8813_v51 = vld [vmem:[#allocation50_spill] sm:$0xff] }
 0x60d   : > { %v3440_v27 = vmul.f32 %v7538_v1, %v8809_v30  ;;  %v5866_v26 = vpop.eup %5865  ;;  %v3492_v47 = vmul.f32 %v5864_v23, %v2592_v55  ;;  %5875 = vpow2.f32 %v2859_v50  ;;  %v3434_v1 = vmul.f32 %v8811_v25, %v8810_v60  ;;  %v2603_v23 = vld [vmem:[%s8786_s14 + $0x100] sm:$0xff] }
 0x60e   : > { %v5868_v4 = vpop.eup %5867  ;;  %v3491_v61 = vmul.f32 %v5866_v26, %v2591_v36  ;;  %v2768_v14 = vmul.f32 %v2685_v19, %v7311_v2  ;;  %v2767_v21 = vmul.f32 %v2685_v19, %v7366_v6  ;;  %v2769_v24 = vmul.f32 %v2686_v35, %v7366_v6  ;;  %v8814_v60 = vld [vmem:[#allocation48_spill] sm:$0xff] }
 0x60f   : > { %v3556_v53 = vadd.f32 %v3492_v47, %v8812_v12  ;;  %v3504_v34 = vmul.f32 %v5868_v4, %v2604_v62  ;;  %v5870_v42 = vpop.eup %5869  ;;  %v2661_v49 = vrot.slane %v7666_v32, 2  ;;  %v2781_v7 = vmul.f32 %v7721_v18, %v7366_v6  ;;  %v2606_v47 = vld [vmem:[%s8786_s14 + $0x118] sm:$0xff] }
 0x610   : > { %3899 = vperm.xlu2 %5794, %v3697_v20   ;;  %v3555_v55 = vadd.f32 %v3491_v61, %v8813_v51  ;;  %v2869_v22 = vmul.f32 1.442695, %v2768_v14  ;;  %v5872_v36 = vpop.eup %5871  ;;  %v7742_v0 = vperm.slane %v2946_v10, 0  ;;  %v3498_v50 = vmul.f32 %v5870_v42, %v2598_v45  ;;  %v3698_v42 = vld [vmem:[#allocation7 + $0x118] sm:$0xff] }
 0x611   : > { %3864 = vperm.xlu1 %5793, %v3690_v16   ;;  %3859 = vperm.xlu0 %5792, %v3689_v58   ;;  %3620 = vst [vmem:[%s6709_s27 + $0xa8] sm:$0xff] %v3556_v53  ;;  %v3568_v63 = vadd.f32 %v3504_v34, %v3440_v27  ;;  %v7746_v30 = vperm.slane %v2658_v40, 0  ;;  %v5874_v62 = vpop.eup %5873  ;;  %v3497_v26 = vmul.f32 %v5872_v36, %v2597_v48  ;;  %v2895_v20 = vmul.f32 1.442695, %v2781_v7  ;;  %v3714_v34 = vld [vmem:[#allocation7 + $0x198] sm:$0xff] }
 0x612   : > { %v7748_v19 = vpop.permute.xlu2 %3384  ;;  %3619 = vst [vmem:[%s6709_s27 + $0xa0] sm:$0xff] %v3555_v55  ;;  %5877 = vpow2.f32 %v2869_v22  ;;  %v2867_v4 = vmul.f32 1.442695, %v2767_v21  ;;  %v3442_v25 = vmul.f32 %v8814_v60, %v7584_v5  ;;  %v3562_v40 = vadd.f32 %v3498_v50, %v3434_v1  ;;  %v8815_v21 = vld [vmem:[#allocation52_spill] sm:$0xff] }
 0x613   : > { %v5876_v10 = vpop.eup %5875  ;;  %v7754_v27 = vpop.permute.xlu1 %3334  ;;  %3632 = vst [vmem:[%s6709_s27 + $0x108] sm:$0xff] %v3568_v63  ;;  %v2871_v58 = vmul.f32 1.442695, %v2769_v24  ;;  %v2656_v61 = vrot.slane %v7430_v17, 4  ;;  %v7760_v45 = vperm.slane %v2952_v11, 0  ;;  %v7762_v14 = vperm.slane %v2661_v49, 0 }
 0x614   : > { %v7756_v16 = vpop.permute.xlu0 %3329  ;;  %v3561_v12 = vadd.f32 %v3497_v26, %v8815_v21  ;;  %5879 = vpow2.f32 %v2895_v20  ;;  %v3444_v5 = vmul.f32 %v7586_v46, %v7742_v0  ;;  %v2953_v53 = vrot.slane %v7710_v57, 2  ;;  %3626 = vst [vmem:[%s6709_s27 + $0xd8] sm:$0xff] %v3562_v40  ;;  %v3713_v24 = vld [vmem:[#allocation7 + $0x190] sm:$0xff]  ;;  %v2608_v11 = vld [vmem:[%s8786_s14 + $0x128] sm:$0xff] }
 0x615   : > { %v3506_v48 = vmul.f32 %v5874_v62, %v2606_v47  ;;  %v3503_v1 = vmul.f32 %v5876_v10, %v2603_v23  ;;  %5881 = vpow2.f32 %v2867_v4  ;;  %v2657_v51 = vrot.slane %v7430_v17, 5  ;;  %v7777_v63 = vld [vmem:[%s8779_s2 + $0x8] sm:$0xff]  ;;  %v2621_v10 = vld [vmem:[%s8786_s14 + $0x190] sm:$0xff]  ;;  %v2607_v60 = vld [vmem:[%s8786_s14 + $0x120] sm:$0xff] }
 0x616   : > { %3625 = vst [vmem:[%s6709_s27 + $0xd0] sm:$0xff] %v3561_v12  ;;  %v2770_v55 = vmul.f32 %v2686_v35, %v7311_v2  ;;  %v2775_v49 = vmul.f32 %v7746_v30, %v7366_v6  ;;  %5883 = vpow2.f32 %v2871_v58  ;;  %v2687_v22 = vperm.slane %v2656_v61, 0 }
 0x617   : > { %v3570_v46 = vadd.f32 %v3506_v48, %v3442_v25  ;;  %v3567_v7 = vadd.f32 %v3503_v1, %v7568_v56  ;;  %v2784_v50 = vmul.f32 %v7777_v63, %v7762_v14  ;;  %v2688_v2 = vperm.slane %v2657_v51, 0 }
 0x618   : > { %v5878_v36 = vpop.eup %5877  ;;  %3984 = vperm.xlu2 %5794, %v3714_v34   ;;  %v2873_v35 = vmul.f32 1.442695, %v2770_v55  ;;  %v2883_v23 = vmul.f32 1.442695, %v2775_v49  ;;  %v7783_v6 = vperm.slane %v2950_v3, 0  ;;  %v2951_v56 = vrot.slane %v7452_v43, 7 }
 0x619   : > { %v3457_v62 = vmul.f32 %v7625_v39, %v7760_v45  ;;  %3979 = vperm.xlu1 %5793, %v3713_v24   ;;  %3904 = vperm.xlu0 %5792, %v3698_v42   ;;  %3634 = vst [vmem:[%s6709_s27 + $0x118] sm:$0xff] %v3570_v46  ;;  %v3508_v26 = vmul.f32 %v5878_v36, %v2608_v11  ;;  %v2949_v47 = vrot.slane %v7452_v43, 5  ;;  %v2901_v3 = vmul.f32 1.442695, %v2784_v50  ;;  %v8816_v34 = vld [vmem:[#allocation53_spill] sm:$0xff]  ;;  %v2609_v42 = vld [vmem:[%s8786_s14 + $0x130] sm:$0xff] }
 0x61a   : > { %v5880_v20 = vpop.eup %5879  ;;  %v7790_v4 = vpop.permute.xlu2 %3399  ;;  %3631 = vst [vmem:[%s6709_s27 + $0x100] sm:$0xff] %v3567_v7  ;;  %v2774_v25 = vmul.f32 %v7777_v63, %v2688_v2  ;;  %5885 = vpow2.f32 %v2873_v35  ;;  %v3443_v39 = vmul.f32 %v7588_v8, %v7742_v0  ;;  %v3445_v48 = vmul.f32 %v8816_v34, %v7596_v28  ;;  %v3715_v11 = vld [vmem:[#allocation7 + $0x1a0] sm:$0xff]  ;;  %v3700_v46 = vld [vmem:[#allocation7 + $0x128] sm:$0xff]  ;;  %v7816_v50 = vld [vmem:[%s8779_s2] sm:$0xff] }
 0x61b   : > { %v7798_v40 = vpop.permute.xlu1 %3349  ;;  %v3521_v61 = vmul.f32 %v5880_v20, %v2621_v10  ;;  %v3572_v21 = vadd.f32 %v3508_v26, %v3444_v5  ;;  %5887 = vpow2.f32 %v2883_v23  ;;  %v5882_v12 = vpop.eup %5881  ;;  %v7804_v1 = vperm.slane %v2953_v53, 0  ;;  %v3699_v7 = vld [vmem:[#allocation7 + $0x120] sm:$0xff]  ;;  %v2610_v36 = vld [vmem:[%s8786_s14 + $0x138] sm:$0xff]  ;;  %v2615_v10 = vld [vmem:[%s8786_s14 + $0x160] sm:$0xff] }
 0x61c   : > { %v7800_v58 = vpop.permute.xlu0 %3344  ;;  %v2663_v24 = vrot.slane %v7666_v32, 4  ;;  %v2772_v8 = vmul.f32 %v7777_v63, %v2687_v22  ;;  %v5884_v0 = vpop.eup %5883  ;;  %v3507_v5 = vmul.f32 %v5882_v12, %v2607_v60  ;;  %5889 = vpow2.f32 %v2901_v3  ;;  %v2624_v12 = vld [vmem:[%s8786_s14 + $0x1a8] sm:$0xff]  ;;  %v2614_v34 = vld [vmem:[%s8786_s14 + $0x158] sm:$0xff] }
 0x61d   : > { %v3585_v51 = vadd.f32 %v3521_v61, %v3457_v62  ;;  %3636 = vst [vmem:[%s6709_s27 + $0x128] sm:$0xff] %v3572_v21  ;;  %v2881_v55 = vmul.f32 1.442695, %v2774_v25  ;;  %v3446_v49 = vmul.f32 %v7630_v33, %v7596_v28  ;;  %v7812_v53 = vperm.slane %v2949_v47, 0 }
 0x61e   : > { %v2771_v35 = vmul.f32 %v7816_v50, %v2687_v22  ;;  %v2651_v23 = vrot.slane %v7297_v59, 6  ;;  %v3571_v62 = vadd.f32 %v3507_v5, %v3443_v39  ;;  %v7821_v26 = vperm.slane %v2663_v24, 0 }
 0x61f   : > { %3649 = vst [vmem:[%s6709_s27 + $0x190] sm:$0xff] %v3585_v51  ;;  %5891 = vpow2.f32 %v2881_v55  ;;  %v3509_v20 = vmul.f32 %v5884_v0, %v2609_v42  ;;  %v3451_v33 = vmul.f32 %v7525_v29, %v7783_v6  ;;  %v2955_v47 = vrot.slane %v7710_v57, 4 }
 0x620   : > { %v5886_v28 = vpop.eup %5885  ;;  %3989 = vperm.xlu2 %5794, %v3715_v11   ;;  %v2877_v22 = vmul.f32 1.442695, %v2772_v8  ;;  %v2773_v60 = vmul.f32 %v7816_v50, %v2688_v2  ;;  %3635 = vst [vmem:[%s6709_s27 + $0x120] sm:$0xff] %v3571_v62  ;;  %v2787_v25 = vmul.f32 %v7816_v50, %v7821_v26  ;;  %v3460_v21 = vmul.f32 %v7670_v9, %v7804_v1 }
 0x621   : > { %v5888_v3 = vpop.eup %5887  ;;  %3914 = vperm.xlu1 %5793, %v3700_v46   ;;  %3909 = vperm.xlu0 %5792, %v3699_v7   ;;  %v3510_v39 = vmul.f32 %v5886_v28, %v2610_v36  ;;  %v3573_v61 = vadd.f32 %v3509_v20, %v3445_v48  ;;  %v2875_v2 = vmul.f32 1.442695, %v2771_v35  ;;  %v2681_v5 = vperm.slane %v2651_v23, 0  ;;  %v8817_v35 = vld [vmem:[#allocation57_spill] sm:$0xff]  ;;  %v3695_v23 = vld [vmem:[#allocation7 + $0x100] sm:$0xff] }
 0x622   : > { %v7833_v29 = vpop.permute.xlu2 %3734  ;;  %v3515_v24 = vmul.f32 %v5888_v3, %v2615_v10  ;;  %5893 = vpow2.f32 %v2877_v22  ;;  %v5890_v42 = vpop.eup %5889  ;;  %v2907_v11 = vmul.f32 1.442695, %v2787_v25  ;;  %v2879_v48 = vmul.f32 1.442695, %v2773_v60  ;;  %v3696_v10 = vld [vmem:[#allocation7 + $0x108] sm:$0xff] }
 0x623   : > { %v7837_v8 = vpop.permute.xlu1 %3364  ;;  %v3574_v51 = vadd.f32 %v3510_v39, %v3446_v49  ;;  %3637 = vst [vmem:[%s6709_s27 + $0x130] sm:$0xff] %v3573_v61  ;;  %v3450_v9 = vmul.f32 %v7677_v15, %v7812_v53  ;;  %v2956_v55 = vrot.slane %v7710_v57, 5  ;;  %v3524_v46 = vmul.f32 %v5890_v42, %v2624_v12  ;;  %v3716_v15 = vld [vmem:[#allocation7 + $0x1a8] sm:$0xff] }
 0x624   : > { %v7839_v0 = vpop.permute.xlu0 %3359  ;;  %v3579_v7 = vadd.f32 %v3515_v24, %v3451_v33  ;;  %v3448_v62 = vmul.f32 %v8817_v35, %v7598_v44  ;;  %v7847_v20 = vperm.slane %v2955_v47, 0  ;;  %5895 = vpow2.f32 %v2907_v11  ;;  %v2612_v33 = vld [vmem:[%s8786_s14 + $0x148] sm:$0xff] }
 0x625   : > { %v5892_v36 = vpop.eup %5891  ;;  %3638 = vst [vmem:[%s6709_s27 + $0x138] sm:$0xff] %v3574_v51  ;;  %v2760_v49 = vmul.f32 %v7777_v63, %v2681_v5  ;;  %v2691_v28 = vperm.slane %v7666_v32, 0  ;;  %v3588_v22 = vadd.f32 %v3524_v46, %v3460_v21  ;;  %5897 = vpow2.f32 %v2875_v2 }
 0x626   : > { %v3514_v60 = vmul.f32 %v5892_v36, %v2614_v34  ;;  %3643 = vst [vmem:[%s6709_s27 + $0x160] sm:$0xff] %v3579_v7  ;;  %v3047_v3 = vperm.slane %v7710_v57, 0  ;;  %v2782_v47 = vmul.f32 %v7777_v63, %v7721_v18  ;;  %5899 = vpow2.f32 %v2879_v48  ;;  %v2627_v48 = vld [vmem:[%s8786_s14 + $0x1c0] sm:$0xff] }
 0x627   : > { %v2853_v25 = vmul.f32 1.442695, %v2760_v49  ;;  %v7857_v61 = vperm.slane %v2956_v55, 0  ;;  %v2779_v21 = vmul.f32 %v7816_v50, %v2691_v28  ;;  %3652 = vst [vmem:[%s6709_s27 + $0x1a8] sm:$0xff] %v3588_v22  ;;  %v2659_v34 = vrot.slane %v7430_v17, 7  ;;  %v2611_v55 = vld [vmem:[%s8786_s14 + $0x140] sm:$0xff] }
 0x628   : > { %v5894_v39 = vpop.eup %5893  ;;  %3894 = vperm.xlu2 %5794, %v3696_v10   ;;  %v3578_v12 = vadd.f32 %v3514_v60, %v3450_v9  ;;  %v2957_v24 = vrot.slane %v7710_v57, 6  ;;  %v2897_v18 = vmul.f32 1.442695, %v2782_v47  ;;  %v3447_v42 = vmul.f32 %v7628_v37, %v7598_v44  ;;  %v2613_v37 = vld [vmem:[%s8786_s14 + $0x150] sm:$0xff]  ;;  %v3702_v47 = vld [vmem:[#allocation7 + $0x138] sm:$0xff] }
 0x629   : > { %3889 = vperm.xlu1 %5793, %v3695_v23   ;;  %3994 = vperm.xlu0 %5792, %v3716_v15   ;;  %v3512_v2 = vmul.f32 %v5894_v39, %v2612_v33  ;;  %5901 = vpow2.f32 %v2853_v25  ;;  %v2891_v51 = vmul.f32 1.442695, %v2779_v21  ;;  %v7870_v9 = vperm.slane %v2659_v34, 0  ;;  %v3711_v15 = vld [vmem:[#allocation7 + $0x180] sm:$0xff]  ;;  %v2600_v33 = vld [vmem:[%s8786_s14 + $0xe8] sm:$0xff]  ;;  %v3701_v25 = vld [vmem:[#allocation7 + $0x130] sm:$0xff] }
 0x62a   : > { %v7865_v11 = vpop.permute.xlu2 %3749  ;;  %3642 = vst [vmem:[%s6709_s27 + $0x158] sm:$0xff] %v3578_v12  ;;  %v5896_v17 = vpop.eup %5895  ;;  %v3449_v46 = vmul.f32 %v7679_v31, %v7812_v53  ;;  %v3463_v7 = vmul.f32 %v7703_v54, %v7847_v20  ;;  %5903 = vpow2.f32 %v2897_v18  ;;  %v2783_v23 = vmul.f32 %v7816_v50, %v7762_v14 }
 0x62b   : > { %v3380_v36 = vpop.permute.xlu1 %3379  ;;  %v3576_v44 = vadd.f32 %v3512_v2, %v3448_v62  ;;  %v5898_v10 = vpop.eup %5897  ;;  %5905 = vpow2.f32 %v2891_v51  ;;  %v2759_v31 = vmul.f32 %v7816_v50, %v2681_v5  ;;  %v3527_v54 = vmul.f32 %v5896_v17, %v2627_v48 }
 0x62c   : > { %v7876_v35 = vpop.permute.xlu0 %3374  ;;  %v7880_v49 = vmul.f32 %v3380_v36, %v7857_v61  ;;  %v5900_v53 = vpop.eup %5899  ;;  %v2780_v22 = vmul.f32 %v7777_v63, %v2691_v28  ;;  %v3511_v60 = vmul.f32 %v5898_v10, %v2611_v55  ;;  %v2652_v62 = vrot.slane %v7297_v59, 7  ;;  %v2622_v55 = vld [vmem:[%s8786_s14 + $0x198] sm:$0xff] }
 0x62d   : > { %3640 = vst [vmem:[%s6709_s27 + $0x148] sm:$0xff] %v3576_v44  ;;  %v7889_v39 = vperm.slane %v2957_v24, 0  ;;  %v2899_v21 = vmul.f32 1.442695, %v2783_v23  ;;  %v3513_v14 = vmul.f32 %v5900_v53, %v2613_v37  ;;  %v2778_v5 = vmul.f32 %v7777_v63, %v7870_v9 }
 0x62e   : > { %v3458_v28 = vmul.f32 %v7800_v58, %v7760_v45  ;;  %v3591_v34 = vadd.f32 %v3527_v54, %v3463_v7  ;;  %v2893_v18 = vmul.f32 1.442695, %v2780_v22  ;;  %v3575_v2 = vadd.f32 %v3511_v60, %v3447_v42  ;;  %v8818_v7 = vld [vmem:[#allocation47_spill] sm:$0xff]  ;;  %v3718_v22 = vld [vmem:[#allocation7 + $0x1b8] sm:$0xff]  ;;  %v3717_v60 = vld [vmem:[#allocation7 + $0x1b0] sm:$0xff] }
 0x62f   : > { %v5902_v12 = vpop.eup %5901  ;;  %5907 = vpow2.f32 %v2899_v21  ;;  %v3577_v59 = vadd.f32 %v3513_v14, %v3449_v46  ;;  %v2889_v51 = vmul.f32 1.442695, %v2778_v5  ;;  %v2851_v17 = vmul.f32 1.442695, %v2759_v31  ;;  %v2619_v31 = vld [vmem:[%s8786_s14 + $0x180] sm:$0xff]  ;;  %v3712_v21 = vld [vmem:[#allocation7 + $0x188] sm:$0xff] }
 0x630   : > { %3969 = vperm.xlu2 %5794, %v3711_v15   ;;  %v3500_v24 = vmul.f32 %v5902_v12, %v2600_v33  ;;  %v5904_v48 = vpop.eup %5903  ;;  %3655 = vst [vmem:[%s6709_s27 + $0x1c0] sm:$0xff] %v3591_v34  ;;  %5909 = vpow2.f32 %v2893_v18  ;;  %v2682_v36 = vperm.slane %v2652_v62, 0  ;;  %v3455_v58 = vmul.f32 %v7756_v16, %v3047_v3  ;;  %v2623_v14 = vld [vmem:[%s8786_s14 + $0x1a0] sm:$0xff]  ;;  %v2620_v12 = vld [vmem:[%s8786_s14 + $0x188] sm:$0xff] }
 0x631   : > { %3924 = vperm.xlu1 %5793, %v3702_v47   ;;  %3919 = vperm.xlu0 %5792, %v3701_v25   ;;  %v5906_v45 = vpop.eup %5905  ;;  %v3522_v46 = vmul.f32 %v5904_v48, %v2622_v55  ;;  %3639 = vst [vmem:[%s6709_s27 + $0x140] sm:$0xff] %v3575_v2  ;;  %v7906_v37 = vperm.slane %v2951_v56, 0  ;;  %v2666_v53 = vrot.slane %v7666_v32, 7  ;;  %5911 = vpow2.f32 %v2889_v51 }
 0x632   : > { %v7900_v42 = vpop.permute.xlu2 %3764  ;;  %v3564_v44 = vadd.f32 %v3500_v24, %v8818_v7  ;;  %3641 = vst [vmem:[%s6709_s27 + $0x150] sm:$0xff] %v3577_v59  ;;  %v2762_v16 = vmul.f32 %v7777_v63, %v2682_v36  ;;  %v3459_v15 = vmul.f32 %v7798_v40, %v7804_v1  ;;  %v3519_v56 = vmul.f32 %v5906_v45, %v2619_v31  ;;  %v2618_v24 = vld [vmem:[%s8786_s14 + $0x178] sm:$0xff] }
 0x633   : > { %v7908_v10 = vpop.permute.xlu1 %3394  ;;  %v7919_v43 = vadd.f32 %v3522_v46, %v3458_v28  ;;  %v2662_v33 = vrot.slane %v7666_v32, 3  ;;  %v7923_v62 = vperm.slane %v2666_v53, 0  ;;  %5913 = vpow2.f32 %v2851_v17 }
 0x634   : > { %v3390_v23 = vpop.permute.xlu0 %3389  ;;  %3628 = vst [vmem:[%s6709_s27 + $0xe8] sm:$0xff] %v3564_v44  ;;  %v2857_v47 = vmul.f32 1.442695, %v2762_v16  ;;  %v3456_v40 = vmul.f32 %v7754_v27, %v3047_v3  ;;  %v2958_v1 = vrot.slane %v7710_v57, 7  ;;  %v3583_v5 = vadd.f32 %v3519_v56, %v3455_v58  ;;  %v2599_v44 = vld [vmem:[%s8786_s14 + $0xe0] sm:$0xff]  ;;  %v5959_v56 = vld [vmem:[%s6709_s27 + $0x8] sm:$0xff] }
 0x635   : > { %v7917_v54 = vmul.f32 %v3390_v23, %v7889_v39  ;;  %v5908_v25 = vpop.eup %5907  ;;  %3650 = vst [vmem:[%s6709_s27 + $0x198] sm:$0xff] %v7919_v43  ;;  %v2761_v28 = vmul.f32 %v7816_v50, %v2682_v36  ;;  %v2694_v2 = vperm.slane %v2662_v33, 0  ;;  %v2793_v59 = vmul.f32 %v7816_v50, %v7923_v62 }
 0x636   : > { %v5910_v34 = vpop.eup %5909  ;;  %v3523_v18 = vmul.f32 %v5908_v25, %v2623_v14  ;;  %5915 = vpow2.f32 %v2857_v47  ;;  %3647 = vst [vmem:[%s6709_s27 + $0x180] sm:$0xff] %v3583_v5  ;;  %v3454_v48 = vmul.f32 %v7570_v38, %v7906_v37  ;;  %v3054_v45 = vperm.slane %v2958_v1, 0  ;;  %v3704_v5 = vld [vmem:[#allocation7 + $0x148] sm:$0xff] }
 0x637   : > { %v3520_v27 = vmul.f32 %v5910_v34, %v2620_v12  ;;  %v2855_v3 = vmul.f32 1.442695, %v2761_v28  ;;  %v5912_v51 = vpop.eup %5911  ;;  %v2786_v17 = vmul.f32 %v7777_v63, %v2694_v2  ;;  %v2919_v36 = vmul.f32 1.442695, %v2793_v59  ;;  %v3703_v12 = vld [vmem:[#allocation7 + $0x140] sm:$0xff] }
 0x638   : > { %4004 = vperm.xlu2 %5794, %v3718_v22   ;;  %v7940_v55 = vadd.f32 %v3523_v18, %v3459_v15  ;;  %v3518_v7 = vmul.f32 %v5912_v51, %v2618_v24  ;;  %v2954_v23 = vrot.slane %v7710_v57, 3  ;;  %v2602_v15 = vld [vmem:[%s8786_s14 + $0xf8] sm:$0xff]  ;;  %v4048_v22 = vmul.f32 %v5959_v56, %v7833_v29  ;;  %v2601_v18 = vld [vmem:[%s8786_s14 + $0xf0] sm:$0xff] }
 0x639   : > { %3999 = vperm.xlu1 %5793, %v3717_v60   ;;  %3974 = vperm.xlu0 %5792, %v3712_v21   ;;  %v3584_v46 = vadd.f32 %v3520_v27, %v3456_v40  ;;  %5917 = vpow2.f32 %v2855_v3  ;;  %v5914_v38 = vpop.eup %5913  ;;  %v2905_v16 = vmul.f32 1.442695, %v2786_v17  ;;  %v5960_v60 = vld [vmem:[%s6709_s27] sm:$0xff]  ;;  %v2785_v57 = vmul.f32 %v7816_v50, %v2694_v2  ;;  %v8819_v2 = vld [vmem:[#allocation55_spill] sm:$0xff] }
 0x63a   : > { %v7943_v58 = vpop.permute.xlu2 %3779  ;;  %3651 = vst [vmem:[%s6709_s27 + $0x1a0] sm:$0xff] %v7940_v55  ;;  %5919 = vpow2.f32 %v2919_v36  ;;  %v3719_v40 = vld [vmem:[#allocation7 + $0x1c0] sm:$0xff]  ;;  %v3582_v1 = vadd.f32 %v3518_v7, %v3454_v48  ;;  %v3499_v21 = vmul.f32 %v5914_v38, %v2599_v44  ;;  %v2776_v29 = vmul.f32 %v7777_v63, %v7746_v30 }
 0x63b   : > { %v3730_v31 = vpop.permute.xlu1 %3729  ;;  %3648 = vst [vmem:[%s6709_s27 + $0x188] sm:$0xff] %v3584_v46  ;;  %5921 = vpow2.f32 %v2905_v16  ;;  %v2777_v28 = vmul.f32 %v7816_v50, %v7870_v9  ;;  %v3050_v59 = vperm.slane %v2954_v23, 0  ;;  %v2903_v24 = vmul.f32 1.442695, %v2785_v57  ;;  %v2633_v48 = vld [vmem:[%s8786_s14 + $0x1f0] sm:$0xff] }
 0x63c   : > { %v3405_v53 = vpop.permute.xlu0 %3404  ;;  %v4047_v33 = vmul.f32 %v5960_v60, %v3730_v31  ;;  %v5916_v25 = vpop.eup %5915  ;;  %3646 = vst [vmem:[%s6709_s27 + $0x178] sm:$0xff] %v3582_v1  ;;  %v3563_v27 = vadd.f32 %v3499_v21, %v8819_v2  ;;  %v2885_v17 = vmul.f32 1.442695, %v2776_v29  ;;  %v7971_v9 = vld [vmem:[%s1121_s19] ss:$0 sm:$0xff]  ;;  %v3469_v44 = vmul.f32 %v7790_v4, %v3054_v45  ;;  %v8821_v60 = vld [vmem:[#allocation58_spill] sm:$0xff] }
 0x63d   : > { %v7953_v47 = vmul.f32 %v3405_v53, %v3054_v45  ;;  %v3502_v34 = vmul.f32 %v5916_v25, %v2602_v15  ;;  %5923 = vpow2.f32 %v2903_v24  ;;  %v2887_v46 = vmul.f32 1.442695, %v2777_v28  ;;  %v5961_v45 = vld [vmem:[%s6709_s27 + $0x18] sm:$0xff]  ;;  %v5963_v1 = vld [vmem:[%s7282_s15] sm:$0xff]  ;;  %v2625_v24 = vld [vmem:[%s8786_s14 + $0x1b0] sm:$0xff] }
 0x63e   : > { %v4111_v14 = vadd.f32 %v4048_v22, %v4047_v33  ;;  %3627 = vst [vmem:[%s6709_s27 + $0xe0] sm:$0xff] %v3563_v27  ;;  %5925 = vpow2.f32 %v2885_v17  ;;  %v3462_v16 = vmul.f32 %v7837_v8, %v3050_v59  ;;  %v2664_v22 = vrot.slane %v7666_v32, 5 }
 0x63f   : > { %v5918_v3 = vpop.eup %5917  ;;  %v3566_v30 = vadd.f32 %v3502_v34, %v7503_v13  ;;  %v2626_v13 = vld [vmem:[%s8786_s14 + $0x1b8] sm:$0xff]  ;;  %v7986_v21 = vmul.f32 %v5963_v1, %v7971_v9  ;;  %v3461_v8 = vmul.f32 %v7839_v0, %v3050_v59  ;;  %5927 = vpow2.f32 %v2887_v46  ;;  %v3705_v34 = vld [vmem:[#allocation7 + $0x150] sm:$0xff]  ;;  %v5964_v59 = vld [vmem:[%s6709_s27 + $0x20] sm:$0xff] }
 0x640   : > { %v4112_v51 = vrot.slane %v4111_v14, 4  ;;  %4009 = vperm.xlu2 %5794, %v3719_v40   ;;  %v5920_v36 = vpop.eup %5919  ;;  %v3501_v7 = vmul.f32 %v5918_v3, %v2601_v18  ;;  %v5962_v40 = vld [vmem:[%s6709_s27 + $0x10] sm:$0xff]  ;;  %v3720_v18 = vld [vmem:[#allocation7 + $0x1c8] sm:$0xff]  ;;  %v2788_v27 = vmul.f32 %v7777_v63, %v7821_v26  ;;  %v3452_v0 = vmul.f32 %v7714_v52, %v7783_v6  ;;  %v2616_v26 = vld [vmem:[%s8786_s14 + $0x168] sm:$0xff] }
 0x641   : > { %3934 = vperm.xlu1 %5793, %v3704_v5   ;;  %3929 = vperm.xlu0 %5792, %v3703_v12   ;;  %v3533_v31 = vmul.f32 %v5920_v36, %v2633_v48  ;;  %3630 = vst [vmem:[%s6709_s27 + $0xf8] sm:$0xff] %v3566_v30  ;;  %v5922_v53 = vpop.eup %5921  ;;  %v7990_v12 = vpop.f32.mrf.mxu1  ;;  %v8001_v17 = vperm.slane %v2664_v22, 0 }
 0x642   : > { %v4113_v38 = vadd.f32 %v4112_v51, %v4111_v14  ;;  %v7975_v23 = vpop.permute.xlu2 %3794  ;;  %v3565_v33 = vadd.f32 %v3501_v7, %v8821_v60  ;;  %v3706_v14 = vld [vmem:[#allocation7 + $0x158] sm:$0xff]  ;;  %v3526_v5 = vmul.f32 %v5922_v53, %v2626_v13  ;;  %v4051_v51 = vmul.f32 %v5964_v59, %v7865_v11 }
 0x643   : > { %v3745_v15 = vpop.permute.xlu1 %3744  ;;  %v3597_v2 = vadd.f32 %v3533_v31, %v3469_v44  ;;  %v5924_v3 = vpop.eup %5923  ;;  %v2665_v44 = vrot.slane %v7666_v32, 6  ;;  %v5476_v52 = vmul.f32 -1.442695, %v7990_v12  ;;  %v2909_v6 = vmul.f32 1.442695, %v2788_v27  ;;  %v3721_v27 = vld [vmem:[#allocation7 + $0x1d0] sm:$0xff] }
 0x644   : > { %v3740_v56 = vpop.permute.xlu0 %3739  ;;  %v4114_v4 = vrot.slane %v4113_v38, 2  ;;  %v4050_v25 = vmul.f32 %v5961_v45, %v3745_v15  ;;  %3629 = vst [vmem:[%s6709_s27 + $0xf0] sm:$0xff] %v3565_v33  ;;  %v7999_v48 = vadd.f32 %v3526_v5, %v3462_v16  ;;  %v5926_v30 = vpop.eup %5925  ;;  %v3525_v7 = vmul.f32 %v5924_v3, %v2625_v24  ;;  %v2617_v5 = vld [vmem:[%s8786_s14 + $0x170] sm:$0xff] }
 0x645   : > { %v4049_v57 = vmul.f32 %v5962_v40, %v3740_v56  ;;  %3661 = vst [vmem:[%s6709_s27 + $0x1f0] sm:$0xff] %v3597_v2  ;;  %v2790_v11 = vmul.f32 %v7777_v63, %v8001_v17  ;;  %v8015_v16 = vperm.slane %v2665_v44, 0  ;;  %v5928_v15 = vpop.eup %5927  ;;  %v5965_v56 = vld [vmem:[%s6709_s27 + $0x38] sm:$0xff]  ;;  %5929 = vpow2.f32 %v2909_v6 }
 0x646   : > { %v4115_v29 = vadd.f32 %v4114_v4, %v4113_v38  ;;  %3654 = vst [vmem:[%s6709_s27 + $0x1b8] sm:$0xff] %v7999_v48  ;;  %v3516_v38 = vmul.f32 %v5926_v30, %v2616_v26  ;;  %v8013_v32 = vadd.f32 %v3525_v7, %v3461_v8  ;;  %v4054_v22 = vmul.f32 %v5965_v56, %v7900_v42  ;;  %v5967_v8 = vld [vmem:[%s6709_s27 + $0x28] sm:$0xff]  ;;  %v3722_v2 = vld [vmem:[#allocation7 + $0x1d8] sm:$0xff] }
 0x647   : > { %v4118_v28 = vadd.f32 %v4050_v25, %v4049_v57  ;;  %v2913_v4 = vmul.f32 1.442695, %v2790_v11  ;;  %v5966_v57 = vld [vmem:[%s6709_s27 + $0x30] sm:$0xff]  ;;  %v3453_v42 = vmul.f32 %v7712_v41, %v7906_v37  ;;  %v4347_v30 = vrot.slane %v7986_v21, 1  ;;  %v2628_v37 = vld [vmem:[%s8786_s14 + $0x1c8] sm:$0xff]  ;;  %v5968_v56 = vld [vmem:[%s6709_s27 + $0x48] sm:$0xff] }
 0x648   : > { %v4116_v36 = vrot.slane %v4115_v29, 1  ;;  %3944 = vperm.xlu2 %5794, %v3706_v14   ;;  %v3580_v45 = vadd.f32 %v3516_v38, %v3452_v0  ;;  %3653 = vst [vmem:[%s6709_s27 + $0x1b0] sm:$0xff] %v8013_v32  ;;  %v3517_v0 = vmul.f32 %v5928_v15, %v2617_v5 }
 0x649   : > { %v4119_v46 = vrot.slane %v4118_v28, 4  ;;  %3939 = vperm.xlu1 %5793, %v3705_v34   ;;  %4014 = vperm.xlu0 %5792, %v3720_v18   ;;  %5931 = vpow2.f32 %v2913_v4  ;;  %v3466_v4 = vmul.f32 %v7748_v19, %v7857_v61  ;;  %v4349_v19 = vrot.slane %v7986_v21, 3 }
 0x64a   : > { %v4117_v13 = vadd.f32 %v4116_v36, %v4115_v29  ;;  %v8011_v53 = vpop.permute.xlu2 %3809  ;;  %v3707_v29 = vld [vmem:[#allocation7 + $0x160] sm:$0xff]  ;;  %3644 = vst [vmem:[%s6709_s27 + $0x168] sm:$0xff] %v3580_v45  ;;  %5933 = vpow2.f32 %v5476_v52 }
 0x64b   : > { %v4120_v31 = vadd.f32 %v4119_v46, %v4118_v28  ;;  %v3760_v60 = vpop.permute.xlu1 %3759  ;;  %v2792_v28 = vmul.f32 %v7777_v63, %v8015_v16  ;;  %v5930_v63 = vpop.eup %5929  ;;  %v3464_v46 = vmul.f32 %v7876_v35, %v7847_v20  ;;  %v5969_v45 = vld [vmem:[%s6709_s27 + $0x40] sm:$0xff] }
 0x64c   : > { %v3755_v33 = vpop.permute.xlu0 %3754  ;;  %v8020_v25 = vadd.f32 %v7986_v21, %v4117_v13  ;;  %v4053_v1 = vmul.f32 %v5966_v57, %v3760_v60  ;;  %v3528_v13 = vmul.f32 %v5930_v63, %v2628_v37  ;;  %v8043_v60 = vpop.f32.mrf.mxu1  ;;  %v3724_v57 = vld [vmem:[#allocation7 + $0x1e8] sm:$0xff] }
 0x64d   : > { %v4121_v40 = vrot.slane %v4120_v31, 2  ;;  %v4052_v14 = vmul.f32 %v5967_v8, %v3755_v33  ;;  %v2917_v3 = vmul.f32 1.442695, %v2792_v28 }
 0x64e   : > { %v4132_v18 = vadd.f32 %v4054_v22, %v4053_v1  ;;  %v5477_v1 = vmul.f32 -1.442695, %v8043_v60  ;;  %v8049_v8 = vadd.f32 %v3528_v13, %v3464_v46 }
 0x64f   : > { %v4122_v34 = vadd.f32 %v4121_v40, %v4120_v31  ;;  %v4125_v24 = vadd.f32 %v4052_v14, %v4051_v51  ;;  %5935 = vpow2.f32 %v2917_v3  ;;  %v3581_v51 = vadd.f32 %v3517_v0, %v3453_v42  ;;  %v5932_v6 = vpop.eup %5931  ;;  %v2630_v31 = vld [vmem:[%s8786_s14 + $0x1d8] sm:$0xff]  ;;  %v3723_v42 = vld [vmem:[#allocation7 + $0x1e0] sm:$0xff] }
 0x650   : > { %v4133_v36 = vrot.slane %v4132_v18, 4  ;;  %3949 = vperm.xlu2 %5794, %v3707_v29   ;;  %v5934_v33 = vpop.eup %5933  ;;  %v3708_v29 = vld [vmem:[#allocation7 + $0x168] sm:$0xff]  ;;  %v3530_v28 = vmul.f32 %v5932_v6, %v2630_v31  ;;  %5937 = vpow2.f32 %v5477_v1  ;;  %3656 = vst [vmem:[%s6709_s27 + $0x1c8] sm:$0xff] %v8049_v8  ;;  %v4348_v3 = vrot.slane %v7986_v21, 2  ;;  %v5972_v31 = vld [vmem:[%s6709_s27 + $0x50] sm:$0xff] }
 0x651   : > { %v4123_v59 = vrot.slane %v4122_v34, 1  ;;  %v4126_v41 = vrot.slane %v4125_v24, 4  ;;  %4024 = vperm.xlu1 %5793, %v3722_v2   ;;  %4019 = vperm.xlu0 %5792, %v3721_v27   ;;  %3645 = vst [vmem:[%s6709_s27 + $0x170] sm:$0xff] %v3581_v51 }
 0x652   : > { %v4134_v44 = vadd.f32 %v4133_v36, %v4132_v18  ;;  %v8036_v52 = vpop.permute.xlu2 %3824  ;;  %v3468_v18 = vmul.f32 %v7908_v10, %v7889_v39  ;;  %v8060_v39 = vadd.f32 %v3530_v28, %v3466_v4 }
 0x653   : > { %v4124_v7 = vadd.f32 %v4123_v59, %v4122_v34  ;;  %v4127_v26 = vadd.f32 %v4126_v41, %v4125_v24  ;;  %v3775_v11 = vpop.permute.xlu1 %3774  ;;  %v2632_v24 = vld [vmem:[%s8786_s14 + $0x1e8] sm:$0xff]  ;;  %v8058_v59 = vadd.f32 1.0, %v5934_v33  ;;  %v3725_v33 = vld [vmem:[#allocation7 + $0x1f0] sm:$0xff] }
 0x654   : > { %v3770_v38 = vpop.permute.xlu0 %3769  ;;  %v4135_v20 = vrot.slane %v4134_v44, 2  ;;  %v4056_v22 = vmul.f32 %v5968_v56, %v3775_v11  ;;  %3658 = vst [vmem:[%s6709_s27 + $0x1d8] sm:$0xff] %v8060_v39  ;;  %v5971_v11 = vld [vmem:[%s6709_s27 + $0x60] sm:$0xff]  ;;  %v5973_v56 = vld [vmem:[%s6709_s27 + $0x58] sm:$0xff] }
 0x655   : > { %v8040_v15 = vadd.f32 %v4347_v30, %v4124_v7  ;;  %v4128_v35 = vrot.slane %v4127_v26, 2  ;;  %v4055_v40 = vmul.f32 %v5969_v45, %v3770_v38  ;;  %v5936_v34 = vpop.eup %5935  ;;  %v5970_v7 = vld [vmem:[%s6709_s27 + $0x68] sm:$0xff]  ;;  %5939 = vrcp.f32 %v8058_v59  ;;  %v3710_v45 = vld [vmem:[#allocation7 + $0x178] sm:$0xff] }
 0x656   : > { %v4136_v14 = vadd.f32 %v4135_v20, %v4134_v44  ;;  %v3532_v0 = vmul.f32 %v5936_v34, %v2632_v24  ;;  %v4060_v44 = vmul.f32 %v5970_v7, %v7975_v23  ;;  %v5938_v13 = vpop.eup %5937  ;;  %v4057_v20 = vmul.f32 %v5972_v31, %v7943_v58 }
 0x657   : > { %v4129_v5 = vadd.f32 %v4128_v35, %v4127_v26  ;;  %v4139_v61 = vadd.f32 %v4056_v22, %v4055_v40  ;;  %v8081_v23 = vadd.f32 1.0, %v5938_v13  ;;  %v3709_v40 = vld [vmem:[#allocation7 + $0x170] sm:$0xff]  ;;  %v4350_v58 = vrot.slane %v7986_v21, 4  ;;  %v5976_v13 = vld [vmem:[%s6709_s27 + $0x80] sm:$0xff] }
 0x658   : > { %v4137_v2 = vrot.slane %v4136_v14, 1  ;;  %4034 = vperm.xlu2 %5794, %v3724_v57   ;;  %v8064_v51 = vadd.f32 %v3532_v0, %v3468_v18  ;;  %v2789_v34 = vmul.f32 %v7816_v50, %v8001_v17  ;;  %v4063_v31 = vmul.f32 %v5976_v13, %v8011_v53 }
 0x659   : > { %v4130_v27 = vrot.slane %v4129_v5, 1  ;;  %v4140_v30 = vrot.slane %v4139_v61, 4  ;;  %4029 = vperm.xlu1 %5793, %v3723_v42   ;;  %3954 = vperm.xlu0 %5792, %v3708_v29   ;;  %5941 = vrcp.f32 %v8081_v23  ;;  %vm4574_vm12 = vweird.f32 %v8081_v23 }
 0x65a   : > { %v4138_v10 = vadd.f32 %v4137_v2, %v4136_v14  ;;  %v8062_v41 = vpop.permute.xlu2 %3839  ;;  %3660 = vst [vmem:[%s6709_s27 + $0x1e8] sm:$0xff] %v8064_v51  ;;  %vm4559_vm0 = vweird.f32 %v8058_v59 }
 0x65b   : > { %v4131_v36 = vadd.f32 %v4130_v27, %v4129_v5  ;;  %v4141_v37 = vadd.f32 %v4140_v30, %v4139_v61  ;;  %v3790_v63 = vpop.permute.xlu1 %3789  ;;  %v8089_v18 = vpop.eup %5939  ;;  %v5974_v30 = vld [vmem:[%s6709_s27 + $0x78] sm:$0xff] }
 0x65c   : > { %v3785_v46 = vpop.permute.xlu0 %3784  ;;  %v8070_v26 = vadd.f32 %v4349_v19, %v4138_v10  ;;  %v4059_v38 = vmul.f32 %v5971_v11, %v3790_v63  ;;  %v3692_v63 = vld [vmem:[#allocation7 + $0xe8] sm:$0xff]  ;;  %v4555_v17 = vmul.f32 %v8089_v18, %v8058_v59  ;;  %v3726_v11 = vld [vmem:[#allocation7 + $0x1f8] sm:$0xff]  ;;  %vm4560_vm1 = vweird.f32 %v8089_v18 }
 0x65d   : > { %v8072_v6 = vadd.f32 %v4348_v3, %v4131_v36  ;;  %v4142_v35 = vrot.slane %v4141_v37, 2  ;;  %v4058_v22 = vmul.f32 %v5973_v56, %v3785_v46  ;;  %v5975_v36 = vld [vmem:[%s6709_s27 + $0x70] sm:$0xff]  ;;  %vm8168_vm2 = vmor %vm4559_vm0, %vm4560_vm1  ;;  %vm4843_vm0 = vcmask 1045509  }
 0x65e   : > { %v4153_v4 = vadd.f32 %v4060_v44, %v4059_v38  ;;  %v3691_v44 = vld [vmem:[#allocation7 + $0xe0] sm:$0xff]  ;;  %v2911_v38 = vmul.f32 1.442695, %v2789_v34  ;;  %v4580_v34 = vand.u32 2147483648, %v8081_v23  ;;  %vm4846_vm1 = vcmask 1046534  }
 0x65f   : > { %v4143_v57 = vadd.f32 %v4142_v35, %v4141_v37  ;;  %v4146_v1 = vadd.f32 %v4058_v22, %v4057_v20  ;;  %v8095_v46 = vpop.eup %5941  ;;  %v4352_v20 = vrot.slane %v7986_v21, 6 }
 0x660   : > { %v4154_v14 = vrot.slane %v4153_v4, 4  ;;  %4039 = vperm.xlu2 %5794, %v3725_v33   ;;  %v4570_v56 = vmul.f32 %v8095_v46, %v8081_v23  ;;  %v4351_v33 = vrot.slane %v7986_v21, 5  ;;  %5943 = vpow2.f32 %v2911_v38 }
 0x661   : > { %v4144_v5 = vrot.slane %v4143_v57, 1  ;;  %v4147_v42 = vrot.slane %v4146_v1, 4  ;;  %3964 = vperm.xlu1 %5793, %v3710_v45   ;;  %3959 = vperm.xlu0 %5792, %v3709_v40   ;;  %v5977_v45 = vld [vmem:[%s6709_s27 + $0x98] sm:$0xff]  ;;  %vm4575_vm13 = vweird.f32 %v8095_v46 }
 0x662   : > { %v4155_v29 = vadd.f32 %v4154_v14, %v4153_v4  ;;  %v8085_v28 = vpop.permute.xlu2 %3854  ;;  %v4066_v40 = vmul.f32 %v5977_v45, %v8036_v52  ;;  %vm8128_vm14 = vmor %vm4574_vm12, %vm4575_vm13  ;;  %vm4834_vm13 = vcmask 1042434  }
 0x663   : > { %v4145_v19 = vadd.f32 %v4144_v5, %v4143_v57  ;;  %v4148_v61 = vadd.f32 %v4147_v42, %v4146_v1  ;;  %v3805_v24 = vpop.permute.xlu1 %3804  ;;  %v4571_v1 = vsub.f32 1.0, %v4570_v56  ;;  %v5980_v56 = vld [vmem:[%s7282_s15 + $0x8] sm:$0xff] }
 0x664   : > { %v3800_v2 = vpop.permute.xlu0 %3799  ;;  %v4156_v27 = vrot.slane %v4155_v29, 2  ;;  %v4062_v10 = vmul.f32 %v5974_v30, %v3805_v24  ;;  %v5979_v30 = vld [vmem:[%s6709_s27 + $0x88] sm:$0xff] }
 0x665   : > { %v8091_v3 = vadd.f32 %v4350_v58, %v4145_v19  ;;  %v4149_v0 = vrot.slane %v4148_v61, 2  ;;  %v4061_v37 = vmul.f32 %v5975_v36, %v3800_v2  ;;  %v2791_v58 = vmul.f32 %v7816_v50, %v8015_v16  ;;  %v2629_v36 = vld [vmem:[%s8786_s14 + $0x1d0] sm:$0xff] }
 0x666   : > { %v4157_v7 = vadd.f32 %v4156_v27, %v4155_v29  ;;  %v4572_v52 = vmul.f32 %v8095_v46, %v4571_v1  ;;  %v4578_v29 = vand.u32 2147483647, %v8081_v23  ;;  %v5978_v27 = vld [vmem:[%s6709_s27 + $0x90] sm:$0xff]  ;;  %v4581_v23 = vor.u32 1.1754944e-38, %v4580_v34 }
 0x667   : > { %v4150_v35 = vadd.f32 %v4149_v0, %v4148_v61  ;;  %v4160_v4 = vadd.f32 %v4062_v10, %v4061_v37  ;;  %v4556_v37 = vsub.f32 1.0, %v4555_v17  ;;  %v3693_v17 = vld [vmem:[#allocation7 + $0xf0] sm:$0xff] }
 0x668   : > { %v4158_v22 = vrot.slane %v4157_v7, 1  ;;  %3874 = vperm.xlu2 %5794, %v3692_v63   ;;  %v4573_v16 = vadd.f32 %v8095_v46, %v4572_v52  ;;  %vm8138_vm15 = vcmp.eq.f32.partialorder %v4578_v29, 8.507059e+37  ;;  %v4563_v29 = vand.u32 2147483647, %v8058_v59 }
 0x669   : > { %v4151_v57 = vrot.slane %v4150_v35, 1  ;;  %3869 = vperm.xlu1 %5793, %v3691_v44   ;;  %4044 = vperm.xlu0 %5792, %v3726_v11   ;;  %v4161_v14 = vrot.slane %v4160_v4, 4  ;;  %v5944_v44 = vpop.eup %5943  ;;  %v4557_v1 = vmul.f32 %v8089_v18, %v4556_v37  ;;  %v5982_v37 = vld [vmem:[%s6709_s27 + $0xa0] sm:$0xff] }
 0x66a   : > { %v4159_v53 = vadd.f32 %v4158_v22, %v4157_v7  ;;  %v8109_v5 = vpop.permute.xlu2 %3899  ;;  %v8132_v7 = vpop.f32.mrf.mxu3  ;;  %v8136_v22 = vmul.f32 %v5980_v56, %v7971_v9  ;;  %v4577_v45 = vsel %vm8128_vm14, %v8095_v46, %v4573_v16  ;;  %vm8180_vm3 = vcmp.eq.f32.partialorder %v4563_v29, 8.507059e+37 }
 0x66b   : > { %v4152_v42 = vadd.f32 %v4151_v57, %v4150_v35  ;;  %v3820_v19 = vpop.permute.xlu1 %3819  ;;  %v4162_v2 = vadd.f32 %v4161_v14, %v4160_v4  ;;  %v2915_v35 = vmul.f32 1.442695, %v2791_v58  ;;  %v3529_v4 = vmul.f32 %v5944_v44, %v2629_v36 }
 0x66c   : > { %v3815_v61 = vpop.permute.xlu0 %3814  ;;  %v8116_v24 = vadd.f32 %v4352_v20, %v4159_v53  ;;  %v4065_v0 = vmul.f32 %v5978_v27, %v3820_v19  ;;  %v3694_v20 = vld [vmem:[#allocation7 + $0xf8] sm:$0xff]  ;;  %v4353_v53 = vrot.slane %v7986_v21, 7  ;;  %v4582_v34 = vsel %vm8138_vm15, %v4581_v23, %v4577_v45  ;;  %v2631_v23 = vld [vmem:[%s8786_s14 + $0x1e0] sm:$0xff] }
 0x66d   : > { %v4064_v10 = vmul.f32 %v5979_v30, %v3815_v61  ;;  %v8121_v50 = vadd.f32 %v4351_v33, %v4152_v42  ;;  %v4163_v11 = vrot.slane %v4162_v2, 2  ;;  %v8149_v14 = vadd.f32 %v3529_v4, %v7880_v49 }
 0x66e   : > { %v4174_v38 = vadd.f32 %v4066_v40, %v4065_v0  ;;  %5945 = vpow2.f32 %v2915_v35  ;;  %v5981_v0 = vld [vmem:[%s6709_s27 + $0xa8] sm:$0xff]  ;;  %v4565_v36 = vand.u32 2147483648, %v8058_v59  ;;  %v8173_v63 = vmul.f32 %v4582_v34, %v8043_v60 }
 0x66f   : > { %v4167_v13 = vadd.f32 %v4064_v10, %v4063_v31  ;;  %v4164_v57 = vadd.f32 %v4163_v11, %v4162_v2  ;;  %3657 = vst [vmem:[%s6709_s27 + $0x1d0] sm:$0xff] %v8149_v14  ;;  %v4558_v10 = vadd.f32 %v8089_v18, %v4557_v1  ;;  %v4354_v60 = vrot.slane %v8136_v22, 1 }
 0x670   : > { %v4175_v40 = vrot.slane %v4174_v38, 4  ;;  %v4566_v45 = vor.u32 1.1754944e-38, %v4565_v36  ;;  %vm4837_vm14 = vcmask 1043459   ;;  %vm4840_vm15 = vcmask 1044484  }
 0x671   : > { %v4168_v31 = vrot.slane %v4167_v13, 4  ;;  %3884 = vperm.xlu1 %5793, %v3694_v20   ;;  %3879 = vperm.xlu0 %5792, %v3693_v17   ;;  %v4165_v58 = vrot.slane %v4164_v57, 1  ;;  %v5478_v17 = vmul.f32 -1.442695, %v8132_v7  ;;  %v4562_v4 = vsel %vm8168_vm2, %v8089_v18, %v4558_v10 }
 0x672   : > { %v4176_v42 = vadd.f32 %v4175_v40, %v4174_v38  ;;  %v3985_v46 = vpop.permute.xlu2 %3984  ;;  %v4567_v10 = vsel %vm8180_vm3, %v4566_v45, %v4562_v4  ;;  %vm4849_vm2 = vcmask 1047559  }
 0x673   : > { %v4169_v52 = vadd.f32 %v4168_v31, %v4167_v13  ;;  %v8156_v21 = vmul.f32 %v3985_v46, %v7919_v43  ;;  %v3835_v19 = vpop.permute.xlu1 %3834  ;;  %v4166_v61 = vadd.f32 %v4165_v58, %v4164_v57  ;;  %v8177_v13 = vpop.f32.mrf.mxu3  ;;  %v5983_v31 = vld [vmem:[%s6709_s27 + $0xb0] sm:$0xff]  ;;  %v5984_v46 = vld [vmem:[%s6709_s27 + $0xc8] sm:$0xff]  ;;  %5947 = vpow2.f32 %v5478_v17 }
 0x674   : > { %v3830_v49 = vpop.permute.xlu0 %3829  ;;  %v4177_v2 = vrot.slane %v4176_v42, 2  ;;  %v4068_v30 = vmul.f32 %v5981_v0, %v3835_v19  ;;  %v5946_v35 = vpop.eup %5945  ;;  %v5479_v40 = vmul.f32 -1.442695, %v8177_v13  ;;  %v4069_v1 = vmul.f32 %v5983_v31, %v8062_v41  ;;  %v5986_v0 = vld [vmem:[%s6709_s27 + $0xb8] sm:$0xff] }
 0x675   : > { %v4170_v27 = vrot.slane %v4169_v52, 2  ;;  %v4067_v16 = vmul.f32 %v5982_v37, %v3830_v49  ;;  %v8175_v44 = vadd.f32 %v4353_v53, %v4166_v61  ;;  %v4629_v53 = vrot.slane %v8173_v63, 1 }
 0x676   : > { %v4178_v11 = vadd.f32 %v4177_v2, %v4176_v42  ;;  %v4072_v29 = vmul.f32 %v5984_v46, %v8085_v28  ;;  %v3531_v49 = vmul.f32 %v5946_v35, %v2631_v23  ;;  %5949 = vpow2.f32 %v5479_v40 }
 0x677   : > { %v4171_v38 = vadd.f32 %v4170_v27, %v4169_v52  ;;  %v4181_v20 = vadd.f32 %v4068_v30, %v4067_v16  ;;  %v5985_v27 = vld [vmem:[%s6709_s27 + $0xc0] sm:$0xff]  ;;  %v8207_v59 = vmul.f32 %v4567_v10, %v7990_v12  ;;  %v4355_v23 = vrot.slane %v8136_v22, 2 }
 0x678   : > { %v4179_v56 = vrot.slane %v4178_v11, 1 }
 0x679   : > { %v4172_v33 = vrot.slane %v4171_v38, 1  ;;  %v4182_v57 = vrot.slane %v4181_v20, 4 }
 0x67a   : > { %v4180_v58 = vadd.f32 %v4179_v56, %v4178_v11  ;;  %v8193_v52 = vpop.permute.xlu2 %3989 }
 0x67b   : > { %v4173_v42 = vadd.f32 %v4172_v33, %v4171_v38  ;;  %v4183_v34 = vadd.f32 %v4182_v57, %v4181_v20  ;;  %v3850_v18 = vpop.permute.xlu1 %3849  ;;  %v8204_v38 = vadd.f32 %v3531_v49, %v7917_v54  ;;  %v5987_v54 = vld [vmem:[%s8779_s2 + $0x8] sm:$0xff]  ;;  %v4623_v49 = vrot.slane %v8207_v59, 2 }
 0x67c   : > { %v3845_v19 = vpop.permute.xlu0 %3844  ;;  %v4416_v61 = vadd.f32 %v4354_v60, %v4180_v58  ;;  %v4071_v41 = vmul.f32 %v5985_v27, %v3850_v18  ;;  %v5948_v60 = vpop.eup %5947  ;;  %v2794_v31 = vmul.f32 %v5987_v54, %v7923_v62  ;;  %v4624_v58 = vrot.slane %v8207_v59, 3 }
 0x67d   : > { %v4415_v2 = vadd.f32 %v8136_v22, %v4173_v42  ;;  %v4070_v30 = vmul.f32 %v5986_v0, %v3845_v19  ;;  %v4184_v36 = vrot.slane %v4183_v34, 2  ;;  %3659 = vst [vmem:[%s6709_s27 + $0x1e0] sm:$0xff] %v8204_v38  ;;  %v8221_v62 = vadd.f32 1.0, %v5948_v60 }
 0x67e   : > { %v4691_v37 = vmul.f32 %v4629_v53, %v4416_v61  ;;  %v4195_v16 = vadd.f32 %v4072_v29, %v4071_v41  ;;  %v4622_v53 = vrot.slane %v8207_v59, 1  ;;  %v2921_v0 = vmul.f32 1.442695, %v2794_v31 }
 0x67f   : > { %v4690_v28 = vmul.f32 %v8173_v63, %v4415_v2  ;;  %v4188_v43 = vadd.f32 %v4070_v30, %v4069_v1  ;;  %v4185_v11 = vadd.f32 %v4184_v36, %v4183_v34  ;;  %v5950_v1 = vpop.eup %5949  ;;  %v5988_v36 = vld [vmem:[%s6709_s27 + $0xd8] sm:$0xff]  ;;  %5951 = vrcp.f32 %v8221_v62 }
 0x680   : > { %v4727_v20 = vpack.c.bf16 %v4691_v37, %v4691_v37  ;;  %v4196_v35 = vrot.slane %v4195_v16, 4  ;;  %v4683_v30 = vmul.f32 %v4622_v53, %v8040_v15  ;;  %v8227_v10 = vadd.f32 1.0, %v5950_v1  ;;  %v5990_v1 = vld [vmem:[%s6709_s27 + $0x190] sm:$0xff] }
 0x681   : > { %v4726_v17 = vpack.c.bf16 %v4690_v28, %v4690_v28  ;;  %v4189_v56 = vrot.slane %v4188_v43, 4  ;;  %v4186_v33 = vrot.slane %v4185_v11, 1  ;;  %v5989_v28 = vld [vmem:[%s6709_s27 + $0xd0] sm:$0xff]  ;;  %v4684_v60 = vmul.f32 %v4623_v49, %v8072_v6 }
 0x682   : > { %v4807_v4 = vunpack.c.l.b16 %v4727_v20  ;;  %v4197_v45 = vadd.f32 %v4196_v35, %v4195_v16  ;;  %v8212_v40 = vpop.permute.xlu2 %3894  ;;  %v4682_v35 = vmul.f32 %v8207_v59, %v8020_v25  ;;  %5953 = vpow2.f32 %v2921_v0 }
 0x683   : > { %v4190_v57 = vadd.f32 %v4189_v56, %v4188_v43  ;;  %v4187_v12 = vadd.f32 %v4186_v33, %v4185_v11  ;;  %v3865_v42 = vpop.permute.xlu1 %3864  ;;  %v4806_v34 = vunpack.c.l.b16 %v4726_v17  ;;  %v4357_v11 = vrot.slane %v8136_v22, 4 }
 0x684   : > { %v3860_v46 = vpop.permute.xlu0 %3859  ;;  %v4851_v29 = vrot.slane %v4807_v4, 7  ;;  %v4198_v18 = vrot.slane %v4197_v45, 2  ;;  %v4074_v37 = vmul.f32 %v5988_v36, %v3865_v42  ;;  %v4356_v17 = vrot.slane %v8136_v22, 3 }
 0x685   : > { %v4191_v19 = vrot.slane %v4190_v57, 2  ;;  %v8219_v61 = vadd.f32 %v4355_v23, %v4187_v12  ;;  %v4073_v16 = vmul.f32 %v5989_v28, %v3860_v46  ;;  %v4685_v56 = vmul.f32 %v4624_v58, %v8070_v26  ;;  %v5991_v12 = vld [vmem:[%s6709_s27 + $0x110] sm:$0xff] }
 0x686   : > { %v8224_v2 = vsel %vm4831_vm4, %v4851_v29, %v4806_v34  ;;  %v4199_v27 = vadd.f32 %v4198_v18, %v4197_v45  ;;  %v4625_v4 = vrot.slane %v8207_v59, 4  ;;  %5955 = vrcp.f32 %v8227_v10  ;;  %v5992_v29 = vld [vmem:[%s6709_s27 + $0x118] sm:$0xff] }
 0x687   : > { %v4192_v41 = vadd.f32 %v4191_v19, %v4190_v57  ;;  %v4202_v15 = vadd.f32 %v4074_v37, %v4073_v16  ;;  %v4719_v54 = vpack.c.bf16 %v4683_v30, %v4683_v30  ;;  %v4718_v58 = vpack.c.bf16 %v4682_v35, %v4682_v35  ;;  %v5994_v30 = vld [vmem:[%s7282_s15 + $0x18] sm:$0xff] }
 0x688   : > { %v4200_v43 = vrot.slane %v4199_v27, 1  ;;  %v4081_v42 = vmul.f32 %v5991_v12, %v8109_v5  ;;  %v4721_v18 = vpack.c.bf16 %v4685_v56, %v4685_v56  ;;  %v4720_v19 = vpack.c.bf16 %v4684_v60, %v4684_v60 }
 0x689   : > { %v4193_v20 = vrot.slane %v4192_v41, 1  ;;  %v4203_v45 = vrot.slane %v4202_v15, 4  ;;  %v8259_v36 = vmul.f32 %v5994_v30, %v7971_v9  ;;  %v8261_v16 = vunpack.c.l.b16 %v4719_v54 }
 0x68a   : > { %v4201_v33 = vadd.f32 %v4200_v43, %v4199_v27  ;;  %v8244_v6 = vpop.permute.xlu2 %3969  ;;  %v8251_v27 = vpop.eup %5951  ;;  %v4686_v43 = vmul.f32 %v4625_v4, %v8091_v3  ;;  %v8268_v35 = vunpack.c.l.b16 %v4718_v58  ;;  %v4626_v56 = vrot.slane %v8207_v59, 5 }
 0x68b   : > { %v4194_v23 = vadd.f32 %v4193_v20, %v4192_v41  ;;  %v3980_v57 = vpop.permute.xlu1 %3979  ;;  %v4204_v46 = vadd.f32 %v4203_v45, %v4202_v15  ;;  %v5993_v41 = vld [vmem:[%s7282_s15 + $0x10] sm:$0xff]  ;;  %v5954_v28 = vpop.eup %5953  ;;  %v2634_v20 = vld [vmem:[%s8786_s14 + $0x1f8] sm:$0xff]  ;;  %v8271_v60 = vunpack.c.l.b16 %v4721_v18  ;;  %v4585_v3 = vmul.f32 %v8251_v27, %v8221_v62 }
 0x68c   : > { %v3905_v25 = vpop.permute.xlu0 %3904  ;;  %v8240_v26 = vadd.f32 %v4357_v11, %v4201_v33  ;;  %v4097_v53 = vmul.f32 %v5990_v1, %v3980_v57  ;;  %v8255_v0 = vmul.f32 %v5993_v41, %v7971_v9  ;;  %v8273_v33 = vunpack.c.l.b16 %v4720_v19  ;;  %v5996_v19 = vld [vmem:[%s6709_s27 + $0x120] sm:$0xff]  ;;  %v5998_v41 = vld [vmem:[%s6709_s27 + $0x1a8] sm:$0xff] }
 0x68d   : > { %v8242_v31 = vadd.f32 %v4356_v17, %v4194_v23  ;;  %v4082_v34 = vmul.f32 %v5992_v29, %v3905_v25  ;;  %v4205_v37 = vrot.slane %v4204_v46, 2  ;;  %v8266_v17 = vpop.eup %5955  ;;  %v4358_v45 = vrot.slane %v8136_v22, 5 }
 0x68e   : > { %v4286_v49 = vadd.f32 %v8156_v21, %v4097_v53  ;;  %v3534_v1 = vmul.f32 %v5954_v28, %v2634_v20  ;;  %v4830_v53 = vrot.slane %v8261_v16, 7  ;;  %v4722_v58 = vpack.c.bf16 %v4686_v43, %v4686_v43 }
 0x68f   : > { %v4230_v5 = vadd.f32 %v4082_v34, %v4081_v42  ;;  %v4206_v15 = vadd.f32 %v4205_v37, %v4204_v46  ;;  %v4600_v12 = vmul.f32 %v8266_v17, %v8227_v10  ;;  %v5995_v34 = vld [vmem:[%s6709_s27 + $0x128] sm:$0xff]  ;;  %v4586_v37 = vsub.f32 1.0, %v4585_v3 }
 0x690   : > { %v4287_v21 = vrot.slane %v4286_v49, 4  ;;  %v8290_v20 = vadd.f32 %v3534_v1, %v7953_v47  ;;  %v4361_v3 = vrot.slane %v8255_v0, 1  ;;  %vm4589_vm5 = vweird.f32 %v8221_v62 }
 0x691   : > { %v4231_v9 = vrot.slane %v4230_v5, 4  ;;  %v4207_v4 = vrot.slane %v4206_v15, 1  ;;  %v4593_v47 = vand.u32 2147483647, %v8221_v62  ;;  %v4587_v1 = vmul.f32 %v8251_v27, %v4586_v37 }
 0x692   : > { %v4288_v23 = vadd.f32 %v4287_v21, %v4286_v49  ;;  %v8285_v28 = vpop.permute.xlu2 %4004  ;;  %3662 = vst [vmem:[%s6709_s27 + $0x1f8] sm:$0xff] %v8290_v20  ;;  %vm4590_vm6 = vweird.f32 %v8251_v27  ;;  %vm4604_vm7 = vweird.f32 %v8227_v10  ;;  %vm4605_vm8 = vweird.f32 %v8266_v17 }
 0x693   : > { %v4232_v57 = vadd.f32 %v4231_v9, %v4230_v5  ;;  %v3915_v25 = vpop.permute.xlu1 %3914  ;;  %v4208_v46 = vadd.f32 %v4207_v4, %v4206_v15  ;;  %v8292_v15 = vunpack.c.l.b16 %v4722_v58  ;;  %v4601_v9 = vsub.f32 1.0, %v4600_v12  ;;  %vm8329_vm9 = vmor %vm4589_vm5, %vm4590_vm6 }
 0x694   : > { %v3910_v54 = vpop.permute.xlu0 %3909  ;;  %v4289_v42 = vrot.slane %v4288_v23, 2  ;;  %v4084_v18 = vmul.f32 %v5995_v34, %v3915_v25  ;;  %v4368_v25 = vrot.slane %v8259_v36, 1  ;;  %v4099_v58 = vmul.f32 %v8193_v52, %v7940_v55  ;;  %vm8342_vm10 = vmor %vm4604_vm7, %vm4605_vm8 }
 0x695   : > { %v4233_v29 = vrot.slane %v4232_v57, 2  ;;  %v4083_v49 = vmul.f32 %v5996_v19, %v3910_v54  ;;  %v8287_v16 = vadd.f32 %v4358_v45, %v4208_v46  ;;  %v4630_v54 = vrot.slane %v8173_v63, 2 }
 0x696   : > { %v4290_v5 = vadd.f32 %v4289_v42, %v4288_v23  ;;  %v4595_v45 = vand.u32 2147483648, %v8221_v62  ;;  %v4608_v52 = vand.u32 2147483647, %v8227_v10  ;;  %vm8348_vm11 = vcmp.eq.f32.partialorder %v4593_v47, 8.507059e+37 }
 0x697   : > { %v4234_v43 = vadd.f32 %v4233_v29, %v4232_v57  ;;  %v4237_v21 = vadd.f32 %v4084_v18, %v4083_v49  ;;  %v4602_v18 = vmul.f32 %v8266_v17, %v4601_v9  ;;  %v5997_v49 = vld [vmem:[%s6709_s27 + $0x100] sm:$0xff]  ;;  %v4588_v9 = vadd.f32 %v8251_v27, %v4587_v1 }
 0x698   : > { %v4291_v4 = vrot.slane %v4290_v5, 1  ;;  %v4632_v1 = vrot.slane %v8173_v63, 4  ;;  %vm8355_vm12 = vcmp.eq.f32.partialorder %v4608_v52, 8.507059e+37 }
 0x699   : > { %v4235_v34 = vrot.slane %v4234_v43, 1  ;;  %v4238_v23 = vrot.slane %v4237_v21, 4 }
 0x69a   : > { %v4292_v57 = vadd.f32 %v4291_v4, %v4290_v5  ;;  %v5999_v5 = vld [vmem:[%s6709_s27 + $0x108] sm:$0xff]  ;;  %v4610_v4 = vand.u32 2147483648, %v8227_v10  ;;  %v4592_v10 = vsel %vm8329_vm9, %v8251_v27, %v4588_v9 }
 0x69b   : > { %v4236_v12 = vadd.f32 %v4235_v34, %v4234_v43  ;;  %v4239_v42 = vadd.f32 %v4238_v23, %v4237_v21  ;;  %v3890_v46 = vpop.permute.xlu1 %3889  ;;  %v4080_v43 = vmul.f32 %v5999_v5, %v8212_v40  ;;  %v8325_v34 = vmul.f32 %v4626_v56, %v8121_v50 }
 0x69c   : > { %v3995_v29 = vpop.permute.xlu0 %3994  ;;  %v8306_v19 = vadd.f32 %v4368_v25, %v4292_v57  ;;  %v4079_v11 = vmul.f32 %v5997_v49, %v3890_v46  ;;  %v4832_v25 = vsel %vm4831_vm4, %v4830_v53, %v8268_v35  ;;  %v4603_v40 = vadd.f32 %v8266_v17, %v4602_v18 }
 0x69d   : > { %v4100_v30 = vmul.f32 %v5998_v41, %v3995_v29  ;;  %v8312_v37 = vadd.f32 %v4361_v3, %v4236_v12  ;;  %v4240_v55 = vrot.slane %v4239_v42, 2  ;;  %v4631_v35 = vrot.slane %v8173_v63, 3 }
 0x69e   : > { %v4223_v23 = vadd.f32 %v4080_v43, %v4079_v11  ;;  %v4362_v56 = vrot.slane %v8255_v0, 2  ;;  %v4692_v53 = vmul.f32 %v4630_v54, %v8219_v61  ;;  %v4611_v46 = vor.u32 1.1754944e-38, %v4610_v4  ;;  %v6001_v43 = vld [vmem:[%s6709_s27 + $0x130] sm:$0xff] }
 0x69f   : > { %v4293_v21 = vadd.f32 %v4100_v30, %v4099_v58  ;;  %v4241_v41 = vadd.f32 %v4240_v55, %v4239_v42  ;;  %v8334_v30 = vpop.permute.xlu2 %4009  ;;  %v4596_v58 = vor.u32 1.1754944e-38, %v4595_v45  ;;  %v4607_v61 = vsel %vm8342_vm10, %v8266_v17, %v4603_v40  ;;  %v6000_v45 = vld [vmem:[%s6709_s27 + $0x138] sm:$0xff] }
 0x6a0   : > { %v4224_v54 = vrot.slane %v4223_v23, 4  ;;  %v4694_v5 = vmul.f32 %v4632_v1, %v8240_v26  ;;  %v4693_v27 = vmul.f32 %v4631_v35, %v8242_v31  ;;  %v4728_v9 = vpack.c.bf16 %v4692_v53, %v4692_v53 }
 0x6a1   : > { %v4294_v57 = vrot.slane %v4293_v21, 4  ;;  %v4242_v62 = vrot.slane %v4241_v41, 1  ;;  %v4597_v4 = vsel %vm8348_vm11, %v4596_v58, %v4592_v10  ;;  %v4612_v17 = vsel %vm8355_vm12, %v4611_v46, %v4607_v61  ;;  %v6003_v61 = vld [vmem:[%s6709_s27 + $0x188] sm:$0xff] }
 0x6a2   : > { %v8838_v40 = vrot.slane %v8273_v33, 6  ;;  %v4225_v31 = vadd.f32 %v4224_v54, %v4223_v23  ;;  %v4369_v1 = vrot.slane %v8259_v36, 2  ;;  %v8839_v35 = vrot.slane %v8271_v60, 5 }
 0x6a3   : > { %v4295_v12 = vadd.f32 %v4294_v57, %v4293_v21  ;;  %v4243_v29 = vadd.f32 %v4242_v62, %v4241_v41  ;;  %v3925_v18 = vpop.permute.xlu1 %3924  ;;  %v4839_v62 = vrot.slane %v8292_v15, 4  ;;  %v4730_v53 = vpack.c.bf16 %v4694_v5, %v4694_v5  ;;  %v6002_v15 = vld [vmem:[%s6709_s27 + $0x180] sm:$0xff] }
 0x6a4   : > { %v3920_v49 = vpop.permute.xlu0 %3919  ;;  %v4086_v55 = vmul.f32 %v6000_v45, %v3925_v18  ;;  %v4835_v26 = vsel %vm4834_vm13, %v8838_v40, %v4832_v25  ;;  %v4729_v11 = vpack.c.bf16 %v4693_v27, %v4693_v27  ;;  %v8383_v33 = vmul.f32 %v4612_v17, %v8177_v13 }
 0x6a5   : > { %v4296_v47 = vrot.slane %v4295_v12, 2  ;;  %v8365_v52 = vadd.f32 %v4362_v56, %v4243_v29  ;;  %v4085_v21 = vmul.f32 %v6001_v43, %v3920_v49  ;;  %v4838_v50 = vsel %vm4837_vm14, %v8839_v35, %v4835_v26 }
 0x6a6   : > { %v4723_v56 = vpack.c.bf16 %v8325_v34, %v8325_v34  ;;  %v4633_v25 = vrot.slane %v8173_v63, 5  ;;  %v8388_v60 = vunpack.c.l.b16 %v4728_v9  ;;  %v8391_v10 = vmul.f32 %v4597_v4, %v8132_v7 }
 0x6a7   : > { %v4297_v41 = vadd.f32 %v4296_v47, %v4295_v12  ;;  %v4244_v3 = vadd.f32 %v4086_v55, %v4085_v21  ;;  %v8386_v58 = vpop.permute.xlu2 %3944  ;;  %v4095_v34 = vmul.f32 %v6002_v15, %v8244_v6  ;;  %v4102_v42 = vmul.f32 %v8285_v28, %v7999_v48  ;;  %v6004_v15 = vld [vmem:[%s6709_s27 + $0x1c0] sm:$0xff] }
 0x6a8   : > { %v4226_v29 = vrot.slane %v4225_v31, 2  ;;  %v8840_v47 = vrot.slane %v8207_v59, 6  ;;  %v4803_v45 = vunpack.c.l.b16 %v4723_v56  ;;  %v8404_v55 = vunpack.c.l.b16 %v4730_v53 }
 0x6a9   : > { %v4298_v57 = vrot.slane %v4297_v41, 1  ;;  %v4245_v12 = vrot.slane %v4244_v3, 4  ;;  %v8406_v6 = vunpack.c.l.b16 %v4729_v11  ;;  %v4643_v48 = vrot.slane %v8383_v33, 1 }
 0x6aa   : > { %v4688_v7 = vmul.f32 %v8840_v47, %v8116_v24  ;;  %v4853_v43 = vrot.slane %v8388_v60, 6  ;;  %v4636_v21 = vrot.slane %v8391_v10, 1  ;;  %v4637_v9 = vrot.slane %v8391_v10, 2 }
 0x6ab   : > { %v4299_v23 = vadd.f32 %v4298_v57, %v4297_v41  ;;  %v4000_v46 = vpop.permute.xlu1 %3999  ;;  %v4246_v28 = vadd.f32 %v4245_v12, %v4244_v3  ;;  %v4227_v24 = vadd.f32 %v4226_v29, %v4225_v31  ;;  %v4857_v17 = vrot.slane %v8404_v55, 4 }
 0x6ac   : > { %v3975_v13 = vpop.permute.xlu0 %3974  ;;  %v4101_v49 = vmul.f32 %v4000_v46, %v8013_v32  ;;  %v4695_v32 = vmul.f32 %v4633_v25, %v8287_v16  ;;  %v4855_v40 = vrot.slane %v8406_v6, 5  ;;  %v4724_v3 = vpack.c.bf16 %v4688_v7, %v4688_v7 }
 0x6ad   : > { %v8397_v18 = vadd.f32 %v4369_v1, %v4299_v23  ;;  %v4096_v54 = vmul.f32 %v6003_v61, %v3975_v13  ;;  %v4841_v26 = vsel %vm4840_vm15, %v4839_v62, %v4838_v50  ;;  %v4707_v57 = vmul.f32 %v4643_v48, %v8306_v19  ;;  %v6006_v13 = vld [vmem:[%s6709_s27 + $0x140] sm:$0xff] }
 0x6ae   : > { %v4300_v5 = vadd.f32 %v4102_v42, %v4101_v49  ;;  %v4644_v16 = vrot.slane %v8383_v33, 2  ;;  %v4247_v1 = vrot.slane %v4246_v28, 2  ;;  %v4731_v56 = vpack.c.bf16 %v4695_v32, %v4695_v32 }
 0x6af   : > { %v4279_v27 = vadd.f32 %v4096_v54, %v4095_v34  ;;  %v4638_v31 = vrot.slane %v8391_v10, 3  ;;  %v4363_v53 = vrot.slane %v8255_v0, 3  ;;  %v4699_v12 = vmul.f32 %v4636_v21, %v8312_v37  ;;  %v8423_v19 = vpop.permute.xlu2 %3949  ;;  %v6005_v34 = vld [vmem:[%s6709_s27 + $0x148] sm:$0xff] }
 0x6b0   : > { %v4301_v4 = vrot.slane %v4300_v5, 4  ;;  %v4103_v50 = vmul.f32 %v6004_v15, %v8334_v30  ;;  %v4228_v62 = vrot.slane %v4227_v24, 1  ;;  %v4628_v49 = vrot.slane %v8207_v59, 7 }
 0x6b1   : > { %v4280_v41 = vrot.slane %v4279_v27, 4  ;;  %v4804_v61 = vunpack.c.l.b16 %v4724_v3  ;;  %v4743_v54 = vpack.c.bf16 %v4707_v57, %v4707_v57  ;;  %v4248_v47 = vadd.f32 %v4247_v1, %v4246_v28 }
 0x6b2   : > { %v4302_v35 = vadd.f32 %v4301_v4, %v4300_v5  ;;  %v4842_v7 = vrot.slane %v4803_v45, 3  ;;  %v4689_v30 = vmul.f32 %v4628_v49, %v8175_v44  ;;  %v8429_v5 = vunpack.c.l.b16 %v4731_v56 }
 0x6b3   : > { %v4281_v11 = vadd.f32 %v4280_v41, %v4279_v27  ;;  %v3935_v25 = vpop.permute.xlu1 %3934  ;;  %v4735_v27 = vpack.c.bf16 %v4699_v12, %v4699_v12  ;;  %v4845_v21 = vrot.slane %v4804_v61, 2  ;;  %v4229_v4 = vadd.f32 %v4228_v62, %v4227_v24  ;;  %v6007_v24 = vld [vmem:[%s6709_s27 + $0x158] sm:$0xff]  ;;  %v6008_v62 = vld [vmem:[%s6709_s27 + $0x150] sm:$0xff] }
 0x6b4   : > { %v3930_v23 = vpop.permute.xlu0 %3929  ;;  %v4088_v42 = vmul.f32 %v6005_v34, %v3935_v25  ;;  %v4303_v46 = vrot.slane %v4302_v35, 2  ;;  %v4844_v32 = vsel %vm4843_vm0, %v4842_v7, %v4841_v26  ;;  %v4725_v3 = vpack.c.bf16 %v4689_v30, %v4689_v30 }
 0x6b5   : > { %v4087_v29 = vmul.f32 %v6006_v13, %v3930_v23  ;;  %v4282_v48 = vrot.slane %v4281_v11, 2  ;;  %v8432_v28 = vunpack.c.l.b16 %v4743_v54  ;;  %v4249_v45 = vrot.slane %v4248_v47, 1 }
 0x6b6   : > { %v4304_v41 = vadd.f32 %v4303_v46, %v4302_v35  ;;  %v4645_v57 = vrot.slane %v8383_v33, 3  ;;  %v4847_v1 = vsel %vm4846_vm1, %v4845_v21, %v4844_v32  ;;  %v4700_v44 = vmul.f32 %v4637_v9, %v8365_v52 }
 0x6b7   : > { %v4251_v37 = vadd.f32 %v4088_v42, %v4087_v29  ;;  %v4283_v56 = vadd.f32 %v4282_v48, %v4281_v11  ;;  %v4805_v12 = vunpack.c.l.b16 %v4725_v3  ;;  %v8437_v15 = vunpack.c.l.b16 %v4735_v27  ;;  %v4035_v11 = vpop.permute.xlu2 %4034 }
 0x6b8   : > { %v4090_v35 = vmul.f32 %v6007_v24, %v8386_v58  ;;  %v4423_v46 = vadd.f32 %v8255_v0, %v4229_v4  ;;  %v4305_v13 = vrot.slane %v4304_v41, 1  ;;  %v4250_v52 = vadd.f32 %v4249_v45, %v4248_v47  ;;  %v6009_v24 = vld [vmem:[%s6709_s27 + $0x160] sm:$0xff] }
 0x6b9   : > { %v4252_v59 = vrot.slane %v4251_v37, 4  ;;  %v4848_v49 = vrot.slane %v4805_v12, 1  ;;  %v4370_v9 = vrot.slane %v8259_v36, 3  ;;  %v4736_v7 = vpack.c.bf16 %v4700_v44, %v4700_v44  ;;  %v5555_v44 = vld [vmem:[%s6697_s1 + $0x38] sm:$0xff] }
 0x6ba   : > { %v4284_v48 = vrot.slane %v4283_v56, 1  ;;  %v4879_v58 = vrot.slane %v8432_v28, 7  ;;  %v4698_v32 = vmul.f32 %v8391_v10, %v4423_v46  ;;  %v4306_v47 = vadd.f32 %v4305_v13, %v4304_v41  ;;  %5591 = vmatpush.bf16.msra.mxu2 %v5555_v44  ;;  %4945 = vmatpush.bf16.msrb.mxu0 %v5555_v44 }
 0x6bb   : > { %v4253_v25 = vadd.f32 %v4252_v59, %v4251_v37  ;;  %v3940_v23 = vpop.permute.xlu1 %3939  ;;  %v8449_v4 = vsel %vm4849_vm2, %v4848_v49, %v4847_v1  ;;  %v4426_v59 = vadd.f32 %v4363_v53, %v4250_v52  ;;  %v4364_v41 = vrot.slane %v8255_v0, 4 }
 0x6bc   : > { %v4015_v26 = vpop.permute.xlu0 %4014  ;;  %v4089_v34 = vmul.f32 %v6008_v62, %v3940_v23  ;;  %v4285_v23 = vadd.f32 %v4284_v48, %v4283_v56  ;;  %v4734_v53 = vpack.c.bf16 %v4698_v32, %v4698_v32 }
 0x6bd   : > { %v4104_v42 = vmul.f32 %v4015_v26, %v8049_v8  ;;  %v4254_v29 = vrot.slane %v4253_v25, 2  ;;  %v4865_v8 = vrot.slane %v8437_v15, 7  ;;  %v4639_v26 = vrot.slane %v8391_v10, 4 }
 0x6be   : > { %v4258_v61 = vadd.f32 %v4090_v35, %v4089_v34  ;;  %v4091_v35 = vmul.f32 %v6009_v24, %v8423_v19  ;;  %v4434_v34 = vadd.f32 %v4370_v9, %v4306_v47  ;;  %v4701_v13 = vmul.f32 %v4638_v31, %v4426_v59  ;;  %v6010_v24 = vld [vmem:[%s6709_s27 + $0x168] sm:$0xff] }
 0x6bf   : > { %v4307_v54 = vadd.f32 %v4104_v42, %v4103_v50  ;;  %v4255_v37 = vadd.f32 %v4254_v29, %v4253_v25  ;;  %v4708_v50 = vmul.f32 %v4644_v16, %v8397_v18  ;;  %v8457_v25 = vunpack.c.l.b16 %v4736_v7 }
 0x6c0   : > { %v4259_v30 = vrot.slane %v4258_v61, 4  ;;  %v4431_v19 = vadd.f32 %v8259_v36, %v4285_v23  ;;  %v4365_v9 = vrot.slane %v8255_v0, 5  ;;  %v8475_v32 = vunpack.c.l.b16 %v4734_v53 }
 0x6c1   : > { %v4308_v27 = vrot.slane %v4307_v54, 4  ;;  %v4256_v21 = vrot.slane %v4255_v37, 1  ;;  %v4744_v46 = vpack.c.bf16 %v4708_v50, %v4708_v50  ;;  %v4867_v52 = vrot.slane %v8457_v25, 6 }
 0x6c2   : > { %v4260_v3 = vadd.f32 %v4259_v30, %v4258_v61  ;;  %v4640_v61 = vrot.slane %v8391_v10, 5  ;;  %v4646_v30 = vrot.slane %v8383_v33, 4  ;;  %v4706_v59 = vmul.f32 %v8383_v33, %v4431_v19 }
 0x6c3   : > { %v4309_v45 = vadd.f32 %v4308_v27, %v4307_v54  ;;  %v4025_v12 = vpop.permute.xlu1 %4024  ;;  %v4257_v42 = vadd.f32 %v4256_v21, %v4255_v37  ;;  %v4040_v54 = vpop.permute.xlu2 %4039  ;;  %v4709_v37 = vmul.f32 %v4645_v57, %v4434_v34  ;;  %v8477_v47 = vunpack.c.l.b16 %v4744_v46  ;;  %v5554_v46 = vld [vmem:[%s6697_s1 + $0x30] sm:$0xff] }
 0x6c4   : > { %v4020_v1 = vpop.permute.xlu0 %4019  ;;  %v4261_v62 = vrot.slane %v4260_v3, 2  ;;  %v4106_v16 = vmul.f32 %v4025_v12, %v8060_v39  ;;  %v4737_v21 = vpack.c.bf16 %v4701_v13, %v4701_v13  ;;  %v4647_v12 = vrot.slane %v8383_v33, 5  ;;  %5592 = vmatpush.bf16.msra.mxu2 %v5554_v46  ;;  %4946 = vmatpush.bf16.msrb.mxu0 %v5554_v46 }
 0x6c5   : > { %v4310_v18 = vrot.slane %v4309_v45, 2  ;;  %v4105_v56 = vmul.f32 %v4020_v1, %v8149_v14  ;;  %v4371_v14 = vrot.slane %v8259_v36, 4  ;;  %v4427_v31 = vadd.f32 %v4364_v41, %v4257_v42 }
 0x6c6   : > { %v4262_v29 = vadd.f32 %v4261_v62, %v4260_v3  ;;  %v4108_v3 = vmul.f32 %v4035_v11, %v8064_v51  ;;  %v4372_v34 = vrot.slane %v8259_v36, 5  ;;  %v8485_v42 = vunpack.c.l.b16 %v4737_v21 }
 0x6c7   : > { %v4311_v49 = vadd.f32 %v4310_v18, %v4309_v45  ;;  %v4314_v39 = vadd.f32 %v4106_v16, %v4105_v56  ;;  %v4745_v18 = vpack.c.bf16 %v4709_v37, %v4709_v37  ;;  %v4702_v16 = vmul.f32 %v4639_v26, %v4427_v31 }
 0x6c8   : > { %v4263_v7 = vrot.slane %v4262_v29, 1  ;;  %v4742_v13 = vpack.c.bf16 %v4706_v59, %v4706_v59  ;;  %v4881_v26 = vrot.slane %v8477_v47, 6 }
 0x6c9   : > { %v4312_v48 = vrot.slane %v4311_v49, 1  ;;  %v4315_v27 = vrot.slane %v4314_v39, 4 }
 0x6ca   : > { %v4264_v45 = vadd.f32 %v4263_v7, %v4262_v29  ;;  %v4822_v21 = vunpack.c.l.b16 %v4742_v13 }
 0x6cb   : > { %v4313_v50 = vadd.f32 %v4312_v48, %v4311_v49  ;;  %v4316_v44 = vadd.f32 %v4315_v27, %v4314_v39  ;;  %v4030_v23 = vpop.permute.xlu1 %4029  ;;  %v4373_v39 = vrot.slane %v8259_v36, 6  ;;  %v5553_v48 = vld [vmem:[%s6697_s1 + $0x28] sm:$0xff]  ;;  %v3875_v31 = vpop.permute.xlu2 %3874 }
 0x6cc   : > { %v3955_v57 = vpop.permute.xlu0 %3954  ;;  %v4107_v1 = vmul.f32 %v4030_v23, %v8204_v38  ;;  %v4428_v29 = vadd.f32 %v4365_v9, %v4264_v45  ;;  %v8492_v38 = vsel %vm4834_vm13, %v4853_v43, %v8224_v2  ;;  %v6011_v9 = vld [vmem:[%s6709_s27 + $0x1f0] sm:$0xff]  ;;  %v4869_v2 = vrot.slane %v8485_v42, 5  ;;  %5593 = vmatpush.bf16.msra.mxu2 %v5553_v48  ;;  %4947 = vmatpush.bf16.msrb.mxu0 %v5553_v48 }
 0x6cd   : > { %v4435_v41 = vadd.f32 %v4371_v14, %v4313_v50  ;;  %v4092_v62 = vmul.f32 %v6010_v24, %v3955_v57  ;;  %v4317_v53 = vrot.slane %v4316_v44, 2  ;;  %v4738_v14 = vpack.c.bf16 %v4702_v16, %v4702_v16  ;;  %v6012_v57 = vld [vmem:[%s6709_s27 + $0x178] sm:$0xff] }
 0x6ce   : > { %v4321_v11 = vadd.f32 %v4108_v3, %v4107_v1  ;;  %v8500_v37 = vmul.f32 %v6011_v9, %v4040_v54  ;;  %v4703_v50 = vmul.f32 %v4640_v61, %v4428_v29  ;;  %v4366_v3 = vrot.slane %v8255_v0, 6  ;;  %v6013_v1 = vld [vmem:[%s6709_s27 + $0x170] sm:$0xff]  ;;  %v6014_v61 = vld [vmem:[%s6709_s27 + $0xe8] sm:$0xff] }
 0x6cf   : > { %v4710_v51 = vmul.f32 %v4646_v30, %v4435_v41  ;;  %v4265_v56 = vadd.f32 %v4092_v62, %v4091_v35  ;;  %v4318_v49 = vadd.f32 %v4317_v53, %v4316_v44  ;;  %v8497_v35 = vunpack.c.l.b16 %v4745_v18  ;;  %v5552_v62 = vld [vmem:[%s6697_s1 + $0x20] sm:$0xff] }
 0x6d0   : > { %v4322_v19 = vrot.slane %v4321_v11, 4  ;;  %v4818_v16 = vunpack.c.l.b16 %v4738_v14  ;;  %v4076_v53 = vmul.f32 %v6014_v61, %v3875_v31  ;;  %v4641_v29 = vrot.slane %v8391_v10, 6  ;;  %5594 = vmatpush.bf16.msra.mxu2 %v5552_v62  ;;  %4948 = vmatpush.bf16.msrb.mxu0 %v5552_v62 }
 0x6d1   : > { %v4266_v7 = vrot.slane %v4265_v56, 4  ;;  %v4319_v60 = vrot.slane %v4318_v49, 1  ;;  %v4746_v43 = vpack.c.bf16 %v4710_v51, %v4710_v51  ;;  %v4883_v18 = vrot.slane %v8497_v35, 5  ;;  %v5551_v35 = vld [vmem:[%s6697_s1 + $0x18] sm:$0xff] }
 0x6d2   : > { %v4323_v30 = vadd.f32 %v4322_v19, %v4321_v11  ;;  %v4739_v19 = vpack.c.bf16 %v4703_v50, %v4703_v50  ;;  %v4880_v25 = vsel %vm4831_vm4, %v4879_v58, %v4822_v21 }
 0x6d3   : > { %v4267_v27 = vadd.f32 %v4266_v7, %v4265_v56  ;;  %v4320_v59 = vadd.f32 %v4319_v60, %v4318_v49  ;;  %v3965_v45 = vpop.permute.xlu1 %3964  ;;  %v4826_v51 = vunpack.c.l.b16 %v4746_v43  ;;  %v4648_v49 = vrot.slane %v8383_v33, 6 }
 0x6d4   : > { %v3960_v44 = vpop.permute.xlu0 %3959  ;;  %v4324_v23 = vrot.slane %v4323_v30, 2  ;;  %v4094_v41 = vmul.f32 %v6012_v57, %v3965_v45  ;;  %v4819_v60 = vunpack.c.l.b16 %v4739_v19  ;;  %v4871_v43 = vrot.slane %v4818_v16, 4  ;;  %5595 = vmatpush.bf16.msra.mxu2 %v5551_v35  ;;  %4949 = vmatpush.bf16.msrb.mxu0 %v5551_v35 }
 0x6d5   : > { %v4268_v54 = vrot.slane %v4267_v27, 2  ;;  %v4093_v24 = vmul.f32 %v6013_v1, %v3960_v44  ;;  %v4436_v42 = vadd.f32 %v4372_v34, %v4320_v59  ;;  %v4866_v34 = vsel %vm4831_vm4, %v4865_v8, %v8475_v32 }
 0x6d6   : > { %v4325_v11 = vadd.f32 %v4324_v23, %v4323_v30  ;;  %v4873_v8 = vrot.slane %v4819_v60, 3  ;;  %v4882_v28 = vsel %vm4834_vm13, %v4881_v26, %v4880_v25  ;;  %v4885_v58 = vrot.slane %v4826_v51, 4 }
 0x6d7   : > { %v4269_v56 = vadd.f32 %v4268_v54, %v4267_v27  ;;  %v4272_v46 = vadd.f32 %v4094_v41, %v4093_v24  ;;  %v4711_v13 = vmul.f32 %v4647_v12, %v4436_v42  ;;  %v4868_v12 = vsel %vm4834_vm13, %v4867_v52, %v4866_v34  ;;  %v6015_v54 = vld [vmem:[%s6709_s27 + $0xe0] sm:$0xff] }
 0x6d8   : > { %v4326_v7 = vrot.slane %v4325_v11, 1  ;;  %v4870_v50 = vsel %vm4837_vm14, %v4869_v2, %v4868_v12  ;;  %v5550_v41 = vld [vmem:[%s6697_s1 + $0x10] sm:$0xff]  ;;  %v4367_v16 = vrot.slane %v8255_v0, 7  ;;  %v4884_v61 = vsel %vm4837_vm14, %v4883_v18, %v4882_v28 }
 0x6d9   : > { %v4270_v9 = vrot.slane %v4269_v56, 1  ;;  %v4273_v48 = vrot.slane %v4272_v46, 4  ;;  %v4747_v14 = vpack.c.bf16 %v4711_v13, %v4711_v13  ;;  %v4872_v15 = vsel %vm4840_vm15, %v4871_v43, %v4870_v50  ;;  %5596 = vmatpush.bf16.msra.mxu2 %v5550_v41  ;;  %4950 = vmatpush.bf16.msrb.mxu0 %v5550_v41 }
 0x6da   : > { %v4327_v31 = vadd.f32 %v4326_v7, %v4325_v11  ;;  %v4874_v1 = vsel %vm4843_vm0, %v4873_v8, %v4872_v15  ;;  %v4856_v0 = vsel %vm4837_vm14, %v4855_v40, %v8492_v38  ;;  %v6016_v40 = vld [vmem:[%s6709_s27 + $0xf8] sm:$0xff]  ;;  %v4634_v41 = vrot.slane %v8173_v63, 6 }
 0x6db   : > { %v4271_v30 = vadd.f32 %v4270_v9, %v4269_v56  ;;  %v4274_v27 = vadd.f32 %v4273_v48, %v4272_v46  ;;  %v3870_v59 = vpop.permute.xlu1 %3869  ;;  %v4827_v44 = vunpack.c.l.b16 %v4747_v14  ;;  %v5549_v56 = vld [vmem:[%s6697_s1 + $0x8] sm:$0xff]  ;;  %v4642_v9 = vrot.slane %v8391_v10, 7  ;;  %v5548_v14 = vld [vmem:[%s6697_s1] sm:$0xff] }
 0x6dc   : > { %v4045_v45 = vpop.permute.xlu0 %4044  ;;  %v4437_v52 = vadd.f32 %v4373_v39, %v4327_v31  ;;  %v4075_v57 = vmul.f32 %v6015_v54, %v3870_v59  ;;  %v4858_v6 = vsel %vm4840_vm15, %v4857_v17, %v4856_v0 }
 0x6dd   : > { %v4429_v32 = vadd.f32 %v4366_v3, %v4271_v30  ;;  %v4275_v23 = vrot.slane %v4274_v27, 2  ;;  %v4110_v2 = vmul.f32 %v4045_v45, %v8290_v20  ;;  %v4887_v42 = vrot.slane %v4827_v44, 3  ;;  %5597 = vmatpush.bf16.msra.mxu2 %v5549_v56  ;;  %4951 = vmatpush.bf16.msrb.mxu0 %v5549_v56 }
 0x6de   : > { %v4209_v24 = vadd.f32 %v4076_v53, %v4075_v57  ;;  %v4712_v3 = vmul.f32 %v4648_v49, %v4437_v52  ;;  %v4886_v53 = vsel %vm4840_vm15, %v4885_v58, %v4884_v61  ;;  %v4359_v44 = vrot.slane %v8136_v22, 6 }
 0x6df   : > { %v4276_v21 = vadd.f32 %v4275_v23, %v4274_v27  ;;  %v4704_v39 = vmul.f32 %v4641_v29, %v4429_v32  ;;  %v4328_v62 = vadd.f32 %v4110_v2, %v8500_v37  ;;  %v4859_v37 = vrot.slane %v8429_v5, 3  ;;  %v6017_v5 = vld [vmem:[%s6709_s27 + $0xf0] sm:$0xff] }
 0x6e0   : > { %v4210_v20 = vrot.slane %v4209_v24, 4  ;;  %v4748_v46 = vpack.c.bf16 %v4712_v3, %v4712_v3  ;;  %v4888_v48 = vsel %vm4843_vm0, %v4887_v42, %v4886_v53  ;;  %v4374_v52 = vrot.slane %v8259_v36, 7 }
 0x6e1   : > { %v4277_v11 = vrot.slane %v4276_v21, 1  ;;  %v4740_v47 = vpack.c.bf16 %v4704_v39, %v4704_v39  ;;  %v4329_v26 = vrot.slane %v4328_v62, 4  ;;  %v4860_v10 = vsel %vm4843_vm0, %v4859_v37, %v4858_v6  ;;  %5598 = vmatpush.bf16.msra.mxu2 %v5548_v14  ;;  %4952 = vmatpush.bf16.msrb.mxu0 %v5548_v14 }
 0x6e2   : > { %v4211_v51 = vadd.f32 %v4210_v20, %v4209_v24  ;;  %v4828_v29 = vunpack.c.l.b16 %v4748_v46  ;;  %v4360_v36 = vrot.slane %v8136_v22, 7  ;;  %v4635_v46 = vrot.slane %v8173_v63, 7 }
 0x6e3   : > { %v4278_v18 = vadd.f32 %v4277_v11, %v4276_v21  ;;  %v4820_v13 = vunpack.c.l.b16 %v4740_v47  ;;  %v4330_v49 = vadd.f32 %v4329_v26, %v4328_v62  ;;  %v3885_v19 = vpop.permute.xlu1 %3884  ;;  %v4649_v21 = vrot.slane %v8383_v33, 7 }
 0x6e4   : > { %v3880_v7 = vpop.permute.xlu0 %3879  ;;  %v4212_v35 = vrot.slane %v4211_v51, 2  ;;  %v4078_v38 = vmul.f32 %v6016_v40, %v3885_v19  ;;  %v4889_v31 = vrot.slane %v4828_v29, 2  ;;  %v4716_v19 = vld [vmem:[#allocation16 + $0x10] sm:$0xff]  ;;  %v4715_v40 = vld [vmem:[#allocation16 + $0x8] sm:$0xff] }
 0x6e5   : > { %v4077_v34 = vmul.f32 %v6017_v5, %v3880_v7  ;;  %v4430_v60 = vadd.f32 %v4367_v16, %v4278_v18  ;;  %v4331_v12 = vrot.slane %v4330_v49, 2  ;;  %v4875_v43 = vrot.slane %v4820_v13, 2  ;;  %v4714_v7 = vld [vmem:[#allocation16] sm:$0xff] }
 0x6e6   : > { %v4213_v30 = vadd.f32 %v4212_v35, %v4211_v51  ;;  %v4890_v59 = vsel %vm4846_vm1, %v4889_v31, %v4888_v48  ;;  %v4717_v35 = vld [vmem:[#allocation16 + $0x18] sm:$0xff] }
 0x6e7   : > { %v4216_v27 = vadd.f32 %v4078_v38, %v4077_v34  ;;  %v4705_v50 = vmul.f32 %v4642_v9, %v4430_v60  ;;  %v4332_v55 = vadd.f32 %v4331_v12, %v4330_v49  ;;  %v4876_v17 = vsel %vm4846_vm1, %v4875_v43, %v4874_v1 }
 0x6e8   : > { %v4214_v45 = vrot.slane %v4213_v30, 1 }
 0x6e9   : > { %v4217_v15 = vrot.slane %v4216_v27, 4  ;;  %v4741_v8 = vpack.c.bf16 %v4705_v50, %v4705_v50  ;;  %v4333_v25 = vrot.slane %v4332_v55, 1 }
 0x6ea   : > { %v4215_v32 = vadd.f32 %v4214_v45, %v4213_v30 }
 0x6eb   : > { %v4218_v23 = vadd.f32 %v4217_v15, %v4216_v27  ;;  %v4821_v54 = vunpack.c.l.b16 %v4741_v8  ;;  %v4334_v57 = vadd.f32 %v4333_v25, %v4332_v55 }
 0x6ec   : > { %v4421_v2 = vadd.f32 %v4359_v44, %v4215_v32 }
 0x6ed   : > { %v4219_v1 = vrot.slane %v4218_v23, 2  ;;  %v4877_v28 = vrot.slane %v4821_v54, 1  ;;  %v4438_v58 = vadd.f32 %v4374_v52, %v4334_v57 }
 0x6ee   : > { %v4696_v24 = vmul.f32 %v4634_v41, %v4421_v2 }
 0x6ef   : > { %v4220_v39 = vadd.f32 %v4219_v1, %v4218_v23  ;;  %v4878_v3 = vsel %vm4849_vm2, %v4877_v28, %v4876_v17  ;;  %v4713_v62 = vmul.f32 %v4649_v21, %v4438_v58 }
 0x6f0   : > { %v4732_v61 = vpack.c.bf16 %v4696_v24, %v4696_v24 }
 0x6f1   : > { %v4221_v16 = vrot.slane %v4220_v39, 1  ;;  %v4749_v42 = vpack.c.bf16 %v4713_v62, %v4713_v62 }
 0x6f2   : > { %v4812_v20 = vunpack.c.l.b16 %v4732_v61 }
 0x6f3   : > { %v4222_v11 = vadd.f32 %v4221_v16, %v4220_v39  ;;  %v4829_v56 = vunpack.c.l.b16 %v4749_v42 }
 0x6f4   : > { %v4861_v26 = vrot.slane %v4812_v20, 2 }
 0x6f5   : > { %v4422_v47 = vadd.f32 %v4360_v36, %v4222_v11  ;;  %v4891_v53 = vrot.slane %v4829_v56, 1 }
 0x6f6   : > { %v4862_v33 = vsel %vm4846_vm1, %v4861_v26, %v4860_v10 }
 0x6f7   : > { %v4697_v0 = vmul.f32 %v4635_v46, %v4422_v47  ;;  %v4892_v37 = vsel %vm4849_vm2, %v4891_v53, %v4890_v59 }
 0x6f8   : > { %v4894_v18 = vpack.c.b16 %v4892_v37, %v4878_v3 }
 0x6f9   : > { %v4733_v51 = vpack.c.bf16 %v4697_v0, %v4697_v0 }
 0x6fa   : > { %4958 = vmatmul.bf16.vlgmr.msra.gmra.mxu2 %v4894_v18 }
 0x6fb   : > { %v4813_v13 = vunpack.c.l.b16 %v4733_v51 }
 0x6fd   : > { %v4863_v22 = vrot.slane %v4813_v13, 1 }
 0x6ff   : > { %v4864_v29 = vsel %vm4849_vm2, %v4863_v22, %v4862_v33 }
 0x700   : > { %v4893_v49 = vpack.c.b16 %v4864_v29, %v8449_v4 }
 0x702   : > { %4953 = vmatmul.bf16.vlgmr.msrb.gmra.mxu0 %v4893_v49 }
 0x77d   : > { %v4959_v63 = vpop.f32.mrf.mxu2 }
 0x77e   : > { %v4966_v9 = vadd.f32 %v4959_v63, %v4716_v19 }
 0x77f   : > { %v4954_v48 = vpop.f32.mrf.mxu0 }
 0x780   : > { %v4964_v6 = vadd.f32 %v4954_v48, %v4714_v7  ;;  %4970 = vst [vmem:[#allocation16 + $0x10] sm:$0xff] %v4966_v9 }
 0x782   : > { %4968 = vst [vmem:[#allocation16] sm:$0xff] %v4964_v6 }
 0x785   : > { %v4961_v38 = vpop.f32.mrf.mxu2 }
 0x786   : > { %v4967_v5 = vadd.f32 %v4961_v38, %v4717_v35 }
 0x787   : > { %v4956_v34 = vpop.f32.mrf.mxu0 }
 0x788   : > { %v4965_v14 = vadd.f32 %v4956_v34, %v4715_v40  ;;  %4971 = vst [vmem:[#allocation16 + $0x18] sm:$0xff] %v4967_v5 }
 0x78a   : > { %4969 = vst [vmem:[#allocation16 + $0x8] sm:$0xff] %v4965_v14 }
 0x78b PF: > { %s8841_s19 = sld [smem:[#allocation33_spill]]  ;;  %s5006_s28 = sshll.u32 %s6705_s6, 4  ;;  %s5007_s28 = int_to_ptr.vmem [resolvable:$true] %s5006_s28 }
 0x78c   : > { %s8842_s20 = sld [smem:[#allocation45_spill]] }
 0x78d   : > { %s8844_s9 = sld [smem:[#allocation72_spill]] }
 0x791   : > { %s4972_s16 = sand.u32 1, %s8841_s19  }
 0x792   : > { %s5515_s30 = sshll.u32 %s8842_s20, 3  ;;  %s8571_s18 = scalar_lea.sflag [#allocation18], %s4972_s16 }
 0x793   : > { %s5005_s29 = scalar_lea.hbm %s8844_s9, %s5515_s30  ;;  %s6094_s6 = scalar_lea.hbm %s8844_s9, 256 }
 0x794   : > { %s5008_s0 = sshll.u32 %s5005_s29, 4  ;;  %s5009_s0 = int_to_ptr.hbm [resolvable:$true] %s5008_s0 }
 0x795   : > { %s6088_s22 = sshra.s32 %s5009_s0, 4  ;;  %s6089_s22 = int_to_ptr.hbm [resolvable:$true] %s6088_s22 }
 0x796   : > { %s6090_s13 = scalar_lea.hbm %s6089_s22, 128  ;;  %p6095_p5 = scmp.lt.s32.totalorder %s6089_s22, %s8844_s9 }
 0x797   : > { %p6091_p2 = scmp.ne.s32.totalorder %s6089_s22, %s6090_s13  ;;  %p6096_p1 = scmp.lt.s32.totalorder %s6094_s6, %s6090_s13 }
 0x799   : > { %p6092_p13 = pnand %p6091_p2, %p6499_p4  ;;  %p6097_p6 = por %p6096_p1, %p6095_p5 }
 0x79b   : > { %p6093_p3 = pneg %p6092_p13 }
 0x79d   : > { %p6098_p9 = pnand %p6097_p6, %p6093_p3 }
 0x79f   : > { %6101 = shalt.err (!%p6098_p9)
}
 0x7a0   : > { %s6271_s11 = smov 128   ;;  %s8845_s5 = sld [smem:[#allocation44_spill]] }
 0x7a1   : > { %s6272_s23 = smov 256   ;;  %s6273_s15 = smov 8  }
 0x7a2   : > { %5605 = dma.vmem_to_hbm [thread:$0]  (%p6499_p4), %s5007_s28, 2048, %s5009_s0, %s8571_s18, %s6271_s11, %s6272_s23, %s6273_s15  }
 0x7a3   : > { %s8846_s12 = sld [smem:[#allocation71_spill]]  ;;  %s6274_s20 = smov [#allocation16]  }
 0x7a4   : > { %s4987_s16 = sshll.u32 %s6274_s20, 4  ;;  %s8848_s8 = sld [smem:[#allocation73_spill]]  ;;  %s4988_s16 = int_to_ptr.vmem [resolvable:$true] %s4987_s16 }
 0x7a5   : > { %s5023_s28 = sshll.u32 %s6709_s27, 4  ;;  %s5024_s28 = int_to_ptr.vmem [resolvable:$true] %s5023_s28 }
 0x7a6   : > { %s5516_s30 = sshll.u32 %s8845_s5, 3 }
 0x7a9   : > { %s4989_s7 = sshll.u32 %s8846_s12, 4  ;;  %s4990_s7 = int_to_ptr.hbm [resolvable:$true] %s4989_s7 }
 0x7aa   : > { %5604 = dma.vmem_to_hbm [thread:$0]  (%p470_p0), %s4988_s16, 512, %s4990_s7, [#allocation11], %s6271_s11, %s6271_s11, %s6273_s15  }
 0x7ab   : > { %s5022_s29 = scalar_lea.hbm %s8848_s8, %s5516_s30  ;;  %s6150_s6 = scalar_lea.hbm %s8848_s8, 1024 }
 0x7ac   : > { %s5025_s0 = sshll.u32 %s5022_s29, 4  ;;  %s5026_s0 = int_to_ptr.hbm [resolvable:$true] %s5025_s0 }
 0x7ad   : > { %s6144_s22 = sshra.s32 %s5026_s0, 4  ;;  %s6145_s22 = int_to_ptr.hbm [resolvable:$true] %s6144_s22 }
 0x7ae   : > { %s6146_s13 = scalar_lea.hbm %s6145_s22, 512  ;;  %p6151_p2 = scmp.lt.s32.totalorder %s6145_s22, %s8848_s8 }
 0x7af   : > { %p6147_p4 = scmp.ne.s32.totalorder %s6145_s22, %s6146_s13  ;;  %p6152_p13 = scmp.lt.s32.totalorder %s6150_s6, %s6146_s13 }
 0x7b1   : > { %p6148_p12 = pnand %p6147_p4, %p6515_p10  ;;  %p6153_p3 = por %p6152_p13, %p6151_p2 }
 0x7b3   : > { %p6149_p7 = pneg %p6148_p12 }
 0x7b5   : > { %p6154_p5 = pnand %p6153_p3, %p6149_p7 }
 0x7b7   : > { %6157 = shalt.err (!%p6154_p5)
}
 0x7b8   : > { %5606 = dma.vmem_to_hbm [thread:$0]  (%p6515_p10), %s5024_s28, 8192, %s5026_s0, %s8571_s18, %s6271_s11, %s6272_s23, %s6273_s15  }
 0x7b9   : > { %6211 = dma.done.wait (%p470_p0), [#allocation11], 512  }
 0x7ba   : > { %6213 = vsyncadd (%p470_p0), [#allocation11], 4294966784 }
 0x7bb PF: > { %s8849_s27 = sld [smem:[#allocation32_spill]] }
 0x7c1   : > { %p5620_p1 = scmp.ge.s32.totalorder %s8849_s27, 2  ;;  %s8851_s2 = sadd.s32 4294967294, %s8849_s27  }
 0x7c2   : > { %s5045_s14 = sand.u32 1, %s8851_s2  }
 0x7c3   : > { %p5612_p6 = pnand %p5620_p1, %p6506_p8  ;;  %s5046_s12 = scalar_lea.sflag [#allocation18], %s5045_s14 }
 0x7c5   : > { %p5613_p9 = pneg %p5612_p6 }
 0x7c7   : > { %6215 = dma.done.wait (%p5613_p9), %s5046_s12, 2048  }
 0x7c8   : > { %6217 = vsyncadd (%p5613_p9), %s5046_s12, 4294965248  ;;  %p5615_p10 = pnand %p5620_p1, %p6522_p11 }
 0x7ca   : > { %p5616_p4 = pneg %p5615_p10 }
 0x7cc   : > { %6219 = dma.done.wait (%p5616_p4), %s5046_s12, 8192  }
 0x7cd   : > { %6221 = vsyncadd (%p5616_p4), %s5046_s12, 4294959104  ;;  %s36_s28 = sadd.s32 1, %s8849_s27   ;;  %s8853_s18 = sld [smem:[#allocation25_spill]] }
 0x7ce   : > { %p33_p0 = scmp.ge.s32.totalorder %s36_s28, 6   ;;  %s8854_s19 = sld [smem:[#allocation26_spill]] }
 0x7cf   : > { %s8855_s20 = sld [smem:[#allocation37_spill]] }
 0x7d0   : > { %s8856_s21 = sld [smem:[#allocation27_spill]] }
 0x7d1   : > { %s8857_s22 = sld [smem:[#allocation28_spill]] }
 0x7d2   : > { %s8858_s23 = sld [smem:[#allocation36_spill]]  ;;  %35 = sbr.rel (!%p33_p0) target bundleno = 28 (0x1c), region = 340 }
 0x7d3   : > { %s8859_s24 = sld [smem:[#allocation30_spill]] }
 0x7d4   : > { %s8860_s25 = sld [smem:[#allocation31_spill]] }
 0x7d5   : > { %s8861_s26 = sld [smem:[#allocation34_spill]] }
 0x7d6   : > { %s8862_s27 = sld [smem:[#allocation35_spill]] }
 0x7d7   :  { %5062 = vsyncpa [#allocation10], 1 }
 0x7d8   :  { %5064 = vsyncpa [#allocation10 + $0x1], 1 }
 0x7d9   :  { %5065 = vsyncpa [#allocation14], 1 }
 0x7da   :  { %5067 = vsyncpa [#allocation14 + $0x1], 1 }
 0x7db   :  { %5068 = vsyncpa [#allocation11], 1 }
 0x7dc   :  { %5070 = vsyncpa [#allocation11 + $0x1], 1 }
 0x7dd   :  { %5071 = vsyncpa [#allocation18], 1 }
 0x7de   :  { %5073 = vsyncpa [#allocation18 + $0x1], 1 }

</bundles_post_ra>
